<compile_context>
chip_gen: v5e
topology: v5e:2x2
jax: 0.10.0
libtpu: 0.0.40
codegen_flags: <defaults>
</compile_context>

<pallas_src>
import functools
import math

import jax
import jax.numpy as jnp
from jax.experimental import pallas as pl
from jax.experimental.pallas import tpu as pltpu

# ------------------------- config (small synthetic model) -------------------------
HIDDEN = 32          # bert.config.hidden_size == ext d_model
HEADS = 2            # bert attention heads
FF = 64              # bert intermediate size
VOCAB = 64
TYPE_VOCAB = 2
MAX_POS = 64
BERT_LAYERS = 2
EXT_HEADS = 2        # args.ext_heads
EXT_FF = 64          # args.ext_ff_size
EXT_LAYERS = 2       # args.ext_layers
NEG_INF = -1e9

# ----------------------- helpers traced INSIDE Pallas kernels ----------------------


def _layernorm(x, g, b, eps):
    x = x.astype(jnp.float32)
    mu = jnp.mean(x, axis=-1, keepdims=True)
    xc = x - mu
    var = jnp.mean(xc * xc, axis=-1, keepdims=True)
    return xc * jax.lax.rsqrt(var + eps) * g + b


def _gelu(x):
    # tanh approximation (PreSumm's gelu; HF BERT's erf-gelu is numerically close)
    c = math.sqrt(2.0 / math.pi)
    return 0.5 * x * (1.0 + jnp.tanh(c * (x + 0.044715 * x * x * x)))


def _softmax_rows(s):
    s = s - jnp.max(s, axis=-1, keepdims=True)
    p = jnp.exp(s)
    return p * pl.reciprocal(jnp.sum(p, axis=-1, keepdims=True), approx=True)


def _mha(x, bias, wqkv, bqkv, wo, bo, num_heads):
    """Fused-QKV multi-head self-attention for one batch element.

    x:(S,H) bias:(1,S) additive key mask, wqkv:(H,3H) bqkv:(1,3H) wo:(H,H) bo:(1,H).
    """
    _, hidden = x.shape
    dh = hidden // num_heads
    scale = 1.0 / math.sqrt(dh)
    qkv = jnp.dot(x, wqkv, preferred_element_type=jnp.float32) + bqkv       # (S, 3H)
    out = bo                                                                # (1, H)
    for h in range(num_heads):
        q = qkv[:, h * dh:(h + 1) * dh] * scale                             # (S, dh)
        k = qkv[:, hidden + h * dh: hidden + (h + 1) * dh]                  # (S, dh)
        v = qkv[:, 2 * hidden + h * dh: 2 * hidden + (h + 1) * dh]          # (S, dh)
        # q @ k^T without materializing a transpose: contract last axes of both.
        s = jax.lax.dot_general(q, k, (((1,), (1,)), ((), ())),
                                preferred_element_type=jnp.float32) + bias  # (S, S)
        p = _softmax_rows(s)
        ctx = jnp.dot(p, v, preferred_element_type=jnp.float32)             # (S, dh)
        # Accumulate this head's slice of the output projection (avoids a concat).
        out = out + jnp.dot(ctx, wo[h * dh:(h + 1) * dh, :],
                            preferred_element_type=jnp.float32)
    return out


# -------------------------------- fused kernels ------------------------------------


def _bert_stack_kernel(emb_ref, bias_ref, eg_ref, eb_ref,
                       wqkv_ref, bqkv_ref, wo_ref, bo_ref,
                       ln1g_ref, ln1b_ref,
                       win_ref, bin_ref, wout_ref, bout_ref,
                       ln2g_ref, ln2b_ref,
                       o_ref):
    """Entire BERT encoder for one batch element: emb LN + all transformer layers."""
    x = _layernorm(emb_ref[...], eg_ref[...], eb_ref[...], 1e-12)           # (S, H)
    bias = bias_ref[...]                                                    # (1, S)
    for l in range(BERT_LAYERS):
        attn = _mha(x, bias, wqkv_ref[l], bqkv_ref[l], wo_ref[l], bo_ref[l], HEADS)
        x = _layernorm(x + attn, ln1g_ref[l], ln1b_ref[l], 1e-12)
        inter = _gelu(jnp.dot(x, win_ref[l], preferred_element_type=jnp.float32)
                      + bin_ref[l])
        ffn = jnp.dot(inter, wout_ref[l], preferred_element_type=jnp.float32) + bout_ref[l]
        x = _layernorm(x + ffn, ln2g_ref[l], ln2b_ref[l], 1e-12)
    o_ref[...] = x.astype(o_ref.dtype)


def _ext_stack_kernel(sents_ref, mask_ref, bias_ref, pe_ref,
                      alng_ref, alnb_ref,
                      wqkv_ref, bqkv_ref, wo_ref, bo_ref,
                      flng_ref, flnb_ref,
                      w1_ref, b1_ref, w2_ref, b2_ref,
                      glng_ref, glnb_ref, ws_ref, bs_ref,
                      o_ref):
    """Entire ExtTransformerEncoder (PreSumm) for one batch element, incl. score head."""
    mask = mask_ref[...]                                                    # (N, 1)
    x = sents_ref[...] * mask + pe_ref[...]                                 # (N, H)
    bias = bias_ref[...]                                                    # (1, N)
    for l in range(EXT_LAYERS):
        inp = _layernorm(x, alng_ref[l], alnb_ref[l], 1e-6) if l != 0 else x
        ctx = _mha(inp, bias, wqkv_ref[l], bqkv_ref[l], wo_ref[l], bo_ref[l], EXT_HEADS)
        out = ctx + x                                                       # dropout = identity (eval)
        xn = _layernorm(out, flng_ref[l], flnb_ref[l], 1e-6)
        inter = _gelu(jnp.dot(xn, w1_ref[l], preferred_element_type=jnp.float32)
                      + b1_ref[l])
        ffn = jnp.dot(inter, w2_ref[l], preferred_element_type=jnp.float32) + b2_ref[l]
        x = ffn + out
    xn = _layernorm(x, glng_ref[...], glnb_ref[...], 1e-6)
    # Score head Linear(H,1) + sigmoid folded in: row-wise dot + cross-lane sum.
    logit = jnp.sum(xn * ws_ref[...], axis=-1, keepdims=True) + bs_ref[...]  # (N, 1)
    scores = 1.0 / (1.0 + jnp.exp(-logit))   # post-LN logits are bounded; stable
    o_ref[...] = (scores * mask).astype(o_ref.dtype)


# ------------------------------- pallas_call wrappers -------------------------------


def bert_encoder(emb, bias, p):
    b, s, h = emb.shape
    nl = BERT_LAYERS

    def full(shape):
        return pl.BlockSpec(shape, lambda i, _n=len(shape): (0,) * _n)

    return pl.pallas_call(
        _bert_stack_kernel,
        grid=(b,),
        in_specs=[
            pl.BlockSpec((None, s, h), lambda i: (i, 0, 0)),     # emb (per batch)
            pl.BlockSpec((None, 1, s), lambda i: (i, 0, 0)),     # additive key mask
            full((1, h)), full((1, h)),                          # emb LN
            full((nl, h, 3 * h)), full((nl, 1, 3 * h)),          # fused QKV
            full((nl, h, h)), full((nl, 1, h)),                  # attn out proj
            full((nl, 1, h)), full((nl, 1, h)),                  # LN1
            full((nl, h, FF)), full((nl, 1, FF)),                # FFN in
            full((nl, FF, h)), full((nl, 1, h)),                 # FFN out
            full((nl, 1, h)), full((nl, 1, h)),                  # LN2
        ],
        out_specs=pl.BlockSpec((None, s, h), lambda i: (i, 0, 0)),
        out_shape=jax.ShapeDtypeStruct((b, s, h), jnp.float32),
        compiler_params=pltpu.CompilerParams(dimension_semantics=("parallel",)),
    )(emb, bias,
      p["emb_ln_g"], p["emb_ln_b"],
      p["wqkv"], p["bqkv"], p["wo"], p["bo"],
      p["ln1_g"], p["ln1_b"],
      p["w_in"], p["b_in"], p["w_out"], p["b_out"],
      p["ln2_g"], p["ln2_b"])


def ext_encoder(sents, mask3, bias, pe, p):
    b, n, h = sents.shape
    nl = EXT_LAYERS

    def full(shape):
        return pl.BlockSpec(shape, lambda i, _n=len(shape): (0,) * _n)

    return pl.pallas_call(
        _ext_stack_kernel,
        grid=(b,),
        in_specs=[
            pl.BlockSpec((None, n, h), lambda i: (i, 0, 0)),     # sents_vec
            pl.BlockSpec((None, n, 1), lambda i: (i, 0, 0)),     # mask (column)
            pl.BlockSpec((None, 1, n), lambda i: (i, 0, 0)),     # additive key mask
            full((n, h)),                                        # sinusoidal PE
            full((nl, 1, h)), full((nl, 1, h)),                  # pre-attn LN (i != 0)
            full((nl, h, 3 * h)), full((nl, 1, 3 * h)),          # fused QKV
            full((nl, h, h)), full((nl, 1, h)),                  # attn out proj
            full((nl, 1, h)), full((nl, 1, h)),                  # FFN LN
            full((nl, h, EXT_FF)), full((nl, 1, EXT_FF)),        # FFN in
            full((nl, EXT_FF, h)), full((nl, 1, h)),             # FFN out
            full((1, h)), full((1, h)),                          # final LN
            full((1, h)), full((1, 1)),                          # score head
        ],
        out_specs=pl.BlockSpec((None, n, 1), lambda i: (i, 0, 0)),
        out_shape=jax.ShapeDtypeStruct((b, n, 1), jnp.float32),
        compiler_params=pltpu.CompilerParams(dimension_semantics=("parallel",)),
    )(sents, mask3, bias, pe,
      p["ln_g"], p["ln_b"],
      p["wqkv"], p["bqkv"], p["wo"], p["bo"],
      p["ffn_ln_g"], p["ffn_ln_b"],
      p["w1"], p["b1"], p["w2"], p["b2"],
      p["fin_ln_g"], p["fin_ln_b"], p["w_score"], p["b_score"])


# ------------------------------- model glue (plain JAX) -----------------------------


def sinusoidal_pe(n, dim):
    position = jnp.arange(n, dtype=jnp.float32)[:, None]
    div_term = jnp.exp(jnp.arange(0, dim, 2, dtype=jnp.float32)
                       * -(math.log(10000.0) / dim))
    pe = jnp.zeros((n, dim), jnp.float32)
    pe = pe.at[:, 0::2].set(jnp.sin(position * div_term))
    pe = pe.at[:, 1::2].set(jnp.cos(position * div_term))
    return pe


def ext_summarizer_forward(params, src, segs, clss, mask_src, mask_cls):
    bp, ep = params["bert"], params["ext"]
    b, s = src.shape

    # --- Bert(src, segs, mask_src).last_hidden_state ---
    emb = (bp["word_emb"][src]
           + bp["pos_emb"][:s][None, :, :]
           + bp["type_emb"][segs]).astype(jnp.float32)
    bias_src = ((1.0 - mask_src.astype(jnp.float32)) * NEG_INF)[:, None, :]   # (B,1,S)
    top_vec = bert_encoder(emb, bias_src, bp)                                 # (B,S,H)

    # --- sents_vec = top_vec[arange(B)[:,None], clss] * mask_cls[:,:,None] ---
    sents_vec = top_vec[jnp.arange(b)[:, None], clss]                         # (B,NC,H)
    nc = clss.shape[1]
    maskf = mask_cls.astype(jnp.float32)
    bias_cls = ((1.0 - maskf) * NEG_INF)[:, None, :]                          # (B,1,NC)
    pe = sinusoidal_pe(nc, HIDDEN)

    # mask multiply + PE add + ext layers + LN + score head all fused in-kernel
    scores = ext_encoder(sents_vec, maskf[:, :, None], bias_cls, pe, ep)      # (B,NC,1)
    return scores.reshape(b, nc), mask_cls


# --------------------------------- parameters --------------------------------------


def init_params(key):
    keys = iter(jax.random.split(key, 256))

    def nrm(shape, scale=0.02):
        return (jax.random.normal(next(keys), shape) * scale).astype(jnp.float32)

    def ones(shape):
        return jnp.ones(shape, jnp.float32)

    def zeros(shape):
        return jnp.zeros(shape, jnp.float32)

    nl = BERT_LAYERS
    bert = {
        "word_emb": nrm((VOCAB, HIDDEN)),
        "pos_emb": nrm((MAX_POS, HIDDEN)),
        "type_emb": nrm((TYPE_VOCAB, HIDDEN)),
        "emb_ln_g": ones((1, HIDDEN)), "emb_ln_b": zeros((1, HIDDEN)),
        "wqkv": nrm((nl, HIDDEN, 3 * HIDDEN)), "bqkv": zeros((nl, 1, 3 * HIDDEN)),
        "wo": nrm((nl, HIDDEN, HIDDEN)), "bo": zeros((nl, 1, HIDDEN)),
        "ln1_g": ones((nl, 1, HIDDEN)), "ln1_b": zeros((nl, 1, HIDDEN)),
        "w_in": nrm((nl, HIDDEN, FF)), "b_in": zeros((nl, 1, FF)),
        "w_out": nrm((nl, FF, HIDDEN)), "b_out": zeros((nl, 1, HIDDEN)),
        "ln2_g": ones((nl, 1, HIDDEN)), "ln2_b": zeros((nl, 1, HIDDEN)),
    }

    ne = EXT_LAYERS
    ext = {
        "ln_g": ones((ne, 1, HIDDEN)), "ln_b": zeros((ne, 1, HIDDEN)),
        "wqkv": nrm((ne, HIDDEN, 3 * HIDDEN)), "bqkv": zeros((ne, 1, 3 * HIDDEN)),
        "wo": nrm((ne, HIDDEN, HIDDEN)), "bo": zeros((ne, 1, HIDDEN)),
        "ffn_ln_g": ones((ne, 1, HIDDEN)), "ffn_ln_b": zeros((ne, 1, HIDDEN)),
        "w1": nrm((ne, HIDDEN, EXT_FF)), "b1": zeros((ne, 1, EXT_FF)),
        "w2": nrm((ne, EXT_FF, HIDDEN)), "b2": zeros((ne, 1, HIDDEN)),
        "fin_ln_g": ones((1, HIDDEN)), "fin_ln_b": zeros((1, HIDDEN)),
        "w_score": nrm((1, HIDDEN)), "b_score": zeros((1, 1)),
    }
    return {"bert": bert, "ext": ext}


# ------------------------------------ main ------------------------------------------

if __name__ == "__main__":
    B, S, NC = 2, 16, 4

    key = jax.random.PRNGKey(0)
    k_src, k_segs = jax.random.split(key, 2)
    src = jax.random.randint(k_src, (B, S), 0, VOCAB, dtype=jnp.int32)
    segs = jax.random.randint(k_segs, (B, S), 0, TYPE_VOCAB, dtype=jnp.int32)
    clss = jnp.array([[0, 4, 8, 12], [0, 5, 10, 0]], dtype=jnp.int32)
    mask_src = jnp.array([[1.0] * 16, [1.0] * 12 + [0.0] * 4], dtype=jnp.float32)
    mask_cls = jnp.array([[1.0, 1.0, 1.0, 1.0], [1.0, 1.0, 1.0, 0.0]], dtype=jnp.float32)

    params = init_params(jax.random.PRNGKey(42))

    fwd = jax.jit(functools.partial(ext_summarizer_forward, params))
    sent_scores, mask_out = fwd(src, segs, clss, mask_src, mask_cls)
    sent_scores = jax.block_until_ready(sent_scores)

    assert sent_scores.shape == (B, NC)
    assert mask_out.shape == (B, NC)
    assert bool(jnp.all(jnp.isfinite(sent_scores)))
    # masked (padded) sentence must score exactly 0 (scores are multiplied by mask_cls)
    assert float(sent_scores[1, 3]) == 0.0

    print("KERNEL_OK")
</pallas_src>

<mosaic_0001>
module attributes {stable_mosaic.version = 11 : i64} {
  func.func @_bert_stack_kernel(%arg0: i32, %arg1: memref<1x16x32xf32, #tpu.memory_space<vmem>>, %arg2: memref<1x1x16xf32, #tpu.memory_space<vmem>>, %arg3: memref<1x32xf32, #tpu.memory_space<vmem>>, %arg4: memref<1x32xf32, #tpu.memory_space<vmem>>, %arg5: memref<2x32x96xf32, #tpu.memory_space<vmem>>, %arg6: memref<2x1x96xf32, #tpu.memory_space<vmem>>, %arg7: memref<2x32x32xf32, #tpu.memory_space<vmem>>, %arg8: memref<2x1x32xf32, #tpu.memory_space<vmem>>, %arg9: memref<2x1x32xf32, #tpu.memory_space<vmem>>, %arg10: memref<2x1x32xf32, #tpu.memory_space<vmem>>, %arg11: memref<2x32x64xf32, #tpu.memory_space<vmem>>, %arg12: memref<2x1x64xf32, #tpu.memory_space<vmem>>, %arg13: memref<2x64x32xf32, #tpu.memory_space<vmem>>, %arg14: memref<2x1x32xf32, #tpu.memory_space<vmem>>, %arg15: memref<2x1x32xf32, #tpu.memory_space<vmem>>, %arg16: memref<2x1x32xf32, #tpu.memory_space<vmem>>, %arg17: memref<1x16x32xf32, #tpu.memory_space<vmem>>) attributes {dimension_semantics = [#tpu.dimension_semantics<parallel>], iteration_bounds = array<i64: 2>, scalar_prefetch = 0 : i64, scratch_operands = 0 : i64, tpu.core_type = #tpu.core_type<tc>, window_params = [{transform_indices = @transform_0, window_bounds = array<i64: 1, 16, 32>}, {transform_indices = @transform_1, window_bounds = array<i64: 1, 1, 16>}, {pipeline_mode = #tpu.pipeline_mode<synchronous>, transform_indices = @transform_2, window_bounds = array<i64: 1, 32>}, {pipeline_mode = #tpu.pipeline_mode<synchronous>, transform_indices = @transform_3, window_bounds = array<i64: 1, 32>}, {pipeline_mode = #tpu.pipeline_mode<synchronous>, transform_indices = @transform_4, window_bounds = array<i64: 2, 32, 96>}, {pipeline_mode = #tpu.pipeline_mode<synchronous>, transform_indices = @transform_5, window_bounds = array<i64: 2, 1, 96>}, {pipeline_mode = #tpu.pipeline_mode<synchronous>, transform_indices = @transform_6, window_bounds = array<i64: 2, 32, 32>}, {pipeline_mode = #tpu.pipeline_mode<synchronous>, transform_indices = @transform_7, window_bounds = array<i64: 2, 1, 32>}, {pipeline_mode = #tpu.pipeline_mode<synchronous>, transform_indices = @transform_8, window_bounds = array<i64: 2, 1, 32>}, {pipeline_mode = #tpu.pipeline_mode<synchronous>, transform_indices = @transform_9, window_bounds = array<i64: 2, 1, 32>}, {pipeline_mode = #tpu.pipeline_mode<synchronous>, transform_indices = @transform_10, window_bounds = array<i64: 2, 32, 64>}, {pipeline_mode = #tpu.pipeline_mode<synchronous>, transform_indices = @transform_11, window_bounds = array<i64: 2, 1, 64>}, {pipeline_mode = #tpu.pipeline_mode<synchronous>, transform_indices = @transform_12, window_bounds = array<i64: 2, 64, 32>}, {pipeline_mode = #tpu.pipeline_mode<synchronous>, transform_indices = @transform_13, window_bounds = array<i64: 2, 1, 32>}, {pipeline_mode = #tpu.pipeline_mode<synchronous>, transform_indices = @transform_14, window_bounds = array<i64: 2, 1, 32>}, {pipeline_mode = #tpu.pipeline_mode<synchronous>, transform_indices = @transform_15, window_bounds = array<i64: 2, 1, 32>}, {transform_indices = @transform_16, window_bounds = array<i64: 1, 16, 32>}]} {
    %c0 = arith.constant 0 : index
    %c0_0 = arith.constant 0 : index
    %c0_1 = arith.constant 0 : index
    %0 = vector.load %arg1[%c0, %c0_0, %c0_1] : memref<1x16x32xf32, #tpu.memory_space<vmem>>, vector<1x16x32xf32>
    %1 = vector.shape_cast %0 : vector<1x16x32xf32> to vector<16x32xf32>
    %c0_2 = arith.constant 0 : index
    %c0_3 = arith.constant 0 : index
    %2 = vector.load %arg3[%c0_2, %c0_3] : memref<1x32xf32, #tpu.memory_space<vmem>>, vector<1x32xf32>
    %c0_4 = arith.constant 0 : index
    %c0_5 = arith.constant 0 : index
    %3 = vector.load %arg4[%c0_4, %c0_5] : memref<1x32xf32, #tpu.memory_space<vmem>>, vector<1x32xf32>
    %cst = arith.constant dense<0.000000e+00> : vector<16xf32>
    %4 = vector.multi_reduction <add>, %1, %cst [1] : vector<16x32xf32> to vector<16xf32>
    %5 = vector.shape_cast %4 : vector<16xf32> to vector<16x1xf32>
    %cst_6 = arith.constant 3.200000e+01 : f32
    %6 = vector.broadcast %cst_6 : f32 to vector<16x1xf32>
    %7 = arith.divf %5, %6 : vector<16x1xf32>
    %8 = vector.broadcast %7 : vector<16x1xf32> to vector<16x32xf32>
    %9 = arith.subf %1, %8 : vector<16x32xf32>
    %10 = arith.mulf %9, %9 : vector<16x32xf32>
    %cst_7 = arith.constant dense<0.000000e+00> : vector<16xf32>
    %11 = vector.multi_reduction <add>, %10, %cst_7 [1] : vector<16x32xf32> to vector<16xf32>
    %12 = vector.shape_cast %11 : vector<16xf32> to vector<16x1xf32>
    %cst_8 = arith.constant 3.200000e+01 : f32
    %13 = vector.broadcast %cst_8 : f32 to vector<16x1xf32>
    %14 = arith.divf %12, %13 : vector<16x1xf32>
    %cst_9 = arith.constant 9.99999996E-13 : f32
    %15 = vector.broadcast %cst_9 : f32 to vector<16x1xf32>
    %16 = arith.addf %14, %15 : vector<16x1xf32>
    %17 = math.rsqrt %16 : vector<16x1xf32>
    %18 = vector.broadcast %17 : vector<16x1xf32> to vector<16x32xf32>
    %19 = arith.mulf %9, %18 : vector<16x32xf32>
    %20 = vector.broadcast %2 : vector<1x32xf32> to vector<16x32xf32>
    %21 = arith.mulf %19, %20 : vector<16x32xf32>
    %22 = vector.broadcast %3 : vector<1x32xf32> to vector<16x32xf32>
    %23 = arith.addf %21, %22 : vector<16x32xf32>
    %c0_10 = arith.constant 0 : index
    %c0_11 = arith.constant 0 : index
    %c0_12 = arith.constant 0 : index
    %24 = vector.load %arg2[%c0_10, %c0_11, %c0_12] : memref<1x1x16xf32, #tpu.memory_space<vmem>>, vector<1x1x16xf32>
    %25 = vector.shape_cast %24 : vector<1x1x16xf32> to vector<1x16xf32>
    %c0_13 = arith.constant 0 : index
    %c0_14 = arith.constant 0 : index
    %c0_15 = arith.constant 0 : index
    %26 = vector.load %arg5[%c0_13, %c0_14, %c0_15] : memref<2x32x96xf32, #tpu.memory_space<vmem>>, vector<1x32x96xf32>
    %27 = vector.shape_cast %26 : vector<1x32x96xf32> to vector<32x96xf32>
    %c0_16 = arith.constant 0 : index
    %c0_17 = arith.constant 0 : index
    %c0_18 = arith.constant 0 : index
    %28 = vector.load %arg6[%c0_16, %c0_17, %c0_18] : memref<2x1x96xf32, #tpu.memory_space<vmem>>, vector<1x1x96xf32>
    %29 = vector.shape_cast %28 : vector<1x1x96xf32> to vector<1x96xf32>
    %c0_19 = arith.constant 0 : index
    %c0_20 = arith.constant 0 : index
    %c0_21 = arith.constant 0 : index
    %30 = vector.load %arg7[%c0_19, %c0_20, %c0_21] : memref<2x32x32xf32, #tpu.memory_space<vmem>>, vector<1x32x32xf32>
    %31 = vector.shape_cast %30 : vector<1x32x32xf32> to vector<32x32xf32>
    %c0_22 = arith.constant 0 : index
    %c0_23 = arith.constant 0 : index
    %c0_24 = arith.constant 0 : index
    %32 = vector.load %arg8[%c0_22, %c0_23, %c0_24] : memref<2x1x32xf32, #tpu.memory_space<vmem>>, vector<1x1x32xf32>
    %33 = vector.shape_cast %32 : vector<1x1x32xf32> to vector<1x32xf32>
    %cst_25 = arith.constant dense<0.000000e+00> : vector<16x96xf32>
    %34 = tpu.matmul %23, %27, %cst_25 {dimension_numbers = #tpu.dot_dimension_numbers<[1], [0], [0], [1], [0, 0, 1, 1], [], []>} : vector<16x32xf32>, vector<32x96xf32>, vector<16x96xf32> -> vector<16x96xf32>
    %35 = vector.broadcast %29 : vector<1x96xf32> to vector<16x96xf32>
    %36 = arith.addf %34, %35 : vector<16x96xf32>
    %37 = vector.extract_strided_slice %36 {offsets = [0, 0], sizes = [16, 16], strides = [1, 1]} : vector<16x96xf32> to vector<16x16xf32>
    %cst_26 = arith.constant 2.500000e-01 : f32
    %38 = vector.broadcast %cst_26 : f32 to vector<16x16xf32>
    %39 = arith.mulf %37, %38 : vector<16x16xf32>
    %40 = vector.extract_strided_slice %36 {offsets = [0, 32], sizes = [16, 16], strides = [1, 1]} : vector<16x96xf32> to vector<16x16xf32>
    %41 = vector.extract_strided_slice %36 {offsets = [0, 64], sizes = [16, 16], strides = [1, 1]} : vector<16x96xf32> to vector<16x16xf32>
    %cst_27 = arith.constant dense<0.000000e+00> : vector<16x16xf32>
    %42 = tpu.matmul %39, %40, %cst_27 {dimension_numbers = #tpu.dot_dimension_numbers<[1], [1], [0], [0], [0, 0, 1, 0], [], []>} : vector<16x16xf32>, vector<16x16xf32>, vector<16x16xf32> -> vector<16x16xf32>
    %43 = vector.broadcast %25 : vector<1x16xf32> to vector<16x16xf32>
    %44 = arith.addf %42, %43 : vector<16x16xf32>
    %cst_28 = arith.constant dense<0xFF800000> : vector<16xf32>
    %45 = vector.multi_reduction <maximumf>, %44, %cst_28 [1] : vector<16x16xf32> to vector<16xf32>
    %46 = vector.shape_cast %45 : vector<16xf32> to vector<16x1xf32>
    %47 = vector.broadcast %46 : vector<16x1xf32> to vector<16x16xf32>
    %48 = arith.subf %44, %47 : vector<16x16xf32>
    %49 = math.exp %48 : vector<16x16xf32>
    %cst_29 = arith.constant dense<0.000000e+00> : vector<16xf32>
    %50 = vector.multi_reduction <add>, %49, %cst_29 [1] : vector<16x16xf32> to vector<16xf32>
    %51 = vector.shape_cast %50 : vector<16xf32> to vector<16x1xf32>
    %52 = tpu.reciprocal %51 {approx = true} : vector<16x1xf32> -> vector<16x1xf32>
    %53 = vector.broadcast %52 : vector<16x1xf32> to vector<16x16xf32>
    %54 = arith.mulf %49, %53 : vector<16x16xf32>
    %cst_30 = arith.constant dense<0.000000e+00> : vector<16x16xf32>
    %55 = tpu.matmul %54, %41, %cst_30 {dimension_numbers = #tpu.dot_dimension_numbers<[1], [0], [0], [1], [0, 0, 1, 1], [], []>} : vector<16x16xf32>, vector<16x16xf32>, vector<16x16xf32> -> vector<16x16xf32>
    %56 = vector.extract_strided_slice %31 {offsets = [0, 0], sizes = [16, 32], strides = [1, 1]} : vector<32x32xf32> to vector<16x32xf32>
    %cst_31 = arith.constant dense<0.000000e+00> : vector<16x32xf32>
    %57 = tpu.matmul %55, %56, %cst_31 {dimension_numbers = #tpu.dot_dimension_numbers<[1], [0], [0], [1], [0, 0, 1, 1], [], []>} : vector<16x16xf32>, vector<16x32xf32>, vector<16x32xf32> -> vector<16x32xf32>
    %58 = vector.broadcast %33 : vector<1x32xf32> to vector<16x32xf32>
    %59 = arith.addf %58, %57 : vector<16x32xf32>
    %60 = vector.extract_strided_slice %36 {offsets = [0, 16], sizes = [16, 16], strides = [1, 1]} : vector<16x96xf32> to vector<16x16xf32>
    %cst_32 = arith.constant 2.500000e-01 : f32
    %61 = vector.broadcast %cst_32 : f32 to vector<16x16xf32>
    %62 = arith.mulf %60, %61 : vector<16x16xf32>
    %63 = vector.extract_strided_slice %36 {offsets = [0, 48], sizes = [16, 16], strides = [1, 1]} : vector<16x96xf32> to vector<16x16xf32>
    %64 = vector.extract_strided_slice %36 {offsets = [0, 80], sizes = [16, 16], strides = [1, 1]} : vector<16x96xf32> to vector<16x16xf32>
    %cst_33 = arith.constant dense<0.000000e+00> : vector<16x16xf32>
    %65 = tpu.matmul %62, %63, %cst_33 {dimension_numbers = #tpu.dot_dimension_numbers<[1], [1], [0], [0], [0, 0, 1, 0], [], []>} : vector<16x16xf32>, vector<16x16xf32>, vector<16x16xf32> -> vector<16x16xf32>
    %66 = vector.broadcast %25 : vector<1x16xf32> to vector<16x16xf32>
    %67 = arith.addf %65, %66 : vector<16x16xf32>
    %cst_34 = arith.constant dense<0xFF800000> : vector<16xf32>
    %68 = vector.multi_reduction <maximumf>, %67, %cst_34 [1] : vector<16x16xf32> to vector<16xf32>
    %69 = vector.shape_cast %68 : vector<16xf32> to vector<16x1xf32>
    %70 = vector.broadcast %69 : vector<16x1xf32> to vector<16x16xf32>
    %71 = arith.subf %67, %70 : vector<16x16xf32>
    %72 = math.exp %71 : vector<16x16xf32>
    %cst_35 = arith.constant dense<0.000000e+00> : vector<16xf32>
    %73 = vector.multi_reduction <add>, %72, %cst_35 [1] : vector<16x16xf32> to vector<16xf32>
    %74 = vector.shape_cast %73 : vector<16xf32> to vector<16x1xf32>
    %75 = tpu.reciprocal %74 {approx = true} : vector<16x1xf32> -> vector<16x1xf32>
    %76 = vector.broadcast %75 : vector<16x1xf32> to vector<16x16xf32>
    %77 = arith.mulf %72, %76 : vector<16x16xf32>
    %cst_36 = arith.constant dense<0.000000e+00> : vector<16x16xf32>
    %78 = tpu.matmul %77, %64, %cst_36 {dimension_numbers = #tpu.dot_dimension_numbers<[1], [0], [0], [1], [0, 0, 1, 1], [], []>} : vector<16x16xf32>, vector<16x16xf32>, vector<16x16xf32> -> vector<16x16xf32>
    %79 = vector.extract_strided_slice %31 {offsets = [16, 0], sizes = [16, 32], strides = [1, 1]} : vector<32x32xf32> to vector<16x32xf32>
    %cst_37 = arith.constant dense<0.000000e+00> : vector<16x32xf32>
    %80 = tpu.matmul %78, %79, %cst_37 {dimension_numbers = #tpu.dot_dimension_numbers<[1], [0], [0], [1], [0, 0, 1, 1], [], []>} : vector<16x16xf32>, vector<16x32xf32>, vector<16x32xf32> -> vector<16x32xf32>
    %81 = arith.addf %59, %80 : vector<16x32xf32>
    %82 = arith.addf %23, %81 : vector<16x32xf32>
    %c0_38 = arith.constant 0 : index
    %c0_39 = arith.constant 0 : index
    %c0_40 = arith.constant 0 : index
    %83 = vector.load %arg9[%c0_38, %c0_39, %c0_40] : memref<2x1x32xf32, #tpu.memory_space<vmem>>, vector<1x1x32xf32>
    %84 = vector.shape_cast %83 : vector<1x1x32xf32> to vector<1x32xf32>
    %c0_41 = arith.constant 0 : index
    %c0_42 = arith.constant 0 : index
    %c0_43 = arith.constant 0 : index
    %85 = vector.load %arg10[%c0_41, %c0_42, %c0_43] : memref<2x1x32xf32, #tpu.memory_space<vmem>>, vector<1x1x32xf32>
    %86 = vector.shape_cast %85 : vector<1x1x32xf32> to vector<1x32xf32>
    %cst_44 = arith.constant dense<0.000000e+00> : vector<16xf32>
    %87 = vector.multi_reduction <add>, %82, %cst_44 [1] : vector<16x32xf32> to vector<16xf32>
    %88 = vector.shape_cast %87 : vector<16xf32> to vector<16x1xf32>
    %cst_45 = arith.constant 3.200000e+01 : f32
    %89 = vector.broadcast %cst_45 : f32 to vector<16x1xf32>
    %90 = arith.divf %88, %89 : vector<16x1xf32>
    %91 = vector.broadcast %90 : vector<16x1xf32> to vector<16x32xf32>
    %92 = arith.subf %82, %91 : vector<16x32xf32>
    %93 = arith.mulf %92, %92 : vector<16x32xf32>
    %cst_46 = arith.constant dense<0.000000e+00> : vector<16xf32>
    %94 = vector.multi_reduction <add>, %93, %cst_46 [1] : vector<16x32xf32> to vector<16xf32>
    %95 = vector.shape_cast %94 : vector<16xf32> to vector<16x1xf32>
    %cst_47 = arith.constant 3.200000e+01 : f32
    %96 = vector.broadcast %cst_47 : f32 to vector<16x1xf32>
    %97 = arith.divf %95, %96 : vector<16x1xf32>
    %cst_48 = arith.constant 9.99999996E-13 : f32
    %98 = vector.broadcast %cst_48 : f32 to vector<16x1xf32>
    %99 = arith.addf %97, %98 : vector<16x1xf32>
    %100 = math.rsqrt %99 : vector<16x1xf32>
    %101 = vector.broadcast %100 : vector<16x1xf32> to vector<16x32xf32>
    %102 = arith.mulf %92, %101 : vector<16x32xf32>
    %103 = vector.broadcast %84 : vector<1x32xf32> to vector<16x32xf32>
    %104 = arith.mulf %102, %103 : vector<16x32xf32>
    %105 = vector.broadcast %86 : vector<1x32xf32> to vector<16x32xf32>
    %106 = arith.addf %104, %105 : vector<16x32xf32>
    %c0_49 = arith.constant 0 : index
    %c0_50 = arith.constant 0 : index
    %c0_51 = arith.constant 0 : index
    %107 = vector.load %arg11[%c0_49, %c0_50, %c0_51] : memref<2x32x64xf32, #tpu.memory_space<vmem>>, vector<1x32x64xf32>
    %108 = vector.shape_cast %107 : vector<1x32x64xf32> to vector<32x64xf32>
    %cst_52 = arith.constant dense<0.000000e+00> : vector<16x64xf32>
    %109 = tpu.matmul %106, %108, %cst_52 {dimension_numbers = #tpu.dot_dimension_numbers<[1], [0], [0], [1], [0, 0, 1, 1], [], []>} : vector<16x32xf32>, vector<32x64xf32>, vector<16x64xf32> -> vector<16x64xf32>
    %c0_53 = arith.constant 0 : index
    %c0_54 = arith.constant 0 : index
    %c0_55 = arith.constant 0 : index
    %110 = vector.load %arg12[%c0_53, %c0_54, %c0_55] : memref<2x1x64xf32, #tpu.memory_space<vmem>>, vector<1x1x64xf32>
    %111 = vector.shape_cast %110 : vector<1x1x64xf32> to vector<1x64xf32>
    %112 = vector.broadcast %111 : vector<1x64xf32> to vector<16x64xf32>
    %113 = arith.addf %109, %112 : vector<16x64xf32>
    %cst_56 = arith.constant 5.000000e-01 : f32
    %114 = vector.broadcast %cst_56 : f32 to vector<16x64xf32>
    %115 = arith.mulf %114, %113 : vector<16x64xf32>
    %cst_57 = arith.constant 4.471500e-02 : f32
    %116 = vector.broadcast %cst_57 : f32 to vector<16x64xf32>
    %117 = arith.mulf %116, %113 : vector<16x64xf32>
    %118 = arith.mulf %117, %113 : vector<16x64xf32>
    %119 = arith.mulf %118, %113 : vector<16x64xf32>
    %120 = arith.addf %113, %119 : vector<16x64xf32>
    %cst_58 = arith.constant 0.797884583 : f32
    %121 = vector.broadcast %cst_58 : f32 to vector<16x64xf32>
    %122 = arith.mulf %121, %120 : vector<16x64xf32>
    %123 = math.tanh %122 : vector<16x64xf32>
    %cst_59 = arith.constant 1.000000e+00 : f32
    %124 = vector.broadcast %cst_59 : f32 to vector<16x64xf32>
    %125 = arith.addf %124, %123 : vector<16x64xf32>
    %126 = arith.mulf %115, %125 : vector<16x64xf32>
    %c0_60 = arith.constant 0 : index
    %c0_61 = arith.constant 0 : index
    %c0_62 = arith.constant 0 : index
    %127 = vector.load %arg13[%c0_60, %c0_61, %c0_62] : memref<2x64x32xf32, #tpu.memory_space<vmem>>, vector<1x64x32xf32>
    %128 = vector.shape_cast %127 : vector<1x64x32xf32> to vector<64x32xf32>
    %cst_63 = arith.constant dense<0.000000e+00> : vector<16x32xf32>
    %129 = tpu.matmul %126, %128, %cst_63 {dimension_numbers = #tpu.dot_dimension_numbers<[1], [0], [0], [1], [0, 0, 1, 1], [], []>} : vector<16x64xf32>, vector<64x32xf32>, vector<16x32xf32> -> vector<16x32xf32>
    %c0_64 = arith.constant 0 : index
    %c0_65 = arith.constant 0 : index
    %c0_66 = arith.constant 0 : index
    %130 = vector.load %arg14[%c0_64, %c0_65, %c0_66] : memref<2x1x32xf32, #tpu.memory_space<vmem>>, vector<1x1x32xf32>
    %131 = vector.shape_cast %130 : vector<1x1x32xf32> to vector<1x32xf32>
    %132 = vector.broadcast %131 : vector<1x32xf32> to vector<16x32xf32>
    %133 = arith.addf %129, %132 : vector<16x32xf32>
    %134 = arith.addf %106, %133 : vector<16x32xf32>
    %c0_67 = arith.constant 0 : index
    %c0_68 = arith.constant 0 : index
    %c0_69 = arith.constant 0 : index
    %135 = vector.load %arg15[%c0_67, %c0_68, %c0_69] : memref<2x1x32xf32, #tpu.memory_space<vmem>>, vector<1x1x32xf32>
    %136 = vector.shape_cast %135 : vector<1x1x32xf32> to vector<1x32xf32>
    %c0_70 = arith.constant 0 : index
    %c0_71 = arith.constant 0 : index
    %c0_72 = arith.constant 0 : index
    %137 = vector.load %arg16[%c0_70, %c0_71, %c0_72] : memref<2x1x32xf32, #tpu.memory_space<vmem>>, vector<1x1x32xf32>
    %138 = vector.shape_cast %137 : vector<1x1x32xf32> to vector<1x32xf32>
    %cst_73 = arith.constant dense<0.000000e+00> : vector<16xf32>
    %139 = vector.multi_reduction <add>, %134, %cst_73 [1] : vector<16x32xf32> to vector<16xf32>
    %140 = vector.shape_cast %139 : vector<16xf32> to vector<16x1xf32>
    %cst_74 = arith.constant 3.200000e+01 : f32
    %141 = vector.broadcast %cst_74 : f32 to vector<16x1xf32>
    %142 = arith.divf %140, %141 : vector<16x1xf32>
    %143 = vector.broadcast %142 : vector<16x1xf32> to vector<16x32xf32>
    %144 = arith.subf %134, %143 : vector<16x32xf32>
    %145 = arith.mulf %144, %144 : vector<16x32xf32>
    %cst_75 = arith.constant dense<0.000000e+00> : vector<16xf32>
    %146 = vector.multi_reduction <add>, %145, %cst_75 [1] : vector<16x32xf32> to vector<16xf32>
    %147 = vector.shape_cast %146 : vector<16xf32> to vector<16x1xf32>
    %cst_76 = arith.constant 3.200000e+01 : f32
    %148 = vector.broadcast %cst_76 : f32 to vector<16x1xf32>
    %149 = arith.divf %147, %148 : vector<16x1xf32>
    %cst_77 = arith.constant 9.99999996E-13 : f32
    %150 = vector.broadcast %cst_77 : f32 to vector<16x1xf32>
    %151 = arith.addf %149, %150 : vector<16x1xf32>
    %152 = math.rsqrt %151 : vector<16x1xf32>
    %153 = vector.broadcast %152 : vector<16x1xf32> to vector<16x32xf32>
    %154 = arith.mulf %144, %153 : vector<16x32xf32>
    %155 = vector.broadcast %136 : vector<1x32xf32> to vector<16x32xf32>
    %156 = arith.mulf %154, %155 : vector<16x32xf32>
    %157 = vector.broadcast %138 : vector<1x32xf32> to vector<16x32xf32>
    %158 = arith.addf %156, %157 : vector<16x32xf32>
    %c1 = arith.constant 1 : index
    %c0_78 = arith.constant 0 : index
    %c0_79 = arith.constant 0 : index
    %159 = vector.load %arg5[%c1, %c0_78, %c0_79] : memref<2x32x96xf32, #tpu.memory_space<vmem>>, vector<1x32x96xf32>
    %160 = vector.shape_cast %159 : vector<1x32x96xf32> to vector<32x96xf32>
    %c1_80 = arith.constant 1 : index
    %c0_81 = arith.constant 0 : index
    %c0_82 = arith.constant 0 : index
    %161 = vector.load %arg6[%c1_80, %c0_81, %c0_82] : memref<2x1x96xf32, #tpu.memory_space<vmem>>, vector<1x1x96xf32>
    %162 = vector.shape_cast %161 : vector<1x1x96xf32> to vector<1x96xf32>
    %c1_83 = arith.constant 1 : index
    %c0_84 = arith.constant 0 : index
    %c0_85 = arith.constant 0 : index
    %163 = vector.load %arg7[%c1_83, %c0_84, %c0_85] : memref<2x32x32xf32, #tpu.memory_space<vmem>>, vector<1x32x32xf32>
    %164 = vector.shape_cast %163 : vector<1x32x32xf32> to vector<32x32xf32>
    %c1_86 = arith.constant 1 : index
    %c0_87 = arith.constant 0 : index
    %c0_88 = arith.constant 0 : index
    %165 = vector.load %arg8[%c1_86, %c0_87, %c0_88] : memref<2x1x32xf32, #tpu.memory_space<vmem>>, vector<1x1x32xf32>
    %166 = vector.shape_cast %165 : vector<1x1x32xf32> to vector<1x32xf32>
    %cst_89 = arith.constant dense<0.000000e+00> : vector<16x96xf32>
    %167 = tpu.matmul %158, %160, %cst_89 {dimension_numbers = #tpu.dot_dimension_numbers<[1], [0], [0], [1], [0, 0, 1, 1], [], []>} : vector<16x32xf32>, vector<32x96xf32>, vector<16x96xf32> -> vector<16x96xf32>
    %168 = vector.broadcast %162 : vector<1x96xf32> to vector<16x96xf32>
    %169 = arith.addf %167, %168 : vector<16x96xf32>
    %170 = vector.extract_strided_slice %169 {offsets = [0, 0], sizes = [16, 16], strides = [1, 1]} : vector<16x96xf32> to vector<16x16xf32>
    %cst_90 = arith.constant 2.500000e-01 : f32
    %171 = vector.broadcast %cst_90 : f32 to vector<16x16xf32>
    %172 = arith.mulf %170, %171 : vector<16x16xf32>
    %173 = vector.extract_strided_slice %169 {offsets = [0, 32], sizes = [16, 16], strides = [1, 1]} : vector<16x96xf32> to vector<16x16xf32>
    %174 = vector.extract_strided_slice %169 {offsets = [0, 64], sizes = [16, 16], strides = [1, 1]} : vector<16x96xf32> to vector<16x16xf32>
    %cst_91 = arith.constant dense<0.000000e+00> : vector<16x16xf32>
    %175 = tpu.matmul %172, %173, %cst_91 {dimension_numbers = #tpu.dot_dimension_numbers<[1], [1], [0], [0], [0, 0, 1, 0], [], []>} : vector<16x16xf32>, vector<16x16xf32>, vector<16x16xf32> -> vector<16x16xf32>
    %176 = vector.broadcast %25 : vector<1x16xf32> to vector<16x16xf32>
    %177 = arith.addf %175, %176 : vector<16x16xf32>
    %cst_92 = arith.constant dense<0xFF800000> : vector<16xf32>
    %178 = vector.multi_reduction <maximumf>, %177, %cst_92 [1] : vector<16x16xf32> to vector<16xf32>
    %179 = vector.shape_cast %178 : vector<16xf32> to vector<16x1xf32>
    %180 = vector.broadcast %179 : vector<16x1xf32> to vector<16x16xf32>
    %181 = arith.subf %177, %180 : vector<16x16xf32>
    %182 = math.exp %181 : vector<16x16xf32>
    %cst_93 = arith.constant dense<0.000000e+00> : vector<16xf32>
    %183 = vector.multi_reduction <add>, %182, %cst_93 [1] : vector<16x16xf32> to vector<16xf32>
    %184 = vector.shape_cast %183 : vector<16xf32> to vector<16x1xf32>
    %185 = tpu.reciprocal %184 {approx = true} : vector<16x1xf32> -> vector<16x1xf32>
    %186 = vector.broadcast %185 : vector<16x1xf32> to vector<16x16xf32>
    %187 = arith.mulf %182, %186 : vector<16x16xf32>
    %cst_94 = arith.constant dense<0.000000e+00> : vector<16x16xf32>
    %188 = tpu.matmul %187, %174, %cst_94 {dimension_numbers = #tpu.dot_dimension_numbers<[1], [0], [0], [1], [0, 0, 1, 1], [], []>} : vector<16x16xf32>, vector<16x16xf32>, vector<16x16xf32> -> vector<16x16xf32>
    %189 = vector.extract_strided_slice %164 {offsets = [0, 0], sizes = [16, 32], strides = [1, 1]} : vector<32x32xf32> to vector<16x32xf32>
    %cst_95 = arith.constant dense<0.000000e+00> : vector<16x32xf32>
    %190 = tpu.matmul %188, %189, %cst_95 {dimension_numbers = #tpu.dot_dimension_numbers<[1], [0], [0], [1], [0, 0, 1, 1], [], []>} : vector<16x16xf32>, vector<16x32xf32>, vector<16x32xf32> -> vector<16x32xf32>
    %191 = vector.broadcast %166 : vector<1x32xf32> to vector<16x32xf32>
    %192 = arith.addf %191, %190 : vector<16x32xf32>
    %193 = vector.extract_strided_slice %169 {offsets = [0, 16], sizes = [16, 16], strides = [1, 1]} : vector<16x96xf32> to vector<16x16xf32>
    %cst_96 = arith.constant 2.500000e-01 : f32
    %194 = vector.broadcast %cst_96 : f32 to vector<16x16xf32>
    %195 = arith.mulf %193, %194 : vector<16x16xf32>
    %196 = vector.extract_strided_slice %169 {offsets = [0, 48], sizes = [16, 16], strides = [1, 1]} : vector<16x96xf32> to vector<16x16xf32>
    %197 = vector.extract_strided_slice %169 {offsets = [0, 80], sizes = [16, 16], strides = [1, 1]} : vector<16x96xf32> to vector<16x16xf32>
    %cst_97 = arith.constant dense<0.000000e+00> : vector<16x16xf32>
    %198 = tpu.matmul %195, %196, %cst_97 {dimension_numbers = #tpu.dot_dimension_numbers<[1], [1], [0], [0], [0, 0, 1, 0], [], []>} : vector<16x16xf32>, vector<16x16xf32>, vector<16x16xf32> -> vector<16x16xf32>
    %199 = vector.broadcast %25 : vector<1x16xf32> to vector<16x16xf32>
    %200 = arith.addf %198, %199 : vector<16x16xf32>
    %cst_98 = arith.constant dense<0xFF800000> : vector<16xf32>
    %201 = vector.multi_reduction <maximumf>, %200, %cst_98 [1] : vector<16x16xf32> to vector<16xf32>
    %202 = vector.shape_cast %201 : vector<16xf32> to vector<16x1xf32>
    %203 = vector.broadcast %202 : vector<16x1xf32> to vector<16x16xf32>
    %204 = arith.subf %200, %203 : vector<16x16xf32>
    %205 = math.exp %204 : vector<16x16xf32>
    %cst_99 = arith.constant dense<0.000000e+00> : vector<16xf32>
    %206 = vector.multi_reduction <add>, %205, %cst_99 [1] : vector<16x16xf32> to vector<16xf32>
    %207 = vector.shape_cast %206 : vector<16xf32> to vector<16x1xf32>
    %208 = tpu.reciprocal %207 {approx = true} : vector<16x1xf32> -> vector<16x1xf32>
    %209 = vector.broadcast %208 : vector<16x1xf32> to vector<16x16xf32>
    %210 = arith.mulf %205, %209 : vector<16x16xf32>
    %cst_100 = arith.constant dense<0.000000e+00> : vector<16x16xf32>
    %211 = tpu.matmul %210, %197, %cst_100 {dimension_numbers = #tpu.dot_dimension_numbers<[1], [0], [0], [1], [0, 0, 1, 1], [], []>} : vector<16x16xf32>, vector<16x16xf32>, vector<16x16xf32> -> vector<16x16xf32>
    %212 = vector.extract_strided_slice %164 {offsets = [16, 0], sizes = [16, 32], strides = [1, 1]} : vector<32x32xf32> to vector<16x32xf32>
    %cst_101 = arith.constant dense<0.000000e+00> : vector<16x32xf32>
    %213 = tpu.matmul %211, %212, %cst_101 {dimension_numbers = #tpu.dot_dimension_numbers<[1], [0], [0], [1], [0, 0, 1, 1], [], []>} : vector<16x16xf32>, vector<16x32xf32>, vector<16x32xf32> -> vector<16x32xf32>
    %214 = arith.addf %192, %213 : vector<16x32xf32>
    %215 = arith.addf %158, %214 : vector<16x32xf32>
    %c1_102 = arith.constant 1 : index
    %c0_103 = arith.constant 0 : index
    %c0_104 = arith.constant 0 : index
    %216 = vector.load %arg9[%c1_102, %c0_103, %c0_104] : memref<2x1x32xf32, #tpu.memory_space<vmem>>, vector<1x1x32xf32>
    %217 = vector.shape_cast %216 : vector<1x1x32xf32> to vector<1x32xf32>
    %c1_105 = arith.constant 1 : index
    %c0_106 = arith.constant 0 : index
    %c0_107 = arith.constant 0 : index
    %218 = vector.load %arg10[%c1_105, %c0_106, %c0_107] : memref<2x1x32xf32, #tpu.memory_space<vmem>>, vector<1x1x32xf32>
    %219 = vector.shape_cast %218 : vector<1x1x32xf32> to vector<1x32xf32>
    %cst_108 = arith.constant dense<0.000000e+00> : vector<16xf32>
    %220 = vector.multi_reduction <add>, %215, %cst_108 [1] : vector<16x32xf32> to vector<16xf32>
    %221 = vector.shape_cast %220 : vector<16xf32> to vector<16x1xf32>
    %cst_109 = arith.constant 3.200000e+01 : f32
    %222 = vector.broadcast %cst_109 : f32 to vector<16x1xf32>
    %223 = arith.divf %221, %222 : vector<16x1xf32>
    %224 = vector.broadcast %223 : vector<16x1xf32> to vector<16x32xf32>
    %225 = arith.subf %215, %224 : vector<16x32xf32>
    %226 = arith.mulf %225, %225 : vector<16x32xf32>
    %cst_110 = arith.constant dense<0.000000e+00> : vector<16xf32>
    %227 = vector.multi_reduction <add>, %226, %cst_110 [1] : vector<16x32xf32> to vector<16xf32>
    %228 = vector.shape_cast %227 : vector<16xf32> to vector<16x1xf32>
    %cst_111 = arith.constant 3.200000e+01 : f32
    %229 = vector.broadcast %cst_111 : f32 to vector<16x1xf32>
    %230 = arith.divf %228, %229 : vector<16x1xf32>
    %cst_112 = arith.constant 9.99999996E-13 : f32
    %231 = vector.broadcast %cst_112 : f32 to vector<16x1xf32>
    %232 = arith.addf %230, %231 : vector<16x1xf32>
    %233 = math.rsqrt %232 : vector<16x1xf32>
    %234 = vector.broadcast %233 : vector<16x1xf32> to vector<16x32xf32>
    %235 = arith.mulf %225, %234 : vector<16x32xf32>
    %236 = vector.broadcast %217 : vector<1x32xf32> to vector<16x32xf32>
    %237 = arith.mulf %235, %236 : vector<16x32xf32>
    %238 = vector.broadcast %219 : vector<1x32xf32> to vector<16x32xf32>
    %239 = arith.addf %237, %238 : vector<16x32xf32>
    %c1_113 = arith.constant 1 : index
    %c0_114 = arith.constant 0 : index
    %c0_115 = arith.constant 0 : index
    %240 = vector.load %arg11[%c1_113, %c0_114, %c0_115] : memref<2x32x64xf32, #tpu.memory_space<vmem>>, vector<1x32x64xf32>
    %241 = vector.shape_cast %240 : vector<1x32x64xf32> to vector<32x64xf32>
    %cst_116 = arith.constant dense<0.000000e+00> : vector<16x64xf32>
    %242 = tpu.matmul %239, %241, %cst_116 {dimension_numbers = #tpu.dot_dimension_numbers<[1], [0], [0], [1], [0, 0, 1, 1], [], []>} : vector<16x32xf32>, vector<32x64xf32>, vector<16x64xf32> -> vector<16x64xf32>
    %c1_117 = arith.constant 1 : index
    %c0_118 = arith.constant 0 : index
    %c0_119 = arith.constant 0 : index
    %243 = vector.load %arg12[%c1_117, %c0_118, %c0_119] : memref<2x1x64xf32, #tpu.memory_space<vmem>>, vector<1x1x64xf32>
    %244 = vector.shape_cast %243 : vector<1x1x64xf32> to vector<1x64xf32>
    %245 = vector.broadcast %244 : vector<1x64xf32> to vector<16x64xf32>
    %246 = arith.addf %242, %245 : vector<16x64xf32>
    %cst_120 = arith.constant 5.000000e-01 : f32
    %247 = vector.broadcast %cst_120 : f32 to vector<16x64xf32>
    %248 = arith.mulf %247, %246 : vector<16x64xf32>
    %cst_121 = arith.constant 4.471500e-02 : f32
    %249 = vector.broadcast %cst_121 : f32 to vector<16x64xf32>
    %250 = arith.mulf %249, %246 : vector<16x64xf32>
    %251 = arith.mulf %250, %246 : vector<16x64xf32>
    %252 = arith.mulf %251, %246 : vector<16x64xf32>
    %253 = arith.addf %246, %252 : vector<16x64xf32>
    %cst_122 = arith.constant 0.797884583 : f32
    %254 = vector.broadcast %cst_122 : f32 to vector<16x64xf32>
    %255 = arith.mulf %254, %253 : vector<16x64xf32>
    %256 = math.tanh %255 : vector<16x64xf32>
    %cst_123 = arith.constant 1.000000e+00 : f32
    %257 = vector.broadcast %cst_123 : f32 to vector<16x64xf32>
    %258 = arith.addf %257, %256 : vector<16x64xf32>
    %259 = arith.mulf %248, %258 : vector<16x64xf32>
    %c1_124 = arith.constant 1 : index
    %c0_125 = arith.constant 0 : index
    %c0_126 = arith.constant 0 : index
    %260 = vector.load %arg13[%c1_124, %c0_125, %c0_126] : memref<2x64x32xf32, #tpu.memory_space<vmem>>, vector<1x64x32xf32>
    %261 = vector.shape_cast %260 : vector<1x64x32xf32> to vector<64x32xf32>
    %cst_127 = arith.constant dense<0.000000e+00> : vector<16x32xf32>
    %262 = tpu.matmul %259, %261, %cst_127 {dimension_numbers = #tpu.dot_dimension_numbers<[1], [0], [0], [1], [0, 0, 1, 1], [], []>} : vector<16x64xf32>, vector<64x32xf32>, vector<16x32xf32> -> vector<16x32xf32>
    %c1_128 = arith.constant 1 : index
    %c0_129 = arith.constant 0 : index
    %c0_130 = arith.constant 0 : index
    %263 = vector.load %arg14[%c1_128, %c0_129, %c0_130] : memref<2x1x32xf32, #tpu.memory_space<vmem>>, vector<1x1x32xf32>
    %264 = vector.shape_cast %263 : vector<1x1x32xf32> to vector<1x32xf32>
    %265 = vector.broadcast %264 : vector<1x32xf32> to vector<16x32xf32>
    %266 = arith.addf %262, %265 : vector<16x32xf32>
    %267 = arith.addf %239, %266 : vector<16x32xf32>
    %c1_131 = arith.constant 1 : index
    %c0_132 = arith.constant 0 : index
    %c0_133 = arith.constant 0 : index
    %268 = vector.load %arg15[%c1_131, %c0_132, %c0_133] : memref<2x1x32xf32, #tpu.memory_space<vmem>>, vector<1x1x32xf32>
    %269 = vector.shape_cast %268 : vector<1x1x32xf32> to vector<1x32xf32>
    %c1_134 = arith.constant 1 : index
    %c0_135 = arith.constant 0 : index
    %c0_136 = arith.constant 0 : index
    %270 = vector.load %arg16[%c1_134, %c0_135, %c0_136] : memref<2x1x32xf32, #tpu.memory_space<vmem>>, vector<1x1x32xf32>
    %271 = vector.shape_cast %270 : vector<1x1x32xf32> to vector<1x32xf32>
    %cst_137 = arith.constant dense<0.000000e+00> : vector<16xf32>
    %272 = vector.multi_reduction <add>, %267, %cst_137 [1] : vector<16x32xf32> to vector<16xf32>
    %273 = vector.shape_cast %272 : vector<16xf32> to vector<16x1xf32>
    %cst_138 = arith.constant 3.200000e+01 : f32
    %274 = vector.broadcast %cst_138 : f32 to vector<16x1xf32>
    %275 = arith.divf %273, %274 : vector<16x1xf32>
    %276 = vector.broadcast %275 : vector<16x1xf32> to vector<16x32xf32>
    %277 = arith.subf %267, %276 : vector<16x32xf32>
    %278 = arith.mulf %277, %277 : vector<16x32xf32>
    %cst_139 = arith.constant dense<0.000000e+00> : vector<16xf32>
    %279 = vector.multi_reduction <add>, %278, %cst_139 [1] : vector<16x32xf32> to vector<16xf32>
    %280 = vector.shape_cast %279 : vector<16xf32> to vector<16x1xf32>
    %cst_140 = arith.constant 3.200000e+01 : f32
    %281 = vector.broadcast %cst_140 : f32 to vector<16x1xf32>
    %282 = arith.divf %280, %281 : vector<16x1xf32>
    %cst_141 = arith.constant 9.99999996E-13 : f32
    %283 = vector.broadcast %cst_141 : f32 to vector<16x1xf32>
    %284 = arith.addf %282, %283 : vector<16x1xf32>
    %285 = math.rsqrt %284 : vector<16x1xf32>
    %286 = vector.broadcast %285 : vector<16x1xf32> to vector<16x32xf32>
    %287 = arith.mulf %277, %286 : vector<16x32xf32>
    %288 = vector.broadcast %269 : vector<1x32xf32> to vector<16x32xf32>
    %289 = arith.mulf %287, %288 : vector<16x32xf32>
    %290 = vector.broadcast %271 : vector<1x32xf32> to vector<16x32xf32>
    %291 = arith.addf %289, %290 : vector<16x32xf32>
    %c0_142 = arith.constant 0 : index
    %c0_143 = arith.constant 0 : index
    %c0_144 = arith.constant 0 : index
    %292 = vector.load %arg17[%c0_142, %c0_143, %c0_144] : memref<1x16x32xf32, #tpu.memory_space<vmem>>, vector<1x16x32xf32>
    %293 = vector.shape_cast %292 : vector<1x16x32xf32> to vector<16x32xf32>
    %294 = vector.shape_cast %291 : vector<16x32xf32> to vector<1x16x32xf32>
    tpu.vector_store %arg17[%c0_142, %c0_143, %c0_144], %294 {strides = array<i32>} : memref<1x16x32xf32, #tpu.memory_space<vmem>>, vector<1x16x32xf32>,
    return
  }
  func.func @transform_0(%arg0: i32) -> (i32, i32, i32) {
    %c0_i32 = arith.constant 0 : i32
    %c0_i32_0 = arith.constant 0 : i32
    %c0_i32_1 = arith.constant 0 : i32
    return %arg0, %c0_i32, %c0_i32_0 : i32, i32, i32
  }
  func.func @transform_1(%arg0: i32) -> (i32, i32, i32) {
    %c0_i32 = arith.constant 0 : i32
    %c0_i32_0 = arith.constant 0 : i32
    %c0_i32_1 = arith.constant 0 : i32
    return %arg0, %c0_i32, %c0_i32_0 : i32, i32, i32
  }
  func.func @transform_2(%arg0: i32) -> (i32, i32) {
    %c0_i32 = arith.constant 0 : i32
    %c0_i32_0 = arith.constant 0 : i32
    %c0_i32_1 = arith.constant 0 : i32
    return %c0_i32, %c0_i32_0 : i32, i32
  }
  func.func @transform_3(%arg0: i32) -> (i32, i32) {
    %c0_i32 = arith.constant 0 : i32
    %c0_i32_0 = arith.constant 0 : i32
    %c0_i32_1 = arith.constant 0 : i32
    return %c0_i32, %c0_i32_0 : i32, i32
  }
  func.func @transform_4(%arg0: i32) -> (i32, i32, i32) {
    %c0_i32 = arith.constant 0 : i32
    %c0_i32_0 = arith.constant 0 : i32
    %c0_i32_1 = arith.constant 0 : i32
    %c0_i32_2 = arith.constant 0 : i32
    return %c0_i32, %c0_i32_0, %c0_i32_1 : i32, i32, i32
  }
  func.func @transform_5(%arg0: i32) -> (i32, i32, i32) {
    %c0_i32 = arith.constant 0 : i32
    %c0_i32_0 = arith.constant 0 : i32
    %c0_i32_1 = arith.constant 0 : i32
    %c0_i32_2 = arith.constant 0 : i32
    return %c0_i32, %c0_i32_0, %c0_i32_1 : i32, i32, i32
  }
  func.func @transform_6(%arg0: i32) -> (i32, i32, i32) {
    %c0_i32 = arith.constant 0 : i32
    %c0_i32_0 = arith.constant 0 : i32
    %c0_i32_1 = arith.constant 0 : i32
    %c0_i32_2 = arith.constant 0 : i32
    return %c0_i32, %c0_i32_0, %c0_i32_1 : i32, i32, i32
  }
  func.func @transform_7(%arg0: i32) -> (i32, i32, i32) {
    %c0_i32 = arith.constant 0 : i32
    %c0_i32_0 = arith.constant 0 : i32
    %c0_i32_1 = arith.constant 0 : i32
    %c0_i32_2 = arith.constant 0 : i32
    return %c0_i32, %c0_i32_0, %c0_i32_1 : i32, i32, i32
  }
  func.func @transform_8(%arg0: i32) -> (i32, i32, i32) {
    %c0_i32 = arith.constant 0 : i32
    %c0_i32_0 = arith.constant 0 : i32
    %c0_i32_1 = arith.constant 0 : i32
    %c0_i32_2 = arith.constant 0 : i32
    return %c0_i32, %c0_i32_0, %c0_i32_1 : i32, i32, i32
  }
  func.func @transform_9(%arg0: i32) -> (i32, i32, i32) {
    %c0_i32 = arith.constant 0 : i32
    %c0_i32_0 = arith.constant 0 : i32
    %c0_i32_1 = arith.constant 0 : i32
    %c0_i32_2 = arith.constant 0 : i32
    return %c0_i32, %c0_i32_0, %c0_i32_1 : i32, i32, i32
  }
  func.func @transform_10(%arg0: i32) -> (i32, i32, i32) {
    %c0_i32 = arith.constant 0 : i32
    %c0_i32_0 = arith.constant 0 : i32
    %c0_i32_1 = arith.constant 0 : i32
    %c0_i32_2 = arith.constant 0 : i32
    return %c0_i32, %c0_i32_0, %c0_i32_1 : i32, i32, i32
  }
  func.func @transform_11(%arg0: i32) -> (i32, i32, i32) {
    %c0_i32 = arith.constant 0 : i32
    %c0_i32_0 = arith.constant 0 : i32
    %c0_i32_1 = arith.constant 0 : i32
    %c0_i32_2 = arith.constant 0 : i32
    return %c0_i32, %c0_i32_0, %c0_i32_1 : i32, i32, i32
  }
  func.func @transform_12(%arg0: i32) -> (i32, i32, i32) {
    %c0_i32 = arith.constant 0 : i32
    %c0_i32_0 = arith.constant 0 : i32
    %c0_i32_1 = arith.constant 0 : i32
    %c0_i32_2 = arith.constant 0 : i32
    return %c0_i32, %c0_i32_0, %c0_i32_1 : i32, i32, i32
  }
  func.func @transform_13(%arg0: i32) -> (i32, i32, i32) {
    %c0_i32 = arith.constant 0 : i32
    %c0_i32_0 = arith.constant 0 : i32
    %c0_i32_1 = arith.constant 0 : i32
    %c0_i32_2 = arith.constant 0 : i32
    return %c0_i32, %c0_i32_0, %c0_i32_1 : i32, i32, i32
  }
  func.func @transform_14(%arg0: i32) -> (i32, i32, i32) {
    %c0_i32 = arith.constant 0 : i32
    %c0_i32_0 = arith.constant 0 : i32
    %c0_i32_1 = arith.constant 0 : i32
    %c0_i32_2 = arith.constant 0 : i32
    return %c0_i32, %c0_i32_0, %c0_i32_1 : i32, i32, i32
  }
  func.func @transform_15(%arg0: i32) -> (i32, i32, i32) {
    %c0_i32 = arith.constant 0 : i32
    %c0_i32_0 = arith.constant 0 : i32
    %c0_i32_1 = arith.constant 0 : i32
    %c0_i32_2 = arith.constant 0 : i32
    return %c0_i32, %c0_i32_0, %c0_i32_1 : i32, i32, i32
  }
  func.func @transform_16(%arg0: i32) -> (i32, i32, i32) {
    %c0_i32 = arith.constant 0 : i32
    %c0_i32_0 = arith.constant 0 : i32
    %c0_i32_1 = arith.constant 0 : i32
    return %arg0, %c0_i32, %c0_i32_0 : i32, i32, i32
  }
}

module attributes {stable_mosaic.version = 11 : i64} {
  func.func @_ext_stack_kernel(%arg0: i32, %arg1: memref<1x4x32xf32, #tpu.memory_space<vmem>>, %arg2: memref<1x4x1xf32, #tpu.memory_space<vmem>>, %arg3: memref<1x1x4xf32, #tpu.memory_space<vmem>>, %arg4: memref<4x32xf32, #tpu.memory_space<vmem>>, %arg5: memref<2x1x32xf32, #tpu.memory_space<vmem>>, %arg6: memref<2x1x32xf32, #tpu.memory_space<vmem>>, %arg7: memref<2x32x96xf32, #tpu.memory_space<vmem>>, %arg8: memref<2x1x96xf32, #tpu.memory_space<vmem>>, %arg9: memref<2x32x32xf32, #tpu.memory_space<vmem>>, %arg10: memref<2x1x32xf32, #tpu.memory_space<vmem>>, %arg11: memref<2x1x32xf32, #tpu.memory_space<vmem>>, %arg12: memref<2x1x32xf32, #tpu.memory_space<vmem>>, %arg13: memref<2x32x64xf32, #tpu.memory_space<vmem>>, %arg14: memref<2x1x64xf32, #tpu.memory_space<vmem>>, %arg15: memref<2x64x32xf32, #tpu.memory_space<vmem>>, %arg16: memref<2x1x32xf32, #tpu.memory_space<vmem>>, %arg17: memref<1x32xf32, #tpu.memory_space<vmem>>, %arg18: memref<1x32xf32, #tpu.memory_space<vmem>>, %arg19: memref<1x32xf32, #tpu.memory_space<vmem>>, %arg20: memref<1x1xf32, #tpu.memory_space<vmem>>, %arg21: memref<1x4x1xf32, #tpu.memory_space<vmem>>) attributes {dimension_semantics = [#tpu.dimension_semantics<parallel>], iteration_bounds = array<i64: 2>, scalar_prefetch = 0 : i64, scratch_operands = 0 : i64, tpu.core_type = #tpu.core_type<tc>, window_params = [{transform_indices = @transform_0, window_bounds = array<i64: 1, 4, 32>}, {transform_indices = @transform_1, window_bounds = array<i64: 1, 4, 1>}, {transform_indices = @transform_2, window_bounds = array<i64: 1, 1, 4>}, {pipeline_mode = #tpu.pipeline_mode<synchronous>, transform_indices = @transform_3, window_bounds = array<i64: 4, 32>}, {pipeline_mode = #tpu.pipeline_mode<synchronous>, transform_indices = @transform_4, window_bounds = array<i64: 2, 1, 32>}, {pipeline_mode = #tpu.pipeline_mode<synchronous>, transform_indices = @transform_5, window_bounds = array<i64: 2, 1, 32>}, {pipeline_mode = #tpu.pipeline_mode<synchronous>, transform_indices = @transform_6, window_bounds = array<i64: 2, 32, 96>}, {pipeline_mode = #tpu.pipeline_mode<synchronous>, transform_indices = @transform_7, window_bounds = array<i64: 2, 1, 96>}, {pipeline_mode = #tpu.pipeline_mode<synchronous>, transform_indices = @transform_8, window_bounds = array<i64: 2, 32, 32>}, {pipeline_mode = #tpu.pipeline_mode<synchronous>, transform_indices = @transform_9, window_bounds = array<i64: 2, 1, 32>}, {pipeline_mode = #tpu.pipeline_mode<synchronous>, transform_indices = @transform_10, window_bounds = array<i64: 2, 1, 32>}, {pipeline_mode = #tpu.pipeline_mode<synchronous>, transform_indices = @transform_11, window_bounds = array<i64: 2, 1, 32>}, {pipeline_mode = #tpu.pipeline_mode<synchronous>, transform_indices = @transform_12, window_bounds = array<i64: 2, 32, 64>}, {pipeline_mode = #tpu.pipeline_mode<synchronous>, transform_indices = @transform_13, window_bounds = array<i64: 2, 1, 64>}, {pipeline_mode = #tpu.pipeline_mode<synchronous>, transform_indices = @transform_14, window_bounds = array<i64: 2, 64, 32>}, {pipeline_mode = #tpu.pipeline_mode<synchronous>, transform_indices = @transform_15, window_bounds = array<i64: 2, 1, 32>}, {pipeline_mode = #tpu.pipeline_mode<synchronous>, transform_indices = @transform_16, window_bounds = array<i64: 1, 32>}, {pipeline_mode = #tpu.pipeline_mode<synchronous>, transform_indices = @transform_17, window_bounds = array<i64: 1, 32>}, {pipeline_mode = #tpu.pipeline_mode<synchronous>, transform_indices = @transform_18, window_bounds = array<i64: 1, 32>}, {pipeline_mode = #tpu.pipeline_mode<synchronous>, transform_indices = @transform_19, window_bounds = array<i64: 1, 1>}, {transform_indices = @transform_20, window_bounds = array<i64: 1, 4, 1>}]} {
    %c0 = arith.constant 0 : index
    %c0_0 = arith.constant 0 : index
    %c0_1 = arith.constant 0 : index
    %0 = vector.load %arg2[%c0, %c0_0, %c0_1] : memref<1x4x1xf32, #tpu.memory_space<vmem>>, vector<1x4x1xf32>
    %1 = vector.shape_cast %0 : vector<1x4x1xf32> to vector<4x1xf32>
    %c0_2 = arith.constant 0 : index
    %c0_3 = arith.constant 0 : index
    %c0_4 = arith.constant 0 : index
    %2 = vector.load %arg1[%c0_2, %c0_3, %c0_4] : memref<1x4x32xf32, #tpu.memory_space<vmem>>, vector<1x4x32xf32>
    %3 = vector.shape_cast %2 : vector<1x4x32xf32> to vector<4x32xf32>
    %4 = vector.broadcast %1 : vector<4x1xf32> to vector<4x32xf32>
    %5 = arith.mulf %3, %4 : vector<4x32xf32>
    %c0_5 = arith.constant 0 : index
    %c0_6 = arith.constant 0 : index
    %6 = vector.load %arg4[%c0_5, %c0_6] : memref<4x32xf32, #tpu.memory_space<vmem>>, vector<4x32xf32>
    %7 = arith.addf %5, %6 : vector<4x32xf32>
    %c0_7 = arith.constant 0 : index
    %c0_8 = arith.constant 0 : index
    %c0_9 = arith.constant 0 : index
    %8 = vector.load %arg3[%c0_7, %c0_8, %c0_9] : memref<1x1x4xf32, #tpu.memory_space<vmem>>, vector<1x1x4xf32>
    %9 = vector.shape_cast %8 : vector<1x1x4xf32> to vector<1x4xf32>
    %c0_10 = arith.constant 0 : index
    %c0_11 = arith.constant 0 : index
    %c0_12 = arith.constant 0 : index
    %10 = vector.load %arg7[%c0_10, %c0_11, %c0_12] : memref<2x32x96xf32, #tpu.memory_space<vmem>>, vector<1x32x96xf32>
    %11 = vector.shape_cast %10 : vector<1x32x96xf32> to vector<32x96xf32>
    %c0_13 = arith.constant 0 : index
    %c0_14 = arith.constant 0 : index
    %c0_15 = arith.constant 0 : index
    %12 = vector.load %arg8[%c0_13, %c0_14, %c0_15] : memref<2x1x96xf32, #tpu.memory_space<vmem>>, vector<1x1x96xf32>
    %13 = vector.shape_cast %12 : vector<1x1x96xf32> to vector<1x96xf32>
    %c0_16 = arith.constant 0 : index
    %c0_17 = arith.constant 0 : index
    %c0_18 = arith.constant 0 : index
    %14 = vector.load %arg9[%c0_16, %c0_17, %c0_18] : memref<2x32x32xf32, #tpu.memory_space<vmem>>, vector<1x32x32xf32>
    %15 = vector.shape_cast %14 : vector<1x32x32xf32> to vector<32x32xf32>
    %c0_19 = arith.constant 0 : index
    %c0_20 = arith.constant 0 : index
    %c0_21 = arith.constant 0 : index
    %16 = vector.load %arg10[%c0_19, %c0_20, %c0_21] : memref<2x1x32xf32, #tpu.memory_space<vmem>>, vector<1x1x32xf32>
    %17 = vector.shape_cast %16 : vector<1x1x32xf32> to vector<1x32xf32>
    %cst = arith.constant dense<0.000000e+00> : vector<4x96xf32>
    %18 = tpu.matmul %7, %11, %cst {dimension_numbers = #tpu.dot_dimension_numbers<[1], [0], [0], [1], [0, 0, 1, 1], [], []>} : vector<4x32xf32>, vector<32x96xf32>, vector<4x96xf32> -> vector<4x96xf32>
    %19 = vector.broadcast %13 : vector<1x96xf32> to vector<4x96xf32>
    %20 = arith.addf %18, %19 : vector<4x96xf32>
    %21 = vector.extract_strided_slice %20 {offsets = [0, 0], sizes = [4, 16], strides = [1, 1]} : vector<4x96xf32> to vector<4x16xf32>
    %cst_22 = arith.constant 2.500000e-01 : f32
    %22 = vector.broadcast %cst_22 : f32 to vector<4x16xf32>
    %23 = arith.mulf %21, %22 : vector<4x16xf32>
    %24 = vector.extract_strided_slice %20 {offsets = [0, 32], sizes = [4, 16], strides = [1, 1]} : vector<4x96xf32> to vector<4x16xf32>
    %25 = vector.extract_strided_slice %20 {offsets = [0, 64], sizes = [4, 16], strides = [1, 1]} : vector<4x96xf32> to vector<4x16xf32>
    %cst_23 = arith.constant dense<0.000000e+00> : vector<4x4xf32>
    %26 = tpu.matmul %23, %24, %cst_23 {dimension_numbers = #tpu.dot_dimension_numbers<[1], [1], [0], [0], [0, 0, 1, 0], [], []>} : vector<4x16xf32>, vector<4x16xf32>, vector<4x4xf32> -> vector<4x4xf32>
    %27 = vector.broadcast %9 : vector<1x4xf32> to vector<4x4xf32>
    %28 = arith.addf %26, %27 : vector<4x4xf32>
    %cst_24 = arith.constant dense<0xFF800000> : vector<4xf32>
    %29 = vector.multi_reduction <maximumf>, %28, %cst_24 [1] : vector<4x4xf32> to vector<4xf32>
    %30 = vector.shape_cast %29 : vector<4xf32> to vector<4x1xf32>
    %31 = vector.broadcast %30 : vector<4x1xf32> to vector<4x4xf32>
    %32 = arith.subf %28, %31 : vector<4x4xf32>
    %33 = math.exp %32 : vector<4x4xf32>
    %cst_25 = arith.constant dense<0.000000e+00> : vector<4xf32>
    %34 = vector.multi_reduction <add>, %33, %cst_25 [1] : vector<4x4xf32> to vector<4xf32>
    %35 = vector.shape_cast %34 : vector<4xf32> to vector<4x1xf32>
    %36 = tpu.reciprocal %35 {approx = true} : vector<4x1xf32> -> vector<4x1xf32>
    %37 = vector.broadcast %36 : vector<4x1xf32> to vector<4x4xf32>
    %38 = arith.mulf %33, %37 : vector<4x4xf32>
    %cst_26 = arith.constant dense<0.000000e+00> : vector<4x16xf32>
    %39 = tpu.matmul %38, %25, %cst_26 {dimension_numbers = #tpu.dot_dimension_numbers<[1], [0], [0], [1], [0, 0, 1, 1], [], []>} : vector<4x4xf32>, vector<4x16xf32>, vector<4x16xf32> -> vector<4x16xf32>
    %40 = vector.extract_strided_slice %15 {offsets = [0, 0], sizes = [16, 32], strides = [1, 1]} : vector<32x32xf32> to vector<16x32xf32>
    %cst_27 = arith.constant dense<0.000000e+00> : vector<4x32xf32>
    %41 = tpu.matmul %39, %40, %cst_27 {dimension_numbers = #tpu.dot_dimension_numbers<[1], [0], [0], [1], [0, 0, 1, 1], [], []>} : vector<4x16xf32>, vector<16x32xf32>, vector<4x32xf32> -> vector<4x32xf32>
    %42 = vector.broadcast %17 : vector<1x32xf32> to vector<4x32xf32>
    %43 = arith.addf %42, %41 : vector<4x32xf32>
    %44 = vector.extract_strided_slice %20 {offsets = [0, 16], sizes = [4, 16], strides = [1, 1]} : vector<4x96xf32> to vector<4x16xf32>
    %cst_28 = arith.constant 2.500000e-01 : f32
    %45 = vector.broadcast %cst_28 : f32 to vector<4x16xf32>
    %46 = arith.mulf %44, %45 : vector<4x16xf32>
    %47 = vector.extract_strided_slice %20 {offsets = [0, 48], sizes = [4, 16], strides = [1, 1]} : vector<4x96xf32> to vector<4x16xf32>
    %48 = vector.extract_strided_slice %20 {offsets = [0, 80], sizes = [4, 16], strides = [1, 1]} : vector<4x96xf32> to vector<4x16xf32>
    %cst_29 = arith.constant dense<0.000000e+00> : vector<4x4xf32>
    %49 = tpu.matmul %46, %47, %cst_29 {dimension_numbers = #tpu.dot_dimension_numbers<[1], [1], [0], [0], [0, 0, 1, 0], [], []>} : vector<4x16xf32>, vector<4x16xf32>, vector<4x4xf32> -> vector<4x4xf32>
    %50 = vector.broadcast %9 : vector<1x4xf32> to vector<4x4xf32>
    %51 = arith.addf %49, %50 : vector<4x4xf32>
    %cst_30 = arith.constant dense<0xFF800000> : vector<4xf32>
    %52 = vector.multi_reduction <maximumf>, %51, %cst_30 [1] : vector<4x4xf32> to vector<4xf32>
    %53 = vector.shape_cast %52 : vector<4xf32> to vector<4x1xf32>
    %54 = vector.broadcast %53 : vector<4x1xf32> to vector<4x4xf32>
    %55 = arith.subf %51, %54 : vector<4x4xf32>
    %56 = math.exp %55 : vector<4x4xf32>
    %cst_31 = arith.constant dense<0.000000e+00> : vector<4xf32>
    %57 = vector.multi_reduction <add>, %56, %cst_31 [1] : vector<4x4xf32> to vector<4xf32>
    %58 = vector.shape_cast %57 : vector<4xf32> to vector<4x1xf32>
    %59 = tpu.reciprocal %58 {approx = true} : vector<4x1xf32> -> vector<4x1xf32>
    %60 = vector.broadcast %59 : vector<4x1xf32> to vector<4x4xf32>
    %61 = arith.mulf %56, %60 : vector<4x4xf32>
    %cst_32 = arith.constant dense<0.000000e+00> : vector<4x16xf32>
    %62 = tpu.matmul %61, %48, %cst_32 {dimension_numbers = #tpu.dot_dimension_numbers<[1], [0], [0], [1], [0, 0, 1, 1], [], []>} : vector<4x4xf32>, vector<4x16xf32>, vector<4x16xf32> -> vector<4x16xf32>
    %63 = vector.extract_strided_slice %15 {offsets = [16, 0], sizes = [16, 32], strides = [1, 1]} : vector<32x32xf32> to vector<16x32xf32>
    %cst_33 = arith.constant dense<0.000000e+00> : vector<4x32xf32>
    %64 = tpu.matmul %62, %63, %cst_33 {dimension_numbers = #tpu.dot_dimension_numbers<[1], [0], [0], [1], [0, 0, 1, 1], [], []>} : vector<4x16xf32>, vector<16x32xf32>, vector<4x32xf32> -> vector<4x32xf32>
    %65 = arith.addf %43, %64 : vector<4x32xf32>
    %66 = arith.addf %65, %7 : vector<4x32xf32>
    %c0_34 = arith.constant 0 : index
    %c0_35 = arith.constant 0 : index
    %c0_36 = arith.constant 0 : index
    %67 = vector.load %arg11[%c0_34, %c0_35, %c0_36] : memref<2x1x32xf32, #tpu.memory_space<vmem>>, vector<1x1x32xf32>
    %68 = vector.shape_cast %67 : vector<1x1x32xf32> to vector<1x32xf32>
    %c0_37 = arith.constant 0 : index
    %c0_38 = arith.constant 0 : index
    %c0_39 = arith.constant 0 : index
    %69 = vector.load %arg12[%c0_37, %c0_38, %c0_39] : memref<2x1x32xf32, #tpu.memory_space<vmem>>, vector<1x1x32xf32>
    %70 = vector.shape_cast %69 : vector<1x1x32xf32> to vector<1x32xf32>
    %cst_40 = arith.constant dense<0.000000e+00> : vector<4xf32>
    %71 = vector.multi_reduction <add>, %66, %cst_40 [1] : vector<4x32xf32> to vector<4xf32>
    %72 = vector.shape_cast %71 : vector<4xf32> to vector<4x1xf32>
    %cst_41 = arith.constant 3.200000e+01 : f32
    %73 = vector.broadcast %cst_41 : f32 to vector<4x1xf32>
    %74 = arith.divf %72, %73 : vector<4x1xf32>
    %75 = vector.broadcast %74 : vector<4x1xf32> to vector<4x32xf32>
    %76 = arith.subf %66, %75 : vector<4x32xf32>
    %77 = arith.mulf %76, %76 : vector<4x32xf32>
    %cst_42 = arith.constant dense<0.000000e+00> : vector<4xf32>
    %78 = vector.multi_reduction <add>, %77, %cst_42 [1] : vector<4x32xf32> to vector<4xf32>
    %79 = vector.shape_cast %78 : vector<4xf32> to vector<4x1xf32>
    %cst_43 = arith.constant 3.200000e+01 : f32
    %80 = vector.broadcast %cst_43 : f32 to vector<4x1xf32>
    %81 = arith.divf %79, %80 : vector<4x1xf32>
    %cst_44 = arith.constant 9.99999997E-7 : f32
    %82 = vector.broadcast %cst_44 : f32 to vector<4x1xf32>
    %83 = arith.addf %81, %82 : vector<4x1xf32>
    %84 = math.rsqrt %83 : vector<4x1xf32>
    %85 = vector.broadcast %84 : vector<4x1xf32> to vector<4x32xf32>
    %86 = arith.mulf %76, %85 : vector<4x32xf32>
    %87 = vector.broadcast %68 : vector<1x32xf32> to vector<4x32xf32>
    %88 = arith.mulf %86, %87 : vector<4x32xf32>
    %89 = vector.broadcast %70 : vector<1x32xf32> to vector<4x32xf32>
    %90 = arith.addf %88, %89 : vector<4x32xf32>
    %c0_45 = arith.constant 0 : index
    %c0_46 = arith.constant 0 : index
    %c0_47 = arith.constant 0 : index
    %91 = vector.load %arg13[%c0_45, %c0_46, %c0_47] : memref<2x32x64xf32, #tpu.memory_space<vmem>>, vector<1x32x64xf32>
    %92 = vector.shape_cast %91 : vector<1x32x64xf32> to vector<32x64xf32>
    %cst_48 = arith.constant dense<0.000000e+00> : vector<4x64xf32>
    %93 = tpu.matmul %90, %92, %cst_48 {dimension_numbers = #tpu.dot_dimension_numbers<[1], [0], [0], [1], [0, 0, 1, 1], [], []>} : vector<4x32xf32>, vector<32x64xf32>, vector<4x64xf32> -> vector<4x64xf32>
    %c0_49 = arith.constant 0 : index
    %c0_50 = arith.constant 0 : index
    %c0_51 = arith.constant 0 : index
    %94 = vector.load %arg14[%c0_49, %c0_50, %c0_51] : memref<2x1x64xf32, #tpu.memory_space<vmem>>, vector<1x1x64xf32>
    %95 = vector.shape_cast %94 : vector<1x1x64xf32> to vector<1x64xf32>
    %96 = vector.broadcast %95 : vector<1x64xf32> to vector<4x64xf32>
    %97 = arith.addf %93, %96 : vector<4x64xf32>
    %cst_52 = arith.constant 5.000000e-01 : f32
    %98 = vector.broadcast %cst_52 : f32 to vector<4x64xf32>
    %99 = arith.mulf %98, %97 : vector<4x64xf32>
    %cst_53 = arith.constant 4.471500e-02 : f32
    %100 = vector.broadcast %cst_53 : f32 to vector<4x64xf32>
    %101 = arith.mulf %100, %97 : vector<4x64xf32>
    %102 = arith.mulf %101, %97 : vector<4x64xf32>
    %103 = arith.mulf %102, %97 : vector<4x64xf32>
    %104 = arith.addf %97, %103 : vector<4x64xf32>
    %cst_54 = arith.constant 0.797884583 : f32
    %105 = vector.broadcast %cst_54 : f32 to vector<4x64xf32>
    %106 = arith.mulf %105, %104 : vector<4x64xf32>
    %107 = math.tanh %106 : vector<4x64xf32>
    %cst_55 = arith.constant 1.000000e+00 : f32
    %108 = vector.broadcast %cst_55 : f32 to vector<4x64xf32>
    %109 = arith.addf %108, %107 : vector<4x64xf32>
    %110 = arith.mulf %99, %109 : vector<4x64xf32>
    %c0_56 = arith.constant 0 : index
    %c0_57 = arith.constant 0 : index
    %c0_58 = arith.constant 0 : index
    %111 = vector.load %arg15[%c0_56, %c0_57, %c0_58] : memref<2x64x32xf32, #tpu.memory_space<vmem>>, vector<1x64x32xf32>
    %112 = vector.shape_cast %111 : vector<1x64x32xf32> to vector<64x32xf32>
    %cst_59 = arith.constant dense<0.000000e+00> : vector<4x32xf32>
    %113 = tpu.matmul %110, %112, %cst_59 {dimension_numbers = #tpu.dot_dimension_numbers<[1], [0], [0], [1], [0, 0, 1, 1], [], []>} : vector<4x64xf32>, vector<64x32xf32>, vector<4x32xf32> -> vector<4x32xf32>
    %c0_60 = arith.constant 0 : index
    %c0_61 = arith.constant 0 : index
    %c0_62 = arith.constant 0 : index
    %114 = vector.load %arg16[%c0_60, %c0_61, %c0_62] : memref<2x1x32xf32, #tpu.memory_space<vmem>>, vector<1x1x32xf32>
    %115 = vector.shape_cast %114 : vector<1x1x32xf32> to vector<1x32xf32>
    %116 = vector.broadcast %115 : vector<1x32xf32> to vector<4x32xf32>
    %117 = arith.addf %113, %116 : vector<4x32xf32>
    %118 = arith.addf %117, %66 : vector<4x32xf32>
    %c1 = arith.constant 1 : index
    %c0_63 = arith.constant 0 : index
    %c0_64 = arith.constant 0 : index
    %119 = vector.load %arg5[%c1, %c0_63, %c0_64] : memref<2x1x32xf32, #tpu.memory_space<vmem>>, vector<1x1x32xf32>
    %120 = vector.shape_cast %119 : vector<1x1x32xf32> to vector<1x32xf32>
    %c1_65 = arith.constant 1 : index
    %c0_66 = arith.constant 0 : index
    %c0_67 = arith.constant 0 : index
    %121 = vector.load %arg6[%c1_65, %c0_66, %c0_67] : memref<2x1x32xf32, #tpu.memory_space<vmem>>, vector<1x1x32xf32>
    %122 = vector.shape_cast %121 : vector<1x1x32xf32> to vector<1x32xf32>
    %cst_68 = arith.constant dense<0.000000e+00> : vector<4xf32>
    %123 = vector.multi_reduction <add>, %118, %cst_68 [1] : vector<4x32xf32> to vector<4xf32>
    %124 = vector.shape_cast %123 : vector<4xf32> to vector<4x1xf32>
    %cst_69 = arith.constant 3.200000e+01 : f32
    %125 = vector.broadcast %cst_69 : f32 to vector<4x1xf32>
    %126 = arith.divf %124, %125 : vector<4x1xf32>
    %127 = vector.broadcast %126 : vector<4x1xf32> to vector<4x32xf32>
    %128 = arith.subf %118, %127 : vector<4x32xf32>
    %129 = arith.mulf %128, %128 : vector<4x32xf32>
    %cst_70 = arith.constant dense<0.000000e+00> : vector<4xf32>
    %130 = vector.multi_reduction <add>, %129, %cst_70 [1] : vector<4x32xf32> to vector<4xf32>
    %131 = vector.shape_cast %130 : vector<4xf32> to vector<4x1xf32>
    %cst_71 = arith.constant 3.200000e+01 : f32
    %132 = vector.broadcast %cst_71 : f32 to vector<4x1xf32>
    %133 = arith.divf %131, %132 : vector<4x1xf32>
    %cst_72 = arith.constant 9.99999997E-7 : f32
    %134 = vector.broadcast %cst_72 : f32 to vector<4x1xf32>
    %135 = arith.addf %133, %134 : vector<4x1xf32>
    %136 = math.rsqrt %135 : vector<4x1xf32>
    %137 = vector.broadcast %136 : vector<4x1xf32> to vector<4x32xf32>
    %138 = arith.mulf %128, %137 : vector<4x32xf32>
    %139 = vector.broadcast %120 : vector<1x32xf32> to vector<4x32xf32>
    %140 = arith.mulf %138, %139 : vector<4x32xf32>
    %141 = vector.broadcast %122 : vector<1x32xf32> to vector<4x32xf32>
    %142 = arith.addf %140, %141 : vector<4x32xf32>
    %c1_73 = arith.constant 1 : index
    %c0_74 = arith.constant 0 : index
    %c0_75 = arith.constant 0 : index
    %143 = vector.load %arg7[%c1_73, %c0_74, %c0_75] : memref<2x32x96xf32, #tpu.memory_space<vmem>>, vector<1x32x96xf32>
    %144 = vector.shape_cast %143 : vector<1x32x96xf32> to vector<32x96xf32>
    %c1_76 = arith.constant 1 : index
    %c0_77 = arith.constant 0 : index
    %c0_78 = arith.constant 0 : index
    %145 = vector.load %arg8[%c1_76, %c0_77, %c0_78] : memref<2x1x96xf32, #tpu.memory_space<vmem>>, vector<1x1x96xf32>
    %146 = vector.shape_cast %145 : vector<1x1x96xf32> to vector<1x96xf32>
    %c1_79 = arith.constant 1 : index
    %c0_80 = arith.constant 0 : index
    %c0_81 = arith.constant 0 : index
    %147 = vector.load %arg9[%c1_79, %c0_80, %c0_81] : memref<2x32x32xf32, #tpu.memory_space<vmem>>, vector<1x32x32xf32>
    %148 = vector.shape_cast %147 : vector<1x32x32xf32> to vector<32x32xf32>
    %c1_82 = arith.constant 1 : index
    %c0_83 = arith.constant 0 : index
    %c0_84 = arith.constant 0 : index
    %149 = vector.load %arg10[%c1_82, %c0_83, %c0_84] : memref<2x1x32xf32, #tpu.memory_space<vmem>>, vector<1x1x32xf32>
    %150 = vector.shape_cast %149 : vector<1x1x32xf32> to vector<1x32xf32>
    %cst_85 = arith.constant dense<0.000000e+00> : vector<4x96xf32>
    %151 = tpu.matmul %142, %144, %cst_85 {dimension_numbers = #tpu.dot_dimension_numbers<[1], [0], [0], [1], [0, 0, 1, 1], [], []>} : vector<4x32xf32>, vector<32x96xf32>, vector<4x96xf32> -> vector<4x96xf32>
    %152 = vector.broadcast %146 : vector<1x96xf32> to vector<4x96xf32>
    %153 = arith.addf %151, %152 : vector<4x96xf32>
    %154 = vector.extract_strided_slice %153 {offsets = [0, 0], sizes = [4, 16], strides = [1, 1]} : vector<4x96xf32> to vector<4x16xf32>
    %cst_86 = arith.constant 2.500000e-01 : f32
    %155 = vector.broadcast %cst_86 : f32 to vector<4x16xf32>
    %156 = arith.mulf %154, %155 : vector<4x16xf32>
    %157 = vector.extract_strided_slice %153 {offsets = [0, 32], sizes = [4, 16], strides = [1, 1]} : vector<4x96xf32> to vector<4x16xf32>
    %158 = vector.extract_strided_slice %153 {offsets = [0, 64], sizes = [4, 16], strides = [1, 1]} : vector<4x96xf32> to vector<4x16xf32>
    %cst_87 = arith.constant dense<0.000000e+00> : vector<4x4xf32>
    %159 = tpu.matmul %156, %157, %cst_87 {dimension_numbers = #tpu.dot_dimension_numbers<[1], [1], [0], [0], [0, 0, 1, 0], [], []>} : vector<4x16xf32>, vector<4x16xf32>, vector<4x4xf32> -> vector<4x4xf32>
    %160 = vector.broadcast %9 : vector<1x4xf32> to vector<4x4xf32>
    %161 = arith.addf %159, %160 : vector<4x4xf32>
    %cst_88 = arith.constant dense<0xFF800000> : vector<4xf32>
    %162 = vector.multi_reduction <maximumf>, %161, %cst_88 [1] : vector<4x4xf32> to vector<4xf32>
    %163 = vector.shape_cast %162 : vector<4xf32> to vector<4x1xf32>
    %164 = vector.broadcast %163 : vector<4x1xf32> to vector<4x4xf32>
    %165 = arith.subf %161, %164 : vector<4x4xf32>
    %166 = math.exp %165 : vector<4x4xf32>
    %cst_89 = arith.constant dense<0.000000e+00> : vector<4xf32>
    %167 = vector.multi_reduction <add>, %166, %cst_89 [1] : vector<4x4xf32> to vector<4xf32>
    %168 = vector.shape_cast %167 : vector<4xf32> to vector<4x1xf32>
    %169 = tpu.reciprocal %168 {approx = true} : vector<4x1xf32> -> vector<4x1xf32>
    %170 = vector.broadcast %169 : vector<4x1xf32> to vector<4x4xf32>
    %171 = arith.mulf %166, %170 : vector<4x4xf32>
    %cst_90 = arith.constant dense<0.000000e+00> : vector<4x16xf32>
    %172 = tpu.matmul %171, %158, %cst_90 {dimension_numbers = #tpu.dot_dimension_numbers<[1], [0], [0], [1], [0, 0, 1, 1], [], []>} : vector<4x4xf32>, vector<4x16xf32>, vector<4x16xf32> -> vector<4x16xf32>
    %173 = vector.extract_strided_slice %148 {offsets = [0, 0], sizes = [16, 32], strides = [1, 1]} : vector<32x32xf32> to vector<16x32xf32>
    %cst_91 = arith.constant dense<0.000000e+00> : vector<4x32xf32>
    %174 = tpu.matmul %172, %173, %cst_91 {dimension_numbers = #tpu.dot_dimension_numbers<[1], [0], [0], [1], [0, 0, 1, 1], [], []>} : vector<4x16xf32>, vector<16x32xf32>, vector<4x32xf32> -> vector<4x32xf32>
    %175 = vector.broadcast %150 : vector<1x32xf32> to vector<4x32xf32>
    %176 = arith.addf %175, %174 : vector<4x32xf32>
    %177 = vector.extract_strided_slice %153 {offsets = [0, 16], sizes = [4, 16], strides = [1, 1]} : vector<4x96xf32> to vector<4x16xf32>
    %cst_92 = arith.constant 2.500000e-01 : f32
    %178 = vector.broadcast %cst_92 : f32 to vector<4x16xf32>
    %179 = arith.mulf %177, %178 : vector<4x16xf32>
    %180 = vector.extract_strided_slice %153 {offsets = [0, 48], sizes = [4, 16], strides = [1, 1]} : vector<4x96xf32> to vector<4x16xf32>
    %181 = vector.extract_strided_slice %153 {offsets = [0, 80], sizes = [4, 16], strides = [1, 1]} : vector<4x96xf32> to vector<4x16xf32>
    %cst_93 = arith.constant dense<0.000000e+00> : vector<4x4xf32>
    %182 = tpu.matmul %179, %180, %cst_93 {dimension_numbers = #tpu.dot_dimension_numbers<[1], [1], [0], [0], [0, 0, 1, 0], [], []>} : vector<4x16xf32>, vector<4x16xf32>, vector<4x4xf32> -> vector<4x4xf32>
    %183 = vector.broadcast %9 : vector<1x4xf32> to vector<4x4xf32>
    %184 = arith.addf %182, %183 : vector<4x4xf32>
    %cst_94 = arith.constant dense<0xFF800000> : vector<4xf32>
    %185 = vector.multi_reduction <maximumf>, %184, %cst_94 [1] : vector<4x4xf32> to vector<4xf32>
    %186 = vector.shape_cast %185 : vector<4xf32> to vector<4x1xf32>
    %187 = vector.broadcast %186 : vector<4x1xf32> to vector<4x4xf32>
    %188 = arith.subf %184, %187 : vector<4x4xf32>
    %189 = math.exp %188 : vector<4x4xf32>
    %cst_95 = arith.constant dense<0.000000e+00> : vector<4xf32>
    %190 = vector.multi_reduction <add>, %189, %cst_95 [1] : vector<4x4xf32> to vector<4xf32>
    %191 = vector.shape_cast %190 : vector<4xf32> to vector<4x1xf32>
    %192 = tpu.reciprocal %191 {approx = true} : vector<4x1xf32> -> vector<4x1xf32>
    %193 = vector.broadcast %192 : vector<4x1xf32> to vector<4x4xf32>
    %194 = arith.mulf %189, %193 : vector<4x4xf32>
    %cst_96 = arith.constant dense<0.000000e+00> : vector<4x16xf32>
    %195 = tpu.matmul %194, %181, %cst_96 {dimension_numbers = #tpu.dot_dimension_numbers<[1], [0], [0], [1], [0, 0, 1, 1], [], []>} : vector<4x4xf32>, vector<4x16xf32>, vector<4x16xf32> -> vector<4x16xf32>
    %196 = vector.extract_strided_slice %148 {offsets = [16, 0], sizes = [16, 32], strides = [1, 1]} : vector<32x32xf32> to vector<16x32xf32>
    %cst_97 = arith.constant dense<0.000000e+00> : vector<4x32xf32>
    %197 = tpu.matmul %195, %196, %cst_97 {dimension_numbers = #tpu.dot_dimension_numbers<[1], [0], [0], [1], [0, 0, 1, 1], [], []>} : vector<4x16xf32>, vector<16x32xf32>, vector<4x32xf32> -> vector<4x32xf32>
    %198 = arith.addf %176, %197 : vector<4x32xf32>
    %199 = arith.addf %198, %118 : vector<4x32xf32>
    %c1_98 = arith.constant 1 : index
    %c0_99 = arith.constant 0 : index
    %c0_100 = arith.constant 0 : index
    %200 = vector.load %arg11[%c1_98, %c0_99, %c0_100] : memref<2x1x32xf32, #tpu.memory_space<vmem>>, vector<1x1x32xf32>
    %201 = vector.shape_cast %200 : vector<1x1x32xf32> to vector<1x32xf32>
    %c1_101 = arith.constant 1 : index
    %c0_102 = arith.constant 0 : index
    %c0_103 = arith.constant 0 : index
    %202 = vector.load %arg12[%c1_101, %c0_102, %c0_103] : memref<2x1x32xf32, #tpu.memory_space<vmem>>, vector<1x1x32xf32>
    %203 = vector.shape_cast %202 : vector<1x1x32xf32> to vector<1x32xf32>
    %cst_104 = arith.constant dense<0.000000e+00> : vector<4xf32>
    %204 = vector.multi_reduction <add>, %199, %cst_104 [1] : vector<4x32xf32> to vector<4xf32>
    %205 = vector.shape_cast %204 : vector<4xf32> to vector<4x1xf32>
    %cst_105 = arith.constant 3.200000e+01 : f32
    %206 = vector.broadcast %cst_105 : f32 to vector<4x1xf32>
    %207 = arith.divf %205, %206 : vector<4x1xf32>
    %208 = vector.broadcast %207 : vector<4x1xf32> to vector<4x32xf32>
    %209 = arith.subf %199, %208 : vector<4x32xf32>
    %210 = arith.mulf %209, %209 : vector<4x32xf32>
    %cst_106 = arith.constant dense<0.000000e+00> : vector<4xf32>
    %211 = vector.multi_reduction <add>, %210, %cst_106 [1] : vector<4x32xf32> to vector<4xf32>
    %212 = vector.shape_cast %211 : vector<4xf32> to vector<4x1xf32>
    %cst_107 = arith.constant 3.200000e+01 : f32
    %213 = vector.broadcast %cst_107 : f32 to vector<4x1xf32>
    %214 = arith.divf %212, %213 : vector<4x1xf32>
    %cst_108 = arith.constant 9.99999997E-7 : f32
    %215 = vector.broadcast %cst_108 : f32 to vector<4x1xf32>
    %216 = arith.addf %214, %215 : vector<4x1xf32>
    %217 = math.rsqrt %216 : vector<4x1xf32>
    %218 = vector.broadcast %217 : vector<4x1xf32> to vector<4x32xf32>
    %219 = arith.mulf %209, %218 : vector<4x32xf32>
    %220 = vector.broadcast %201 : vector<1x32xf32> to vector<4x32xf32>
    %221 = arith.mulf %219, %220 : vector<4x32xf32>
    %222 = vector.broadcast %203 : vector<1x32xf32> to vector<4x32xf32>
    %223 = arith.addf %221, %222 : vector<4x32xf32>
    %c1_109 = arith.constant 1 : index
    %c0_110 = arith.constant 0 : index
    %c0_111 = arith.constant 0 : index
    %224 = vector.load %arg13[%c1_109, %c0_110, %c0_111] : memref<2x32x64xf32, #tpu.memory_space<vmem>>, vector<1x32x64xf32>
    %225 = vector.shape_cast %224 : vector<1x32x64xf32> to vector<32x64xf32>
    %cst_112 = arith.constant dense<0.000000e+00> : vector<4x64xf32>
    %226 = tpu.matmul %223, %225, %cst_112 {dimension_numbers = #tpu.dot_dimension_numbers<[1], [0], [0], [1], [0, 0, 1, 1], [], []>} : vector<4x32xf32>, vector<32x64xf32>, vector<4x64xf32> -> vector<4x64xf32>
    %c1_113 = arith.constant 1 : index
    %c0_114 = arith.constant 0 : index
    %c0_115 = arith.constant 0 : index
    %227 = vector.load %arg14[%c1_113, %c0_114, %c0_115] : memref<2x1x64xf32, #tpu.memory_space<vmem>>, vector<1x1x64xf32>
    %228 = vector.shape_cast %227 : vector<1x1x64xf32> to vector<1x64xf32>
    %229 = vector.broadcast %228 : vector<1x64xf32> to vector<4x64xf32>
    %230 = arith.addf %226, %229 : vector<4x64xf32>
    %cst_116 = arith.constant 5.000000e-01 : f32
    %231 = vector.broadcast %cst_116 : f32 to vector<4x64xf32>
    %232 = arith.mulf %231, %230 : vector<4x64xf32>
    %cst_117 = arith.constant 4.471500e-02 : f32
    %233 = vector.broadcast %cst_117 : f32 to vector<4x64xf32>
    %234 = arith.mulf %233, %230 : vector<4x64xf32>
    %235 = arith.mulf %234, %230 : vector<4x64xf32>
    %236 = arith.mulf %235, %230 : vector<4x64xf32>
    %237 = arith.addf %230, %236 : vector<4x64xf32>
    %cst_118 = arith.constant 0.797884583 : f32
    %238 = vector.broadcast %cst_118 : f32 to vector<4x64xf32>
    %239 = arith.mulf %238, %237 : vector<4x64xf32>
    %240 = math.tanh %239 : vector<4x64xf32>
    %cst_119 = arith.constant 1.000000e+00 : f32
    %241 = vector.broadcast %cst_119 : f32 to vector<4x64xf32>
    %242 = arith.addf %241, %240 : vector<4x64xf32>
    %243 = arith.mulf %232, %242 : vector<4x64xf32>
    %c1_120 = arith.constant 1 : index
    %c0_121 = arith.constant 0 : index
    %c0_122 = arith.constant 0 : index
    %244 = vector.load %arg15[%c1_120, %c0_121, %c0_122] : memref<2x64x32xf32, #tpu.memory_space<vmem>>, vector<1x64x32xf32>
    %245 = vector.shape_cast %244 : vector<1x64x32xf32> to vector<64x32xf32>
    %cst_123 = arith.constant dense<0.000000e+00> : vector<4x32xf32>
    %246 = tpu.matmul %243, %245, %cst_123 {dimension_numbers = #tpu.dot_dimension_numbers<[1], [0], [0], [1], [0, 0, 1, 1], [], []>} : vector<4x64xf32>, vector<64x32xf32>, vector<4x32xf32> -> vector<4x32xf32>
    %c1_124 = arith.constant 1 : index
    %c0_125 = arith.constant 0 : index
    %c0_126 = arith.constant 0 : index
    %247 = vector.load %arg16[%c1_124, %c0_125, %c0_126] : memref<2x1x32xf32, #tpu.memory_space<vmem>>, vector<1x1x32xf32>
    %248 = vector.shape_cast %247 : vector<1x1x32xf32> to vector<1x32xf32>
    %249 = vector.broadcast %248 : vector<1x32xf32> to vector<4x32xf32>
    %250 = arith.addf %246, %249 : vector<4x32xf32>
    %251 = arith.addf %250, %199 : vector<4x32xf32>
    %c0_127 = arith.constant 0 : index
    %c0_128 = arith.constant 0 : index
    %252 = vector.load %arg17[%c0_127, %c0_128] : memref<1x32xf32, #tpu.memory_space<vmem>>, vector<1x32xf32>
    %c0_129 = arith.constant 0 : index
    %c0_130 = arith.constant 0 : index
    %253 = vector.load %arg18[%c0_129, %c0_130] : memref<1x32xf32, #tpu.memory_space<vmem>>, vector<1x32xf32>
    %cst_131 = arith.constant dense<0.000000e+00> : vector<4xf32>
    %254 = vector.multi_reduction <add>, %251, %cst_131 [1] : vector<4x32xf32> to vector<4xf32>
    %255 = vector.shape_cast %254 : vector<4xf32> to vector<4x1xf32>
    %cst_132 = arith.constant 3.200000e+01 : f32
    %256 = vector.broadcast %cst_132 : f32 to vector<4x1xf32>
    %257 = arith.divf %255, %256 : vector<4x1xf32>
    %258 = vector.broadcast %257 : vector<4x1xf32> to vector<4x32xf32>
    %259 = arith.subf %251, %258 : vector<4x32xf32>
    %260 = arith.mulf %259, %259 : vector<4x32xf32>
    %cst_133 = arith.constant dense<0.000000e+00> : vector<4xf32>
    %261 = vector.multi_reduction <add>, %260, %cst_133 [1] : vector<4x32xf32> to vector<4xf32>
    %262 = vector.shape_cast %261 : vector<4xf32> to vector<4x1xf32>
    %cst_134 = arith.constant 3.200000e+01 : f32
    %263 = vector.broadcast %cst_134 : f32 to vector<4x1xf32>
    %264 = arith.divf %262, %263 : vector<4x1xf32>
    %cst_135 = arith.constant 9.99999997E-7 : f32
    %265 = vector.broadcast %cst_135 : f32 to vector<4x1xf32>
    %266 = arith.addf %264, %265 : vector<4x1xf32>
    %267 = math.rsqrt %266 : vector<4x1xf32>
    %268 = vector.broadcast %267 : vector<4x1xf32> to vector<4x32xf32>
    %269 = arith.mulf %259, %268 : vector<4x32xf32>
    %270 = vector.broadcast %252 : vector<1x32xf32> to vector<4x32xf32>
    %271 = arith.mulf %269, %270 : vector<4x32xf32>
    %272 = vector.broadcast %253 : vector<1x32xf32> to vector<4x32xf32>
    %273 = arith.addf %271, %272 : vector<4x32xf32>
    %c0_136 = arith.constant 0 : index
    %c0_137 = arith.constant 0 : index
    %274 = vector.load %arg19[%c0_136, %c0_137] : memref<1x32xf32, #tpu.memory_space<vmem>>, vector<1x32xf32>
    %275 = vector.broadcast %274 : vector<1x32xf32> to vector<4x32xf32>
    %276 = arith.mulf %273, %275 : vector<4x32xf32>
    %cst_138 = arith.constant dense<0.000000e+00> : vector<4xf32>
    %277 = vector.multi_reduction <add>, %276, %cst_138 [1] : vector<4x32xf32> to vector<4xf32>
    %278 = vector.shape_cast %277 : vector<4xf32> to vector<4x1xf32>
    %c0_139 = arith.constant 0 : index
    %c0_140 = arith.constant 0 : index
    %279 = vector.load %arg20[%c0_139, %c0_140] : memref<1x1xf32, #tpu.memory_space<vmem>>, vector<1x1xf32>
    %280 = vector.broadcast %279 : vector<1x1xf32> to vector<4x1xf32>
    %281 = arith.addf %278, %280 : vector<4x1xf32>
    %cst_141 = arith.constant 0.000000e+00 : f32
    %282 = vector.broadcast %cst_141 : f32 to vector<4x1xf32>
    %283 = arith.subf %282, %281 : vector<4x1xf32>
    %284 = math.exp %283 : vector<4x1xf32>
    %cst_142 = arith.constant 1.000000e+00 : f32
    %285 = vector.broadcast %cst_142 : f32 to vector<4x1xf32>
    %286 = arith.addf %285, %284 : vector<4x1xf32>
    %cst_143 = arith.constant 1.000000e+00 : f32
    %287 = vector.broadcast %cst_143 : f32 to vector<4x1xf32>
    %288 = arith.divf %287, %286 : vector<4x1xf32>
    %289 = arith.mulf %288, %1 : vector<4x1xf32>
    %c0_144 = arith.constant 0 : index
    %c0_145 = arith.constant 0 : index
    %c0_146 = arith.constant 0 : index
    %290 = vector.load %arg21[%c0_144, %c0_145, %c0_146] : memref<1x4x1xf32, #tpu.memory_space<vmem>>, vector<1x4x1xf32>
    %291 = vector.shape_cast %290 : vector<1x4x1xf32> to vector<4x1xf32>
    %292 = vector.shape_cast %289 : vector<4x1xf32> to vector<1x4x1xf32>
    tpu.vector_store %arg21[%c0_144, %c0_145, %c0_146], %292 {strides = array<i32>} : memref<1x4x1xf32, #tpu.memory_space<vmem>>, vector<1x4x1xf32>,
    return
  }
  func.func @transform_0(%arg0: i32) -> (i32, i32, i32) {
    %c0_i32 = arith.constant 0 : i32
    %c0_i32_0 = arith.constant 0 : i32
    %c0_i32_1 = arith.constant 0 : i32
    return %arg0, %c0_i32, %c0_i32_0 : i32, i32, i32
  }
  func.func @transform_1(%arg0: i32) -> (i32, i32, i32) {
    %c0_i32 = arith.constant 0 : i32
    %c0_i32_0 = arith.constant 0 : i32
    %c0_i32_1 = arith.constant 0 : i32
    return %arg0, %c0_i32, %c0_i32_0 : i32, i32, i32
  }
  func.func @transform_2(%arg0: i32) -> (i32, i32, i32) {
    %c0_i32 = arith.constant 0 : i32
    %c0_i32_0 = arith.constant 0 : i32
    %c0_i32_1 = arith.constant 0 : i32
    return %arg0, %c0_i32, %c0_i32_0 : i32, i32, i32
  }
  func.func @transform_3(%arg0: i32) -> (i32, i32) {
    %c0_i32 = arith.constant 0 : i32
    %c0_i32_0 = arith.constant 0 : i32
    %c0_i32_1 = arith.constant 0 : i32
    return %c0_i32, %c0_i32_0 : i32, i32
  }
  func.func @transform_4(%arg0: i32) -> (i32, i32, i32) {
    %c0_i32 = arith.constant 0 : i32
    %c0_i32_0 = arith.constant 0 : i32
    %c0_i32_1 = arith.constant 0 : i32
    %c0_i32_2 = arith.constant 0 : i32
    return %c0_i32, %c0_i32_0, %c0_i32_1 : i32, i32, i32
  }
  func.func @transform_5(%arg0: i32) -> (i32, i32, i32) {
    %c0_i32 = arith.constant 0 : i32
    %c0_i32_0 = arith.constant 0 : i32
    %c0_i32_1 = arith.constant 0 : i32
    %c0_i32_2 = arith.constant 0 : i32
    return %c0_i32, %c0_i32_0, %c0_i32_1 : i32, i32, i32
  }
  func.func @transform_6(%arg0: i32) -> (i32, i32, i32) {
    %c0_i32 = arith.constant 0 : i32
    %c0_i32_0 = arith.constant 0 : i32
    %c0_i32_1 = arith.constant 0 : i32
    %c0_i32_2 = arith.constant 0 : i32
    return %c0_i32, %c0_i32_0, %c0_i32_1 : i32, i32, i32
  }
  func.func @transform_7(%arg0: i32) -> (i32, i32, i32) {
    %c0_i32 = arith.constant 0 : i32
    %c0_i32_0 = arith.constant 0 : i32
    %c0_i32_1 = arith.constant 0 : i32
    %c0_i32_2 = arith.constant 0 : i32
    return %c0_i32, %c0_i32_0, %c0_i32_1 : i32, i32, i32
  }
  func.func @transform_8(%arg0: i32) -> (i32, i32, i32) {
    %c0_i32 = arith.constant 0 : i32
    %c0_i32_0 = arith.constant 0 : i32
    %c0_i32_1 = arith.constant 0 : i32
    %c0_i32_2 = arith.constant 0 : i32
    return %c0_i32, %c0_i32_0, %c0_i32_1 : i32, i32, i32
  }
  func.func @transform_9(%arg0: i32) -> (i32, i32, i32) {
    %c0_i32 = arith.constant 0 : i32
    %c0_i32_0 = arith.constant 0 : i32
    %c0_i32_1 = arith.constant 0 : i32
    %c0_i32_2 = arith.constant 0 : i32
    return %c0_i32, %c0_i32_0, %c0_i32_1 : i32, i32, i32
  }
  func.func @transform_10(%arg0: i32) -> (i32, i32, i32) {
    %c0_i32 = arith.constant 0 : i32
    %c0_i32_0 = arith.constant 0 : i32
    %c0_i32_1 = arith.constant 0 : i32
    %c0_i32_2 = arith.constant 0 : i32
    return %c0_i32, %c0_i32_0, %c0_i32_1 : i32, i32, i32
  }
  func.func @transform_11(%arg0: i32) -> (i32, i32, i32) {
    %c0_i32 = arith.constant 0 : i32
    %c0_i32_0 = arith.constant 0 : i32
    %c0_i32_1 = arith.constant 0 : i32
    %c0_i32_2 = arith.constant 0 : i32
    return %c0_i32, %c0_i32_0, %c0_i32_1 : i32, i32, i32
  }
  func.func @transform_12(%arg0: i32) -> (i32, i32, i32) {
    %c0_i32 = arith.constant 0 : i32
    %c0_i32_0 = arith.constant 0 : i32
    %c0_i32_1 = arith.constant 0 : i32
    %c0_i32_2 = arith.constant 0 : i32
    return %c0_i32, %c0_i32_0, %c0_i32_1 : i32, i32, i32
  }
  func.func @transform_13(%arg0: i32) -> (i32, i32, i32) {
    %c0_i32 = arith.constant 0 : i32
    %c0_i32_0 = arith.constant 0 : i32
    %c0_i32_1 = arith.constant 0 : i32
    %c0_i32_2 = arith.constant 0 : i32
    return %c0_i32, %c0_i32_0, %c0_i32_1 : i32, i32, i32
  }
  func.func @transform_14(%arg0: i32) -> (i32, i32, i32) {
    %c0_i32 = arith.constant 0 : i32
    %c0_i32_0 = arith.constant 0 : i32
    %c0_i32_1 = arith.constant 0 : i32
    %c0_i32_2 = arith.constant 0 : i32
    return %c0_i32, %c0_i32_0, %c0_i32_1 : i32, i32, i32
  }
  func.func @transform_15(%arg0: i32) -> (i32, i32, i32) {
    %c0_i32 = arith.constant 0 : i32
    %c0_i32_0 = arith.constant 0 : i32
    %c0_i32_1 = arith.constant 0 : i32
    %c0_i32_2 = arith.constant 0 : i32
    return %c0_i32, %c0_i32_0, %c0_i32_1 : i32, i32, i32
  }
  func.func @transform_16(%arg0: i32) -> (i32, i32) {
    %c0_i32 = arith.constant 0 : i32
    %c0_i32_0 = arith.constant 0 : i32
    %c0_i32_1 = arith.constant 0 : i32
    return %c0_i32, %c0_i32_0 : i32, i32
  }
  func.func @transform_17(%arg0: i32) -> (i32, i32) {
    %c0_i32 = arith.constant 0 : i32
    %c0_i32_0 = arith.constant 0 : i32
    %c0_i32_1 = arith.constant 0 : i32
    return %c0_i32, %c0_i32_0 : i32, i32
  }
  func.func @transform_18(%arg0: i32) -> (i32, i32) {
    %c0_i32 = arith.constant 0 : i32
    %c0_i32_0 = arith.constant 0 : i32
    %c0_i32_1 = arith.constant 0 : i32
    return %c0_i32, %c0_i32_0 : i32, i32
  }
  func.func @transform_19(%arg0: i32) -> (i32, i32) {
    %c0_i32 = arith.constant 0 : i32
    %c0_i32_0 = arith.constant 0 : i32
    %c0_i32_1 = arith.constant 0 : i32
    return %c0_i32, %c0_i32_0 : i32, i32
  }
  func.func @transform_20(%arg0: i32) -> (i32, i32, i32) {
    %c0_i32 = arith.constant 0 : i32
    %c0_i32_0 = arith.constant 0 : i32
    %c0_i32_1 = arith.constant 0 : i32
    return %arg0, %c0_i32, %c0_i32_0 : i32, i32, i32
  }
}

</mosaic_0001>

<bundles_post_ra>
// kernel: ext_summarizer_forward.3
= control target key start
LH: loop header
LB: loop body
LE: loop exit
PB: predicated region body
PF: predicated region fallthrough
CT: control target
= control target key end

     0   :  { %s1785_s23 = smov 0   ;;  %s2088_s0 = inlined_call_operand.vmem [shape: f32[2,4,32], index: 0, kind: input, shape index: {}]   ;;  %s2089_s1 = inlined_call_operand.vmem [shape: f32[2,4,1], index: 1, kind: input, shape index: {}]   ;;  %s2090_s2 = inlined_call_operand.vmem [shape: f32[2,1,4], index: 2, kind: input, shape index: {}]   ;;  %s2091_s3 = inlined_call_operand.vmem [shape: f32[4,32], index: 3, kind: input, shape index: {}]   ;;  %s2092_s4 = inlined_call_operand.vmem [shape: f32[2,1,32], index: 4, kind: input, shape index: {}, may-alias: {4,10}]   ;;  %s2093_s5 = inlined_call_operand.vmem [shape: f32[2,1,32], index: 5, kind: input, shape index: {}, may-alias: {5,9,11,15}]   ;;  %s2094_s6 = inlined_call_operand.vmem [shape: f32[2,32,96], index: 6, kind: input, shape index: {}]   ;;  %s2095_s7 = inlined_call_operand.vmem [shape: f32[2,1,96], index: 7, kind: input, shape index: {}]   ;;  %s2096_s8 = inlined_call_operand.vmem [shape: f32[2,32,32], index: 8, kind: input, shape index: {}]   ;;  %s2097_s9 = inlined_call_operand.vmem [shape: f32[2,1,32], index: 9, kind: input, shape index: {}, may-alias: {5,9,11,15}]   ;;  %s2098_s10 = inlined_call_operand.vmem [shape: f32[2,1,32], index: 10, kind: input, shape index: {}, may-alias: {4,10}]   ;;  %s2099_s11 = inlined_call_operand.vmem [shape: f32[2,1,32], index: 11, kind: input, shape index: {}, may-alias: {5,9,11,15}]   ;;  %s2100_s12 = inlined_call_operand.vmem [shape: f32[2,32,64], index: 12, kind: input, shape index: {}]   ;;  %s2101_s13 = inlined_call_operand.vmem [shape: f32[2,1,64], index: 13, kind: input, shape index: {}]   ;;  %s2102_s14 = inlined_call_operand.vmem [shape: f32[2,64,32], index: 14, kind: input, shape index: {}]   ;;  %s2103_s15 = inlined_call_operand.vmem [shape: f32[2,1,32], index: 15, kind: input, shape index: {}, may-alias: {5,9,11,15}]   ;;  %s2104_s16 = inlined_call_operand.vmem [shape: f32[1,32], index: 16, kind: input, shape index: {}]   ;;  %s2105_s17 = inlined_call_operand.vmem [shape: f32[1,32], index: 17, kind: input, shape index: {}]   ;;  %s2106_s18 = inlined_call_operand.vmem [shape: f32[1,32], index: 18, kind: input, shape index: {}]   ;;  %s2107_s19 = inlined_call_operand.<no memory space> [shape: f32[1,1], index: 19, kind: input, shape index: {}]   ;;  %s2108_s20 = inlined_call_operand.vmem [shape: f32[2,4,1], index: 20, kind: output, shape index: {}]  }
   0x1   :  { %2112 = sst [smem:[#allocation3_spill]] %s2088_s0  ;;  %v25_v0 = vstv %s2107_s19 }
   0x2   :  { %2113 = sst [smem:[#allocation4_spill]] %s2089_s1  ;;  %26 = vst [vmem:[#allocation2] sm:$0x1] %v25_v0 }
   0x3   :  { %2114 = sst [smem:[#allocation5_spill]] %s2090_s2 }
   0x4   :  { %2115 = sst [smem:[#allocation6_spill]] %s2091_s3 }
   0x5   :  { %2116 = sst [smem:[#allocation7_spill]] %s2092_s4 }
   0x6 LB: > { %s1529_s24 = sadd.s32 4294967295, %s1668_s23   ;;  %p1533_p0 = scmp.ge.s32.totalorder %s1668_s23, 1  ;;  %s1668_s23 = sphi %s1785_s23, %s32_s23  }
   0x7   : > { %p580_p1 = scmp.lt.s32.totalorder %s1668_s23, 3 }
   0x9   : > { %p581_p2 = pnand %p1533_p0, %p580_p1 }
   0xa   : > { %p643_p3 = scmp.lt.s32.totalorder (!%p581_p2), %s1529_s24, 1  ;;  %s2117_s4 = sld [smem:[#allocation5_spill]] (!%p581_p2) }
   0xb   : > { %584 = sbr.rel (%p581_p2) target bundleno = 4136 (0x1028), region = 100  ;;  %s2118_s21 = sld [smem:[#allocation4_spill]] (!%p581_p2) }
   0xc   : > { %s2119_s28 = sld [smem:[#allocation3_spill]] (!%p581_p2)  ;;  %s2111_s2 = smov (!%p581_p2), 64  }
   0xd   : > { %s1673_s25 = smov (!%p581_p2), 80   ;;  %s1674_s19 = smov (!%p581_p2), 112  }
   0xe   : > { %s2110_s3 = smov (!%p581_p2), 48  }
  0x10   : > { %v672_v1 = vld [vmem:[%s2094_s6 + $0x18] sm:$0xff]  ;;  %v671_v2 = vld [vmem:[%s2094_s6 + $0x10] sm:$0xff]  ;;  %v1670_v3 = vmov 0   ;;  %s2126_s24 = smov (!%p643_p3, %s1529_s24), 1  ;;  %v670_v5 = vld [vmem:[%s2094_s6 + $0x8] sm:$0xff]  ;;  %vm682_vm0 = vcmask 261120  }
  0x11   : > { %1608 = vset.pattern.permute.xlu0 %v1670_v3  ;;  %698 = vmatpush.msra.mxu0 %v672_v1  ;;  %s1802_s26 = sshll.u32 %s2126_s24, 2  ;;  %v669_v6 = vld [vmem:[%s2094_s6] sm:$0xff]  ;;  %vm757_vm1 = vcmask 1043456   ;;  %vm713_vm2 = vcmask 130048   ;;  %s2121_s30 = scalar_lea.vmem %s2117_s4, %s2126_s24  ;;  %vm739_vm3 = vcmask 27648   ;;  %v675_v30 = vld [vmem:[%s2096_s8 + $0x8] sm:$0xff] }
  0x12   : > { %s650_s1 = scalar_lea.vmem %s2118_s21, %s1802_s26  ;;  %s646_s29 = scalar_lea.vmem %s2119_s28, %s1802_s26  ;;  %v1610_v12 = vld [vmem:[%s2095_s7] ss:$0 sm:$0xff]  ;;  %vm753_vm4 = vcmask 31744   ;;  %v677_v44 = vld [vmem:[%s2096_s8 + $0x18] sm:$0xff]  ;;  %v676_v48 = vld [vmem:[%s2096_s8 + $0x10] sm:$0xff]  ;;  %vm900_vm5 = vcmask 257024  }
  0x13   : > { %699 = vmatpush.msra.mxu0 %v671_v2  ;;  %v1812_v4 = vld [vmem:[%s650_s1] sm:$0xf]  ;;  %s2120_s21 = sld [smem:[#allocation6_spill]]  ;;  %890 = vmatpush.msra.mxu3 %v677_v44  ;;  %v1676_v57 = vmov 32.0   ;;  %vm990_vm10 = vcmask 523264  }
  0x14   : > { %662 = vperm.xlu0 %1608, %v1812_v4   ;;  %v659_v7 = vld [vmem:[%s646_s29] sm:$0xf]  ;;  %s1672_s29 = smov 96   ;;  %s2122_s28 = sld [smem:[#allocation7_spill]] }
  0x15   : > { %700 = vmatpush.msra.mxu0 %v670_v5  ;;  %v1850_v21 = vld [vmem:[%s2121_s30] ss:$0 sm:$0xff]  ;;  %891 = vmatpush.msra.mxu3 %v676_v48 }
  0x16   : > { %v674_v34 = vld [vmem:[%s2096_s8] sm:$0xff] }
  0x17   : > { %701 = vmatpush.msra.mxu0 %v669_v6  ;;  %v1611_v50 = vld [vmem:[%s2097_s9] ss:$0 sm:$0xff]  ;;  %v941_v6 = vld [vmem:[%s2100_s12 + $0x18] sm:$0xff] }
  0x19   : > { %v666_v8 = vld [vmem:[%s2120_s21] sm:$0xf]  ;;  %797 = vmatpush.msrb.mxu0 %v675_v30  ;;  %v981_v30 = vld [vmem:[%s2102_s14 + $0x18] sm:$0xff] }
  0x1b   : > { %798 = vmatpush.msrb.mxu0 %v674_v34  ;;  %v1614_v34 = vld [vmem:[%s2101_s13] ss:$0 sm:$0xff] }
  0x86   : > { %v663_v9 = vpop.permute.xlu0 %662 }
  0x87   : > { %v665_v10 = vmul.f32 %v663_v9, %v659_v7  ;;  %v940_v7 = vld [vmem:[%s2100_s12 + $0x10] sm:$0xff]  ;;  %v938_v9 = vld [vmem:[%s2100_s12] sm:$0xff] }
  0x89   : > { %v1828_v11 = vadd.f32 %v666_v8, %v665_v10  ;;  %v939_v8 = vld [vmem:[%s2100_s12 + $0x8] sm:$0xff] }
  0x8b   : > { %1537 = vmatmul.msk.f32.vlgmr.msra.gmra.mxu0 %vm682_vm0, %v1828_v11 }
  0x8c   : > { %961 = vmatpush.msra.mxu0 %v941_v6 }
  0x8e   : > { %962 = vmatpush.msra.mxu0 %v940_v7  ;;  %v1616_v7 = vld [vmem:[%s2122_s28 + $0x1] ss:$0 sm:$0xff] }
  0x90   : > { %963 = vmatpush.msra.mxu0 %v939_v8 }
  0x92   : > { %964 = vmatpush.msra.mxu0 %v938_v9 }
 0x108   : > { %v703_v13 = vpop.f32.mrf.mxu0 }
 0x109   : > { %v704_v14 = vadd.f32 %v1610_v12, %v703_v13 }
 0x10b   : > { %751 = vrot.lane.b32.xlu2 %v704_v14, %s2111_s2  ;;  %711 = vrot.lane.b32.xlu0 %v704_v14, %s1672_s29  ;;  %v706_v15 = vmul.f32 0.25, %v704_v14 }
 0x113   : > { %809 = vrot.lane.b32.xlu2 %v704_v14, %s1673_s25  ;;  %807 = vrot.lane.b32.xlu0 %v706_v15, %s1674_s19 }
 0x11b   : > { %846 = vrot.lane.b32.xlu0 %v704_v14, %s2110_s3 }
 0x165   : > { %v752_v16 = vpop.permute.xlu2 %751 }
 0x166   : > { %1540 = vmatpush.msk.msra.mxu2 %vm757_vm1, %v752_v16 }
 0x16d   : > { %v810_v17 = vpop.permute.xlu2 %809 }
 0x16e   : > { %1543 = vmatpush.xpose.msk.msrb.mxu2 %vm713_vm2, %v810_v17 }
 0x17d   : > { %v712_v18 = vpop.permute.xlu0 %711 }
 0x17e   : > { %1538 = vmatpush.xpose.msk.msra.mxu1 %vm713_vm2, %v712_v18 }
 0x181   : > { %1539 = vmatmul.msk.f32.vlgmr.msra.gmra.mxu1 %vm713_vm2, %v706_v15 }
 0x185   : > { %v808_v19 = vpop.permute.xlu0 %807 }
 0x18d   : > { %v847_v20 = vpop.permute.xlu0 %846 }
 0x18e   : > { %1545 = vmatpush.msk.msrb.mxu1 %vm757_vm1, %v847_v20 }
 0x1fe   : > { %v736_v22 = vpop.f32.mrf.mxu1 }
 0x1ff   : > { %v737_v23 = vadd.f32 %v1850_v21, %v736_v22 }
 0x201   : > { %v740_v24 = vsel %vm739_vm3, %v737_v23, -inf }
 0x202   : > { %741 = vmax.xlane.f32.xlu1 %v740_v24 }
 0x275   : > { %v742_v25 = vpop.xlane.xlu1 %741 }
 0x276   : > { %v743_v26 = vsub.f32 %v737_v23, %v742_v25  ;;  %v1613_v23 = vld [vmem:[%s2099_s11] ss:$0 sm:$0xff] }
 0x278   : > { %v744_v27 = vmul.f32 1.442695, %v743_v26  ;;  %v985_v26 = vld [vmem:[%s2102_s14 + $0x38] sm:$0xff] }
 0x27a   : > { %1628 = vpow2.f32 %v744_v27  ;;  %v984_v27 = vld [vmem:[%s2102_s14 + $0x30] sm:$0xff] }
 0x280   : > { %v1629_v28 = vpop.eup %1628 }
 0x281   : > { %v746_v29 = vsel %vm739_vm3, %v1629_v28, 0.0 }
 0x282   : > { %747 = vadd.xlane.f32.xlu1 %v746_v29  ;;  %v982_v29 = vld [vmem:[%s2102_s14 + $0x20] sm:$0xff] }
 0x2f5   : > { %v748_v31 = vpop.xlane.xlu1 %747 }
 0x2f6   : > { %1630 = vrcp.f32 %v748_v31  ;;  %v980_v31 = vld [vmem:[%s2102_s14 + $0x10] sm:$0xff] }
 0x2fc   : > { %v1631_v32 = vpop.eup %1630 }
 0x2fd   : > { %v750_v33 = vmul.f32 %v1631_v32, %v1629_v28  ;;  %v983_v28 = vld [vmem:[%s2102_s14 + $0x28] sm:$0xff] }
 0x2fe   : > { %v979_v32 = vld [vmem:[%s2102_s14 + $0x8] sm:$0xff] }
 0x2ff   : > { %1541 = vmatmul.msk.f32.vlgmr.msra.gmra.mxu2 %vm753_vm4, %v750_v33  ;;  %v978_v33 = vld [vmem:[%s2102_s14] sm:$0xff] }
 0x300   : > { %1002 = vmatpush.msra.mxu2 %v985_v26 }
 0x302   : > { %1003 = vmatpush.msra.mxu2 %v984_v27 }
 0x304   : > { %1004 = vmatpush.msra.mxu2 %v983_v28 }
 0x306   : > { %1005 = vmatpush.msra.mxu2 %v982_v29 }
 0x307   : > { %1544 = vmatmul.msk.f32.vlgmr.msrb.gmra.mxu2 %vm713_vm2, %v808_v19  ;;  %v1612_v19 = vld [vmem:[%s2098_s10] ss:$0 sm:$0xff] }
 0x308   : > { %1006 = vmatpush.msra.mxu2 %v981_v30 }
 0x30a   : > { %1007 = vmatpush.msra.mxu2 %v980_v31 }
 0x30c   : > { %1008 = vmatpush.msra.mxu2 %v979_v32 }
 0x30e   : > { %1009 = vmatpush.msra.mxu2 %v978_v33 }
 0x382   : > { %v777_v35 = vpop.f32.mrf.mxu2 }
 0x383   : > { %1542 = vmatmul.msk.f32.vlgmr.msrb.gmra.mxu0 %vm713_vm2, %v777_v35 }
 0x38a   : > { %v832_v36 = vpop.f32.mrf.mxu2 }
 0x38b   : > { %v833_v37 = vadd.f32 %v1850_v21, %v832_v36 }
 0x38d   : > { %v835_v38 = vsel %vm739_vm3, %v833_v37, -inf }
 0x38e   : > { %836 = vmax.xlane.f32.xlu1 %v835_v38 }
 0x400   : > { %v800_v51 = vpop.f32.mrf.mxu0 }
 0x401   : > { %v837_v39 = vpop.xlane.xlu1 %836  ;;  %v806_v52 = vadd.f32 %v1611_v50, %v800_v51 }
 0x402   : > { %v838_v40 = vsub.f32 %v833_v37, %v837_v39 }
 0x404   : > { %v839_v41 = vmul.f32 1.442695, %v838_v40 }
 0x406   : > { %1632 = vpow2.f32 %v839_v41 }
 0x40c   : > { %v1633_v42 = vpop.eup %1632 }
 0x40d   : > { %v841_v43 = vsel %vm739_vm3, %v1633_v42, 0.0 }
 0x40e   : > { %842 = vadd.xlane.f32.xlu2 %v841_v43 }
 0x481   : > { %v843_v45 = vpop.xlane.xlu2 %842 }
 0x482   : > { %1634 = vrcp.f32 %v843_v45 }
 0x483   : > { %1636 = vrcp.f32 %v1676_v57  ;;  %v1555_v57 = vld [vmem:[%s2094_s6 + $0x38] sm:$0xff] }
 0x484   : > { %1081 = vmatpush.msra.mxu1 %v1555_v57 }
 0x488   : > { %v1635_v46 = vpop.eup %1634 }
 0x489   : > { %v845_v47 = vmul.f32 %v1635_v46, %v1633_v42  ;;  %v1637_v58 = vpop.eup %1636  ;;  %v1615_v46 = vld [vmem:[%s2103_s15] ss:$0 sm:$0xff] }
 0x48a   : > { %v905_v59 = vmul.f32 32.0, %v1637_v58  ;;  %vm909_vm6 = vweird.f32 %v1637_v58 }
 0x48b   : > { %1546 = vmatmul.msk.f32.vlgmr.msrb.gmra.mxu1 %vm753_vm4, %v845_v47 }
 0x48c   : > { %v906_v60 = vsub.f32 1.0, %v905_v59  ;;  %v1552_v59 = vld [vmem:[%s2094_s6 + $0x20] sm:$0xff] }
 0x48e   : > { %v907_v61 = vmul.f32 %v1637_v58, %v906_v60 }
 0x490   : > { %v908_v62 = vadd.f32 %v1637_v58, %v907_v61 }
 0x492   : > { %v1883_v63 = vsel %vm909_vm6, %v1637_v58, %v908_v62  ;;  %v1553_v58 = vld [vmem:[%s2094_s6 + $0x28] sm:$0xff] }
 0x508   : > { %v870_v49 = vpop.f32.mrf.mxu1 }
 0x509   : > { %1547 = vmatmul.msk.f32.vlgmr.msra.gmra.mxu3 %vm713_vm2, %v870_v49 }
 0x58c   : > { %v893_v53 = vpop.f32.mrf.mxu3 }
 0x58d   : > { %v896_v54 = vadd.f32 %v893_v53, %v806_v52 }
 0x58f   : > { %v1879_v55 = vadd.f32 %v896_v54, %v1828_v11 }
 0x591   : > { %v901_v56 = vsel %vm900_vm5, %v1879_v55, 0.0 }
 0x592   : > { %902 = vadd.xlane.f32.xlu1 %v901_v56 }
 0x605   : > { %v903_v0 = vpop.xlane.xlu1 %902 }
 0x606   : > { %v911_v1 = vmul.f32 %v1883_v63, %v903_v0 }
 0x608   : > { %v912_v2 = vsub.f32 %v1879_v55, %v911_v1 }
 0x60a   : > { %v913_v3 = vmul.f32 %v912_v2, %v912_v2 }
 0x60c   : > { %v914_v5 = vsel %vm900_vm5, %v913_v3, 0.0 }
 0x60d   : > { %915 = vadd.xlane.f32.xlu0 %v914_v5 }
 0x680   : > { %v916_v10 = vpop.xlane.xlu0 %915 }
 0x681   : > { %v917_v11 = vmul.f32 %v916_v10, %v1883_v63  ;;  %v1617_v10 = vld [vmem:[%s2093_s5 + $0x1] ss:$0 sm:$0xff] }
 0x683   : > { %v918_v12 = vadd.f32 1e-06, %v917_v11 }
 0x685   : > { %1638 = vrsqrt.f32 %v918_v12  ;;  %vm925_vm8 = vweird.f32 %v918_v12 }
 0x68b   : > { %v1639_v13 = vpop.eup %1638 }
 0x68c   : > { %v920_v14 = vmul.f32 %v1639_v13, %v918_v12  ;;  %vm926_vm7 = vweird.f32 %v1639_v13 }
 0x68d   : > { %vm927_vm9 = vmor %vm925_vm8, %vm926_vm7  ;;  %vm1453_vm8 = vcmask 3072  }
 0x68e   : > { %v921_v15 = vmul.f32 %v1639_v13, %v920_v14 }
 0x690   : > { %v922_v16 = vmul.f32 0.5, %v921_v15 }
 0x692   : > { %v923_v17 = vsub.f32 1.5, %v922_v16 }
 0x694   : > { %v924_v18 = vmul.f32 %v1639_v13, %v923_v17 }
 0x696   : > { %v928_v20 = vsel %vm927_vm9, %v1639_v13, %v924_v18  ;;  %v1618_v13 = vld [vmem:[%s2095_s7 + $0x1] ss:$0 sm:$0xff] }
 0x697   : > { %v929_v22 = vmul.f32 %v928_v20, %v912_v2 }
 0x699   : > { %v933_v24 = vmul.f32 %v1612_v19, %v929_v22 }
 0x69b   : > { %v937_v25 = vadd.f32 %v1613_v23, %v933_v24 }
 0x69d   : > { %1548 = vmatmul.msk.f32.vlgmr.msra.gmra.mxu0 %vm682_vm0, %v937_v25 }
 0x71a   : > { %v966_v35 = vpop.f32.mrf.mxu0 }
 0x71b   : > { %v967_v36 = vadd.f32 %v1614_v34, %v966_v35 }
 0x71d   : > { %v970_v37 = vmul.f32 0.044715, %v967_v36  ;;  %v969_v43 = vmul.f32 0.5, %v967_v36 }
 0x71f   : > { %v971_v38 = vmul.f32 %v970_v37, %v967_v36  ;;  %v1558_v37 = vld [vmem:[%s2096_s8 + $0x28] sm:$0xff] }
 0x721   : > { %v972_v39 = vmul.f32 %v971_v38, %v967_v36 }
 0x723   : > { %v973_v40 = vadd.f32 %v972_v39, %v967_v36 }
 0x725   : > { %v974_v41 = vmul.f32 0.7978846, %v973_v40 }
 0x727   : > { %1640 = vtanh.f32 %v974_v41 }
 0x72d   : > { %v1641_v42 = vpop.eup %1640 }
 0x72e   : > { %v976_v44 = vadd.f32 1.0, %v1641_v42 }
 0x730   : > { %v977_v45 = vmul.f32 %v976_v44, %v969_v43 }
 0x732   : > { %1549 = vmatmul.msk.f32.vlgmr.msra.gmra.mxu2 %vm990_vm10, %v977_v45  ;;  %v1557_v45 = vld [vmem:[%s2096_s8 + $0x20] sm:$0xff] }
 0x7b5   : > { %v1011_v47 = vpop.f32.mrf.mxu2 }
 0x7b6   : > { %v1012_v48 = vadd.f32 %v1615_v46, %v1011_v47  ;;  %v1560_v46 = vld [vmem:[%s2096_s8 + $0x38] sm:$0xff]  ;;  %v1559_v47 = vld [vmem:[%s2096_s8 + $0x30] sm:$0xff] }
 0x7b7   : > { %1266 = vmatpush.msrb.mxu2 %v1560_v46 }
 0x7b8   : > { %v1940_v49 = vadd.f32 %v1012_v48, %v1879_v55  ;;  %v1554_v55 = vld [vmem:[%s2094_s6 + $0x30] sm:$0xff] }
 0x7b9   : > { %1082 = vmatpush.msra.mxu1 %v1554_v55  ;;  %1267 = vmatpush.msrb.mxu2 %v1559_v47 }
 0x7ba   : > { %v1019_v50 = vsel %vm900_vm5, %v1940_v49, 0.0 }
 0x7bb   : > { %1020 = vadd.xlane.f32.xlu1 %v1019_v50  ;;  %1083 = vmatpush.msra.mxu1 %v1553_v58 }
 0x7bd   : > { %1084 = vmatpush.msra.mxu1 %v1552_v59 }
 0x7bf   : > { %1173 = vmatpush.msrb.mxu1 %v1558_v37 }
 0x7c1   : > { %1174 = vmatpush.msrb.mxu1 %v1557_v45 }
 0x82e   : > { %v1021_v51 = vpop.xlane.xlu1 %1020 }
 0x82f   : > { %v1022_v52 = vmul.f32 %v1021_v51, %v1883_v63  ;;  %v1619_v51 = vld [vmem:[%s2097_s9 + $0x1] ss:$0 sm:$0xff] }
 0x831   : > { %v1023_v53 = vsub.f32 %v1940_v49, %v1022_v52 }
 0x833   : > { %v1024_v54 = vmul.f32 %v1023_v53, %v1023_v53 }
 0x835   : > { %v1025_v56 = vsel %vm900_vm5, %v1024_v54, 0.0 }
 0x836   : > { %1026 = vadd.xlane.f32.xlu1 %v1025_v56 }
 0x8a9   : > { %v1027_v60 = vpop.xlane.xlu1 %1026 }
 0x8aa   : > { %v1028_v61 = vmul.f32 %v1027_v60, %v1883_v63 }
 0x8ac   : > { %v1029_v62 = vadd.f32 1e-06, %v1028_v61 }
 0x8ae   : > { %1642 = vrsqrt.f32 %v1029_v62  ;;  %vm1036_vm12 = vweird.f32 %v1029_v62 }
 0x8b4   : > { %v1643_v0 = vpop.eup %1642 }
 0x8b5   : > { %v1031_v1 = vmul.f32 %v1643_v0, %v1029_v62  ;;  %vm1037_vm11 = vweird.f32 %v1643_v0 }
 0x8b6   : > { %vm1038_vm13 = vmor %vm1036_vm12, %vm1037_vm11 }
 0x8b7   : > { %v1032_v2 = vmul.f32 %v1643_v0, %v1031_v1  ;;  %v1576_v1 = vld [vmem:[%s2100_s12 + $0x28] sm:$0xff] }
 0x8b9   : > { %v1033_v3 = vmul.f32 0.5, %v1032_v2  ;;  %v1575_v2 = vld [vmem:[%s2100_s12 + $0x20] sm:$0xff] }
 0x8bb   : > { %v1034_v5 = vsub.f32 1.5, %v1033_v3 }
 0x8bd   : > { %v1035_v6 = vmul.f32 %v1643_v0, %v1034_v5 }
 0x8bf   : > { %v1039_v8 = vsel %vm1038_vm13, %v1643_v0, %v1035_v6  ;;  %v1578_v0 = vld [vmem:[%s2100_s12 + $0x38] sm:$0xff] }
 0x8c0   : > { %v1040_v9 = vmul.f32 %v1039_v8, %v1023_v53 }
 0x8c2   : > { %v1044_v11 = vmul.f32 %v1616_v7, %v1040_v9 }
 0x8c4   : > { %v1048_v12 = vadd.f32 %v1617_v10, %v1044_v11 }
 0x8c6   : > { %1562 = vmatmul.msk.f32.vlgmr.msra.gmra.mxu1 %vm682_vm0, %v1048_v12 }
 0x8c7   : > { %1333 = vmatpush.msra.mxu1 %v1578_v0  ;;  %v1626_v0 = vld [vmem:[%s2106_s18] ss:$0 sm:$0xff] }
 0x943   : > { %v1086_v14 = vpop.f32.mrf.mxu1 }
 0x944   : > { %v1087_v15 = vadd.f32 %v1618_v13, %v1086_v14  ;;  %v1620_v13 = vld [vmem:[%s2098_s10 + $0x1] ss:$0 sm:$0xff] }
 0x946   : > { %1185 = vrot.lane.b32.xlu2 %v1087_v15, %s1673_s25  ;;  %1091 = vrot.lane.b32.xlu1 %v1087_v15, %s1672_s29  ;;  %v1089_v16 = vmul.f32 0.25, %v1087_v15  ;;  %s2123_s29 = smov 64   ;;  %s2124_s25 = smov 48  }
 0x94e   : > { %1183 = vrot.lane.b32.xlu1 %v1089_v16, %s1674_s19 }
 0x9a0   : > { %v1186_v18 = vpop.permute.xlu2 %1185 }
 0x9b8   : > { %v1092_v17 = vpop.permute.xlu1 %1091 }
 0x9b9   : > { %1563 = vmatpush.xpose.msk.msrb.mxu3 %vm713_vm2, %v1092_v17 }
 0x9bc   : > { %1564 = vmatmul.msk.f32.vlgmr.msrb.gmra.mxu3 %vm713_vm2, %v1089_v16  ;;  %v1621_v16 = vld [vmem:[%s2099_s11 + $0x1] ss:$0 sm:$0xff] }
 0x9bd   : > { %1568 = vmatpush.xpose.msk.msra.mxu3 %vm713_vm2, %v1186_v18 }
 0x9c0   : > { %v1184_v19 = vpop.permute.xlu1 %1183 }
 0x9c4   : > { %1569 = vmatmul.msk.f32.vlgmr.msra.gmra.mxu3 %vm713_vm2, %v1184_v19  ;;  %v1588_v19 = vld [vmem:[%s2102_s14 + $0x78] sm:$0xff] }
 0x9c5   : > { %1375 = vmatpush.msrb.mxu3 %v1588_v19 }
 0xa3f   : > { %v1115_v20 = vpop.f32.mrf.mxu3 }
 0xa40   : > { %v1116_v22 = vadd.f32 %v1850_v21, %v1115_v20  ;;  %v1587_v20 = vld [vmem:[%s2102_s14 + $0x70] sm:$0xff] }
 0xa41   : > { %1376 = vmatpush.msrb.mxu3 %v1587_v20 }
 0xa42   : > { %v1118_v23 = vsel %vm739_vm3, %v1116_v22, -inf }
 0xa43   : > { %1119 = vmax.xlane.f32.xlu0 %v1118_v23  ;;  %v1585_v23 = vld [vmem:[%s2102_s14 + $0x60] sm:$0xff] }
 0xa47   : > { %v1208_v24 = vpop.f32.mrf.mxu3 }
 0xa48   : > { %v1209_v25 = vadd.f32 %v1850_v21, %v1208_v24  ;;  %v1584_v24 = vld [vmem:[%s2102_s14 + $0x58] sm:$0xff] }
 0xa4a   : > { %v1211_v26 = vsel %vm739_vm3, %v1209_v25, -inf }
 0xa4b   : > { %1212 = vmax.xlane.f32.xlu1 %v1211_v26  ;;  %v1582_v26 = vld [vmem:[%s2102_s14 + $0x48] sm:$0xff] }
 0xa57   : > { %1129 = vrot.lane.b32.xlu0 %v1087_v15, %s2123_s29  ;;  %s657_s29 = scalar_lea.vmem %s2108_s20, %s1802_s26 }
 0xab6   : > { %v1120_v27 = vpop.xlane.xlu0 %1119 }
 0xab7   : > { %v1121_v28 = vsub.f32 %v1116_v22, %v1120_v27  ;;  %v1586_v22 = vld [vmem:[%s2102_s14 + $0x68] sm:$0xff]  ;;  %v1581_v27 = vld [vmem:[%s2102_s14 + $0x40] sm:$0xff] }
 0xab8   : > { %1377 = vmatpush.msrb.mxu3 %v1586_v22 }
 0xab9   : > { %v1122_v29 = vmul.f32 1.442695, %v1121_v28  ;;  %v1622_v28 = vld [vmem:[%s2101_s13 + $0x1] ss:$0 sm:$0xff] }
 0xaba   : > { %1378 = vmatpush.msrb.mxu3 %v1585_v23 }
 0xabb   : > { %1644 = vpow2.f32 %v1122_v29 }
 0xabc   : > { %1379 = vmatpush.msrb.mxu3 %v1584_v24 }
 0xabe   : > { %v1213_v30 = vpop.xlane.xlu1 %1212 }
 0xabf   : > { %v1214_v31 = vsub.f32 %v1209_v25, %v1213_v30  ;;  %v1583_v25 = vld [vmem:[%s2102_s14 + $0x50] sm:$0xff] }
 0xac0   : > { %1380 = vmatpush.msrb.mxu3 %v1583_v25 }
 0xac1   : > { %v1645_v32 = vpop.eup %1644  ;;  %v1215_v33 = vmul.f32 1.442695, %v1214_v31 }
 0xac2   : > { %v1124_v34 = vsel %vm739_vm3, %v1645_v32, 0.0  ;;  %1381 = vmatpush.msrb.mxu3 %v1582_v26 }
 0xac3   : > { %1646 = vpow2.f32 %v1215_v33  ;;  %1125 = vadd.xlane.f32.xlu2 %v1124_v34 }
 0xac4   : > { %1382 = vmatpush.msrb.mxu3 %v1581_v27 }
 0xac9   : > { %v1647_v35 = vpop.eup %1646  ;;  %v1130_v36 = vpop.permute.xlu0 %1129 }
 0xaca   : > { %1565 = vmatpush.msk.msrb.mxu0 %vm757_vm1, %v1130_v36  ;;  %v1217_v21 = vsel %vm739_vm3, %v1647_v35, 0.0 }
 0xacb   : > { %1218 = vadd.xlane.f32.xlu0 %v1217_v21 }
 0xadf   : > { %1222 = vrot.lane.b32.xlu0 %v1087_v15, %s2124_s25 }
 0xb36   : > { %v1126_v38 = vpop.xlane.xlu2 %1125 }
 0xb37   : > { %1648 = vrcp.f32 %v1126_v38 }
 0xb3d   : > { %v1649_v39 = vpop.eup %1648 }
 0xb3e   : > { %v1128_v40 = vmul.f32 %v1649_v39, %v1645_v32  ;;  %v1219_v41 = vpop.xlane.xlu0 %1218  ;;  %v1623_v39 = vld [vmem:[%s2103_s15 + $0x1] ss:$0 sm:$0xff] }
 0xb3f   : > { %1650 = vrcp.f32 %v1219_v41 }
 0xb40   : > { %1566 = vmatmul.msk.f32.vlgmr.msrb.gmra.mxu0 %vm753_vm4, %v1128_v40 }
 0xb45   : > { %v1651_v42 = vpop.eup %1650 }
 0xb46   : > { %v1221_v43 = vmul.f32 %v1651_v42, %v1647_v35 }
 0xb51   : > { %v1223_v44 = vpop.permute.xlu0 %1222 }
 0xb52   : > { %1570 = vmatpush.msk.msra.mxu0 %vm757_vm1, %v1223_v44 }
 0xb53   : > { %1571 = vmatmul.msk.f32.vlgmr.msra.gmra.mxu0 %vm753_vm4, %v1221_v43 }
 0xbbd   : > { %v1153_v48 = vpop.f32.mrf.mxu0 }
 0xbbe   : > { %1567 = vmatmul.msk.f32.vlgmr.msrb.gmra.mxu1 %vm713_vm2, %v1153_v48 }
 0xbd0   : > { %v1246_v50 = vpop.f32.mrf.mxu0 }
 0xbd1   : > { %1572 = vmatmul.msk.f32.vlgmr.msrb.gmra.mxu2 %vm713_vm2, %v1246_v50 }
 0xc3b   : > { %v1176_v52 = vpop.f32.mrf.mxu1 }
 0xc3c   : > { %v1182_v53 = vadd.f32 %v1619_v51, %v1176_v52 }
 0xc54   : > { %v1269_v54 = vpop.f32.mrf.mxu2 }
 0xc55   : > { %v1272_v56 = vadd.f32 %v1269_v54, %v1182_v53 }
 0xc57   : > { %v2007_v57 = vadd.f32 %v1272_v56, %v1940_v49  ;;  %v1577_v49 = vld [vmem:[%s2100_s12 + $0x30] sm:$0xff] }
 0xc58   : > { %1334 = vmatpush.msra.mxu1 %v1577_v49 }
 0xc59   : > { %v1278_v55 = vsel %vm900_vm5, %v2007_v57, 0.0 }
 0xc5a   : > { %1279 = vadd.xlane.f32.xlu0 %v1278_v55  ;;  %1335 = vmatpush.msra.mxu1 %v1576_v1 }
 0xc5c   : > { %1336 = vmatpush.msra.mxu1 %v1575_v2 }
 0xccd   : > { %v1280_v58 = vpop.xlane.xlu0 %1279 }
 0xcce   : > { %v1281_v59 = vmul.f32 %v1280_v58, %v1883_v63 }
 0xcd0   : > { %v1282_v60 = vsub.f32 %v2007_v57, %v1281_v59  ;;  %v1624_v59 = vld [vmem:[%s2104_s16] ss:$0 sm:$0xff] }
 0xcd2   : > { %v1283_v61 = vmul.f32 %v1282_v60, %v1282_v60 }
 0xcd4   : > { %v1284_v62 = vsel %vm900_vm5, %v1283_v61, 0.0 }
 0xcd5   : > { %1285 = vadd.xlane.f32.xlu2 %v1284_v62 }
 0xd48   : > { %v1286_v3 = vpop.xlane.xlu2 %1285 }
 0xd49   : > { %v1287_v5 = vmul.f32 %v1286_v3, %v1883_v63  ;;  %v1627_v3 = vld [vmem:[#allocation2] ss:$0 sm:$0xff] }
 0xd4b   : > { %v1288_v6 = vadd.f32 1e-06, %v1287_v5 }
 0xd4d   : > { %1652 = vrsqrt.f32 %v1288_v6  ;;  %vm1295_vm15 = vweird.f32 %v1288_v6 }
 0xd53   : > { %v1653_v7 = vpop.eup %1652 }
 0xd54   : > { %v1290_v8 = vmul.f32 %v1653_v7, %v1288_v6  ;;  %vm1296_vm14 = vweird.f32 %v1653_v7 }
 0xd55   : > { %vm1297_vm1 = vmor %vm1295_vm15, %vm1296_vm14 }
 0xd56   : > { %v1291_v9 = vmul.f32 %v1653_v7, %v1290_v8 }
 0xd58   : > { %v1292_v10 = vmul.f32 0.5, %v1291_v9 }
 0xd5a   : > { %v1293_v11 = vsub.f32 1.5, %v1292_v10 }
 0xd5c   : > { %v1294_v12 = vmul.f32 %v1653_v7, %v1293_v11 }
 0xd5e   : > { %v1298_v14 = vsel %vm1297_vm1, %v1653_v7, %v1294_v12 }
 0xd5f   : > { %v1299_v15 = vmul.f32 %v1298_v14, %v1282_v60 }
 0xd61   : > { %v1303_v17 = vmul.f32 %v1620_v13, %v1299_v15 }
 0xd63   : > { %v1307_v18 = vadd.f32 %v1621_v16, %v1303_v17 }
 0xd65   : > { %1580 = vmatmul.msk.f32.vlgmr.msra.gmra.mxu1 %vm682_vm0, %v1307_v18 }
 0xde2   : > { %v1338_v29 = vpop.f32.mrf.mxu1 }
 0xde3   : > { %v1339_v30 = vadd.f32 %v1622_v28, %v1338_v29 }
 0xde5   : > { %v1342_v31 = vmul.f32 0.044715, %v1339_v30  ;;  %v1341_v21 = vmul.f32 0.5, %v1339_v30 }
 0xde7   : > { %v1343_v32 = vmul.f32 %v1342_v31, %v1339_v30 }
 0xde9   : > { %v1344_v33 = vmul.f32 %v1343_v32, %v1339_v30 }
 0xdeb   : > { %v1345_v34 = vadd.f32 %v1344_v33, %v1339_v30 }
 0xded   : > { %v1346_v35 = vmul.f32 0.7978846, %v1345_v34 }
 0xdef   : > { %1654 = vtanh.f32 %v1346_v35 }
 0xdf5   : > { %v1655_v36 = vpop.eup %1654 }
 0xdf6   : > { %v1348_v37 = vadd.f32 1.0, %v1655_v36 }
 0xdf8   : > { %v1349_v38 = vmul.f32 %v1348_v37, %v1341_v21 }
 0xdfa   : > { %1590 = vmatmul.msk.f32.vlgmr.msrb.gmra.mxu3 %vm990_vm10, %v1349_v38 }
 0xe7d   : > { %v1384_v40 = vpop.f32.mrf.mxu3 }
 0xe7e   : > { %v1385_v41 = vadd.f32 %v1623_v39, %v1384_v40 }
 0xe80   : > { %v1387_v42 = vadd.f32 %v1385_v41, %v2007_v57 }
 0xe82   : > { %v1390_v43 = vsel %vm900_vm5, %v1387_v42, 0.0 }
 0xe83   : > { %1391 = vadd.xlane.f32.xlu1 %v1390_v43 }
 0xef6   : > { %v1392_v44 = vpop.xlane.xlu1 %1391 }
 0xef7   : > { %v1393_v45 = vmul.f32 %v1392_v44, %v1883_v63 }
 0xef9   : > { %v1394_v46 = vsub.f32 %v1387_v42, %v1393_v45 }
 0xefb   : > { %v1395_v47 = vmul.f32 %v1394_v46, %v1394_v46 }
 0xefd   : > { %v1396_v48 = vsel %vm900_vm5, %v1395_v47, 0.0 }
 0xefe   : > { %1397 = vadd.xlane.f32.xlu2 %v1396_v48 }
 0xf71   : > { %v1398_v50 = vpop.xlane.xlu2 %1397 }
 0xf72   : > { %v1399_v51 = vmul.f32 %v1398_v50, %v1883_v63  ;;  %v1625_v63 = vld [vmem:[%s2105_s17] ss:$0 sm:$0xff] }
 0xf74   : > { %v1400_v52 = vadd.f32 1e-06, %v1399_v51 }
 0xf76   : > { %1656 = vrsqrt.f32 %v1400_v52  ;;  %vm1407_vm2 = vweird.f32 %v1400_v52 }
 0xf7c   : > { %v1657_v53 = vpop.eup %1656 }
 0xf7d   : > { %v1402_v54 = vmul.f32 %v1657_v53, %v1400_v52  ;;  %vm1408_vm0 = vweird.f32 %v1657_v53 }
 0xf7e   : > { %vm1409_vm3 = vmor %vm1407_vm2, %vm1408_vm0 }
 0xf7f   : > { %v1403_v56 = vmul.f32 %v1657_v53, %v1402_v54 }
 0xf81   : > { %v1404_v57 = vmul.f32 0.5, %v1403_v56 }
 0xf83   : > { %v1405_v55 = vsub.f32 1.5, %v1404_v57 }
 0xf85   : > { %v1406_v58 = vmul.f32 %v1657_v53, %v1405_v55 }
 0xf87   : > { %v1410_v60 = vsel %vm1409_vm3, %v1657_v53, %v1406_v58 }
 0xf88   : > { %v1411_v61 = vmul.f32 %v1410_v60, %v1394_v46 }
 0xf8a   : > { %v1415_v62 = vmul.f32 %v1624_v59, %v1411_v61 }
 0xf8c   : > { %v1419_v49 = vadd.f32 %v1625_v63, %v1415_v62 }
 0xf8e   : > { %v1424_v1 = vmul.f32 %v1626_v0, %v1419_v49 }
 0xf90   : > { %v1425_v2 = vsel %vm900_vm5, %v1424_v1, 0.0 }
 0xf91   : > { %1426 = vadd.xlane.f32.xlu1 %v1425_v2 }
0x1004   : > { %v1427_v5 = vpop.xlane.xlu1 %1426 }
0x1005   : > { %v1432_v6 = vadd.f32 %v1627_v3, %v1427_v5 }
0x1007   : > { %v1433_v7 = vsub.f32 0.0, %v1432_v6 }
0x1009   : > { %v1434_v8 = vmul.f32 1.442695, %v1433_v7 }
0x100b   : > { %1658 = vpow2.f32 %v1434_v8 }
0x1011   : > { %v1659_v9 = vpop.eup %1658 }
0x1012   : > { %v1436_v10 = vadd.f32 1.0, %v1659_v9 }
0x1014   : > { %1660 = vrcp.f32 %v1436_v10  ;;  %v1448_v14 = vand.u32 2147483648, %v1436_v10  ;;  %v1446_v16 = vand.u32 2147483647, %v1436_v10  ;;  %vm1442_vm5 = vweird.f32 %v1436_v10 }
0x1016   : > { %v1449_v18 = vor.u32 1.1754944e-38, %v1448_v14  ;;  %vm1447_vm7 = vcmp.eq.f32.partialorder %v1446_v16, 8.507059e+37 }
0x101a   : > { %v1661_v11 = vpop.eup %1660 }
0x101b   : > { %v1438_v12 = vmul.f32 %v1661_v11, %v1436_v10  ;;  %vm1443_vm4 = vweird.f32 %v1661_v11 }
0x101c   : > { %vm1444_vm6 = vmor %vm1442_vm5, %vm1443_vm4 }
0x101d   : > { %v1439_v13 = vsub.f32 1.0, %v1438_v12 }
0x101f   : > { %v1440_v15 = vmul.f32 %v1661_v11, %v1439_v13 }
0x1021   : > { %v1441_v17 = vadd.f32 %v1661_v11, %v1440_v15 }
0x1023   : > { %v1445_v19 = vsel %vm1444_vm6, %v1661_v11, %v1441_v17 }
0x1024   : > { %v1450_v20 = vsel %vm1447_vm7, %v1449_v18, %v1445_v19 }
0x1025   : > { %v1452_v22 = vmul.f32 %v1450_v20, %v1812_v4 }
0x1027   : > { %1454 = vst.msk [vmem:[%s657_s29] sm:$0xf] %vm1453_vm8, %v1452_v22 }
0x1028 PF: > { %s32_s23 = sadd.s32 1, %s1668_s23  }
0x1029   : > { %p29_p4 = scmp.ge.s32.totalorder %s32_s23, 4  }
0x102b   :  { %31 = sbr.rel (!%p29_p4) target bundleno = 6 (0x6), region = 148 }

// kernel: ext_summarizer_forward.2
= control target key start
LH: loop header
LB: loop body
LE: loop exit
PB: predicated region body
PF: predicated region fallthrough
CT: control target
= control target key end

     0   :  { %s2015_s21 = smov 0   ;;  %s2376_s0 = inlined_call_operand.vmem [shape: f32[2,16,32], index: 0, kind: input, shape index: {}]   ;;  %s2377_s1 = inlined_call_operand.vmem [shape: f32[2,1,16], index: 1, kind: input, shape index: {}]   ;;  %s2378_s2 = inlined_call_operand.vmem [shape: f32[1,32], index: 2, kind: input, shape index: {}]   ;;  %s2379_s3 = inlined_call_operand.vmem [shape: f32[1,32], index: 3, kind: input, shape index: {}]   ;;  %s2380_s4 = inlined_call_operand.vmem [shape: f32[2,32,96], index: 4, kind: input, shape index: {}]   ;;  %s2381_s5 = inlined_call_operand.vmem [shape: f32[2,1,96], index: 5, kind: input, shape index: {}]   ;;  %s2382_s6 = inlined_call_operand.vmem [shape: f32[2,32,32], index: 6, kind: input, shape index: {}]   ;;  %s2383_s7 = inlined_call_operand.vmem [shape: f32[2,1,32], index: 7, kind: input, shape index: {}, may-alias: {7,9,13,15}]   ;;  %s2384_s8 = inlined_call_operand.vmem [shape: f32[2,1,32], index: 8, kind: input, shape index: {}, may-alias: {8,14}]   ;;  %s2385_s9 = inlined_call_operand.vmem [shape: f32[2,1,32], index: 9, kind: input, shape index: {}, may-alias: {7,9,13,15}]   ;;  %s2386_s10 = inlined_call_operand.vmem [shape: f32[2,32,64], index: 10, kind: input, shape index: {}]   ;;  %s2387_s11 = inlined_call_operand.vmem [shape: f32[2,1,64], index: 11, kind: input, shape index: {}]   ;;  %s2388_s12 = inlined_call_operand.vmem [shape: f32[2,64,32], index: 12, kind: input, shape index: {}]   ;;  %s2389_s13 = inlined_call_operand.vmem [shape: f32[2,1,32], index: 13, kind: input, shape index: {}, may-alias: {7,9,13,15}]   ;;  %s2390_s14 = inlined_call_operand.vmem [shape: f32[2,1,32], index: 14, kind: input, shape index: {}, may-alias: {8,14}]   ;;  %s2391_s15 = inlined_call_operand.vmem [shape: f32[2,1,32], index: 15, kind: input, shape index: {}, may-alias: {7,9,13,15}]   ;;  %s2392_s16 = inlined_call_operand.vmem [shape: f32[2,16,32], index: 16, kind: output, shape index: {}]  }
   0x1   :  { %2396 = sst [smem:[#allocation2_spill]] %s2376_s0 }
   0x2 LB: > { %s1712_s22 = sadd.s32 4294967295, %s1922_s21   ;;  %p1716_p0 = scmp.ge.s32.totalorder %s1922_s21, 1  ;;  %s1922_s21 = sphi %s2015_s21, %s26_s21  }
   0x3   : > { %p470_p1 = scmp.lt.s32.totalorder %s1922_s21, 3 }
   0x5   : > { %p471_p2 = pnand %p1716_p0, %p470_p1 }
   0x6   : > { %p523_p3 = scmp.lt.s32.totalorder (!%p471_p2), %s1712_s22, 1  ;;  %s2397_s29 = sld [smem:[#allocation2_spill]] (!%p471_p2) }
   0x7   : > { %474 = sbr.rel (%p471_p2) target bundleno = 4166 (0x1046), region = 84  ;;  %s1925_s19 = smov (!%p471_p2), 96  }
   0x8   : > { %s2395_s20 = smov (!%p471_p2), 64   ;;  %s1927_s24 = smov (!%p471_p2), 112  }
   0x9   : > { %s1928_s28 = smov (!%p471_p2), 80   ;;  %s2394_s17 = smov (!%p471_p2), 48  }
   0xc   : > { %s2402_s22 = smov (!%p523_p3, %s1712_s22), 1  ;;  %vm540_vm0 = vcmask 261120   ;;  %v1924_v4 = vmov 32.0   ;;  %v606_v21 = vld [vmem:[%s2380_s4 + $0x18] sm:$0xff]  ;;  %v605_v22 = vld [vmem:[%s2380_s4 + $0x10] sm:$0xff]  ;;  %v604_v23 = vld [vmem:[%s2380_s4 + $0x8] sm:$0xff] }
   0xd   : > { %s2393_s23 = sshll.u32 %s2402_s22, 4  ;;  %s530_s26 = scalar_lea.vmem %s2377_s1, %s2402_s22  ;;  %1854 = vrcp.f32 %v1924_v4  ;;  %634 = vmatpush.msra.mxu0 %v606_v21  ;;  %v603_v24 = vld [vmem:[%s2380_s4] sm:$0xff]  ;;  %vm656_vm8 = vcmask 130048   ;;  %vm1033_vm15 = vcmask 523264  }
   0xe   : > { %s527_s30 = scalar_lea.vmem %s2397_s29, %s2393_s23  ;;  %v1836_v39 = vld [vmem:[%s2378_s2] ss:$0 sm:$0xff]  ;;  %s2400_s27 = sshll.u32 %s2402_s22, 4 }
   0xf   : > { %v536_v0 = vld [vmem:[%s527_s30] sm:$0xff]  ;;  %v537_v2 = vld [vmem:[%s527_s30 + $0x8] sm:$0xff]  ;;  %635 = vmatpush.msra.mxu0 %v605_v22  ;;  %s535_s30 = scalar_lea.vmem %s2392_s16, %s2400_s27 }
  0x10   : > { %v541_v1 = vsel %vm540_vm0, %v536_v0, 0.0  ;;  %v544_v3 = vsel %vm540_vm0, %v537_v2, 0.0  ;;  %v1837_v43 = vld [vmem:[%s2379_s3] ss:$0 sm:$0xff] }
  0x11   : > { %542 = vadd.xlane.f32.xlu0 %v541_v1  ;;  %636 = vmatpush.msra.mxu0 %v604_v23  ;;  %v1838_v54 = vld [vmem:[%s2381_s5] ss:$0 sm:$0xff] }
  0x13   : > { %v1855_v5 = vpop.eup %1854  ;;  %637 = vmatpush.msra.mxu0 %v603_v24 }
  0x14   : > { %v548_v6 = vmul.f32 32.0, %v1855_v5  ;;  %vm552_vm1 = vweird.f32 %v1855_v5 }
  0x16   : > { %v549_v7 = vsub.f32 1.0, %v548_v6 }
  0x18   : > { %v550_v8 = vmul.f32 %v1855_v5, %v549_v7 }
  0x19   : > { %545 = vadd.xlane.f32.xlu0 %v544_v3  ;;  %v2091_v3 = vld [vmem:[%s530_s26] ss:$0 sm:$0xff] }
  0x1a   : > { %v551_v9 = vadd.f32 %v1855_v5, %v550_v8 }
  0x1c   : > { %v2037_v10 = vsel %vm552_vm1, %v1855_v5, %v551_v9 }
  0x84   : > { %v543_v11 = vpop.xlane.xlu0 %542 }
  0x85   : > { %v554_v12 = vmul.f32 %v2037_v10, %v543_v11 }
  0x87   : > { %v556_v13 = vsub.f32 %v536_v0, %v554_v12 }
  0x89   : > { %v558_v14 = vmul.f32 %v556_v13, %v556_v13 }
  0x8b   : > { %v560_v15 = vsel %vm540_vm0, %v558_v14, 0.0 }
  0x8c   : > { %561 = vadd.xlane.f32.xlu1 %v560_v15  ;;  %v546_v16 = vpop.xlane.xlu0 %545 }
  0x8d   : > { %v555_v17 = vmul.f32 %v2037_v10, %v546_v16 }
  0x8f   : > { %v557_v18 = vsub.f32 %v537_v2, %v555_v17 }
  0x91   : > { %v559_v19 = vmul.f32 %v557_v18, %v557_v18 }
  0x93   : > { %v563_v20 = vsel %vm540_vm0, %v559_v19, 0.0 }
  0x94   : > { %564 = vadd.xlane.f32.xlu1 %v563_v20 }
  0xff   : > { %v562_v25 = vpop.xlane.xlu1 %561 }
 0x100   : > { %v566_v26 = vmul.f32 %v562_v25, %v2037_v10 }
 0x102   : > { %v568_v27 = vadd.f32 1e-12, %v566_v26 }
 0x104   : > { %1856 = vrsqrt.f32 %v568_v27  ;;  %vm576_vm3 = vweird.f32 %v568_v27 }
 0x107   : > { %v565_v28 = vpop.xlane.xlu1 %564 }
 0x108   : > { %v567_v29 = vmul.f32 %v565_v28, %v2037_v10 }
 0x10a   : > { %v1857_v30 = vpop.eup %1856  ;;  %v569_v31 = vadd.f32 1e-12, %v567_v29 }
 0x10b   : > { %v571_v32 = vmul.f32 %v1857_v30, %v568_v27  ;;  %vm577_vm2 = vweird.f32 %v1857_v30  ;;  %v609_v27 = vld [vmem:[%s2382_s6 + $0x8] sm:$0xff] }
 0x10c   : > { %1858 = vrsqrt.f32 %v569_v31  ;;  %vm578_vm4 = vmor %vm576_vm3, %vm577_vm2  ;;  %vm586_vm6 = vweird.f32 %v569_v31  ;;  %1799 = vmatpush.msra.mxu3 %v609_v27 }
 0x10d   : > { %v572_v33 = vmul.f32 %v1857_v30, %v571_v32 }
 0x10f   : > { %v573_v34 = vmul.f32 0.5, %v572_v33 }
 0x111   : > { %v574_v35 = vsub.f32 1.5, %v573_v34 }
 0x112   : > { %v1859_v36 = vpop.eup %1858 }
 0x113   : > { %v575_v37 = vmul.f32 %v1857_v30, %v574_v35  ;;  %v581_v38 = vmul.f32 %v1859_v36, %v569_v31  ;;  %vm587_vm5 = vweird.f32 %v1859_v36  ;;  %v608_v31 = vld [vmem:[%s2382_s6] sm:$0xff] }
 0x114   : > { %vm588_vm7 = vmor %vm586_vm6, %vm587_vm5  ;;  %1800 = vmatpush.msra.mxu3 %v608_v31 }
 0x115   : > { %v579_v40 = vsel %vm578_vm4, %v1857_v30, %v575_v37  ;;  %v582_v41 = vmul.f32 %v1859_v36, %v581_v38 }
 0x116   : > { %v590_v42 = vmul.f32 %v579_v40, %v556_v13 }
 0x117   : > { %v583_v44 = vmul.f32 0.5, %v582_v41 }
 0x118   : > { %v595_v45 = vmul.f32 %v1836_v39, %v590_v42 }
 0x119   : > { %v584_v46 = vsub.f32 1.5, %v583_v44 }
 0x11a   : > { %v2063_v47 = vadd.f32 %v1837_v43, %v595_v45 }
 0x11b   : > { %v585_v48 = vmul.f32 %v1859_v36, %v584_v46 }
 0x11c   : > { %1721 = vmatmul.msk.f32.vlgmr.msra.gmra.mxu0 %vm540_vm0, %v2063_v47 }
 0x11d   : > { %v589_v49 = vsel %vm588_vm7, %v1859_v36, %v585_v48 }
 0x11e   : > { %v591_v50 = vmul.f32 %v589_v49, %v557_v18 }
 0x120   : > { %v596_v51 = vmul.f32 %v1836_v39, %v591_v50 }
 0x122   : > { %v2067_v52 = vadd.f32 %v1837_v43, %v596_v51  ;;  %v611_v51 = vld [vmem:[%s2382_s6 + $0x18] sm:$0xff] }
 0x124   : > { %1722 = vmatmul.msk.f32.gmra.mxu0 %vm540_vm0, %v2067_v52 }
 0x199   : > { %v639_v53 = vpop.f32.mrf.mxu0 }
 0x19a   : > { %v640_v57 = vadd.f32 %v1838_v54, %v639_v53 }
 0x19c   : > { %v645_v59 = vmul.f32 0.25, %v640_v57 }
 0x1a1   : > { %v642_v55 = vpop.f32.mrf.mxu0 }
 0x1a2   : > { %v643_v56 = vadd.f32 %v1838_v54, %v642_v55 }
 0x1a4   : > { %654 = vrot.lane.b32.xlu2 %v643_v56, %s1925_s19  ;;  %v2076_v58 = vpack.i.bf16 %v640_v57, %v643_v56  ;;  %v646_v60 = vmul.f32 0.25, %v643_v56 }
 0x1ac   : > { %652 = vrot.lane.b32.xlu2 %v640_v57, %s1925_s19 }
 0x1b4   : > { %1816 = vrot.lane.b32.xlu2 %v2076_v58, %s2395_s20 }
 0x1bc   : > { %781 = vrot.lane.b32.xlu2 %v645_v59, %s1927_s24 }
 0x1c4   : > { %783 = vrot.lane.b32.xlu2 %v646_v60, %s1927_s24 }
 0x1fe   : > { %v655_v61 = vpop.permute.xlu2 %654 }
 0x1ff   : > { %1723 = vmatpush.xpose.msk.msra.mxu1 %vm656_vm8, %v655_v61 }
 0x206   : > { %v653_v62 = vpop.permute.xlu2 %652 }
 0x207   : > { %1724 = vmatpush.xpose.msk.msra.mxu1 %vm656_vm8, %v653_v62  ;;  %v610_v62 = vld [vmem:[%s2382_s6 + $0x10] sm:$0xff] }
 0x20a   : > { %1725 = vmatmul.msk.f32.vlgmr.msra.gmra.mxu1 %vm656_vm8, %v645_v59 }
 0x20b   : > { %767 = vmatpush.msrb.mxu1 %v609_v27  ;;  %v966_v27 = vld [vmem:[%s2386_s10] sm:$0xff] }
 0x20d   : > { %768 = vmatpush.msrb.mxu1 %v608_v31 }
 0x20e   : > { %v1817_v63 = vpop.permute.xlu2 %1816 }
 0x20f   : > { %v1818_v0 = vunpack.i.l.bf16 %v1817_v63  ;;  %v1819_v1 = vunpack.i.h.bf16 %v1817_v63 }
 0x211   : > { %738 = vmatpush.msrb.mxu0 %v1818_v0  ;;  %1797 = vmatpush.msra.mxu2 %v1818_v0 }
 0x212   : > { %1726 = vmatmul.msk.f32.gmra.mxu1 %vm656_vm8, %v646_v60 }
 0x213   : > { %739 = vmatpush.msrb.mxu0 %v1819_v1  ;;  %1798 = vmatpush.msra.mxu2 %v1819_v1 }
 0x215   : > { %897 = vmatpush.msra.mxu0 %v611_v51 }
 0x216   : > { %v782_v25 = vpop.permute.xlu2 %781 }
 0x217   : > { %898 = vmatpush.msra.mxu0 %v610_v62  ;;  %v1024_v62 = vld [vmem:[%s2388_s12 + $0x18] sm:$0xff] }
 0x21e   : > { %v784_v26 = vpop.permute.xlu2 %783 }
 0x287   : > { %v684_v2 = vpop.f32.mrf.mxu1 }
 0x288   : > { %v685_v7 = vadd.f32 %v2091_v3, %v684_v2 }
 0x28a   : > { %v690_v8 = vsel %vm656_vm8, %v685_v7, -inf }
 0x28f   : > { %v687_v4 = vpop.f32.mrf.mxu1 }
 0x290   : > { %v688_v5 = vadd.f32 %v2091_v3, %v687_v4  ;;  %v1839_v4 = vld [vmem:[%s2383_s7] ss:$0 sm:$0xff] }
 0x292   : > { %v693_v6 = vsel %vm656_vm8, %v688_v5, -inf }
 0x293   : > { %694 = vmax.xlane.f32.xlu0 %v693_v6 }
 0x2a7   : > { %787 = vrot.lane.b32.xlu0 %v643_v56, %s1928_s28 }
 0x2d1   : > { %691 = vmax.xlane.f32.xlu0 %v690_v8 }
 0x306   : > { %v695_v9 = vpop.xlane.xlu0 %694 }
 0x307   : > { %v697_v11 = vsub.f32 %v688_v5, %v695_v9 }
 0x309   : > { %v700_v12 = vmul.f32 1.442695, %v697_v11 }
 0x30b   : > { %1860 = vpow2.f32 %v700_v12 }
 0x311   : > { %v1861_v13 = vpop.eup %1860 }
 0x312   : > { %v705_v14 = vsel %vm656_vm8, %v1861_v13, 0.0 }
 0x313   : > { %706 = vadd.xlane.f32.xlu1 %v705_v14 }
 0x319   : > { %v788_v15 = vpop.permute.xlu0 %787 }
 0x31a   : > { %1731 = vmatpush.xpose.msk.msrb.mxu2 %vm656_vm8, %v788_v15 }
 0x32c   : > { %785 = vrot.lane.b32.xlu1 %v640_v57, %s1928_s28 }
 0x344   : > { %v692_v16 = vpop.xlane.xlu0 %691 }
 0x345   : > { %v696_v17 = vsub.f32 %v685_v7, %v692_v16 }
 0x347   : > { %v698_v18 = vmul.f32 1.442695, %v696_v17 }
 0x349   : > { %1862 = vpow2.f32 %v698_v18 }
 0x34f   : > { %v1863_v19 = vpop.eup %1862 }
 0x350   : > { %v702_v20 = vsel %vm656_vm8, %v1863_v19, 0.0 }
 0x351   : > { %703 = vadd.xlane.f32.xlu0 %v702_v20 }
 0x386   : > { %v707_v21 = vpop.xlane.xlu1 %706 }
 0x387   : > { %1864 = vrcp.f32 %v707_v21 }
 0x38d   : > { %v1865_v22 = vpop.eup %1864 }
 0x38e   : > { %v711_v23 = vmul.f32 %v1865_v22, %v1861_v13 }
 0x390   : > { %1728 = vmatmul.msk.f32.vlgmr.msra.gmra.mxu2 %vm656_vm8, %v711_v23 }
 0x39e   : > { %v786_v24 = vpop.permute.xlu1 %785 }
 0x39f   : > { %1732 = vmatpush.xpose.msk.msrb.mxu2 %vm656_vm8, %v786_v24 }
 0x3a2   : > { %1733 = vmatmul.msk.f32.vlgmr.msrb.gmra.mxu2 %vm656_vm8, %v782_v25  ;;  %v968_v25 = vld [vmem:[%s2386_s10 + $0x10] sm:$0xff] }
 0x3aa   : > { %1734 = vmatmul.msk.f32.gmra.mxu2 %vm656_vm8, %v784_v26  ;;  %v967_v26 = vld [vmem:[%s2386_s10 + $0x8] sm:$0xff] }
 0x3c4   : > { %v704_v28 = vpop.xlane.xlu0 %703 }
 0x3c5   : > { %1866 = vrcp.f32 %v704_v28 }
 0x3cb   : > { %v1867_v29 = vpop.eup %1866 }
 0x3cc   : > { %v710_v30 = vmul.f32 %v1867_v29, %v1863_v19 }
 0x3ce   : > { %1727 = vmatmul.msk.f32.vlgmr.msrb.gmra.mxu0 %vm656_vm8, %v710_v30 }
 0x413   : > { %v744_v32 = vpop.f32.mrf.mxu2 }
 0x414   : > { %1730 = vmatmul.msk.f32.vlgmr.msra.gmra.mxu3 %vm656_vm8, %v744_v32 }
 0x425   : > { %v814_v33 = vpop.f32.mrf.mxu2 }
 0x426   : > { %v815_v34 = vadd.f32 %v2091_v3, %v814_v33 }
 0x428   : > { %v820_v35 = vsel %vm656_vm8, %v815_v34, -inf }
 0x429   : > { %821 = vmax.xlane.f32.xlu2 %v820_v35 }
 0x42d   : > { %v817_v36 = vpop.f32.mrf.mxu2 }
 0x42e   : > { %v818_v37 = vadd.f32 %v2091_v3, %v817_v36 }
 0x430   : > { %v823_v38 = vsel %vm656_vm8, %v818_v37, -inf }
 0x431   : > { %824 = vmax.xlane.f32.xlu1 %v823_v38 }
 0x44b   : > { %v741_v39 = vpop.f32.mrf.mxu0 }
 0x44c   : > { %1729 = vmatmul.msk.f32.vlgmr.msrb.gmra.mxu1 %vm656_vm8, %v741_v39 }
 0x497   : > { %v773_v63 = vpop.f32.mrf.mxu3 }
 0x498   : > { %v780_v11 = vadd.f32 %v1839_v4, %v773_v63  ;;  %v1023_v63 = vld [vmem:[%s2388_s12 + $0x10] sm:$0xff] }
 0x49c   : > { %v822_v40 = vpop.xlane.xlu2 %821 }
 0x49d   : > { %v826_v41 = vsub.f32 %v815_v34, %v822_v40 }
 0x49f   : > { %v828_v42 = vmul.f32 1.442695, %v826_v41 }
 0x4a1   : > { %1868 = vpow2.f32 %v828_v42  ;;  %v1840_v42 = vld [vmem:[%s2384_s8] ss:$0 sm:$0xff] }
 0x4a4   : > { %v825_v43 = vpop.xlane.xlu1 %824 }
 0x4a5   : > { %v827_v44 = vsub.f32 %v818_v37, %v825_v43 }
 0x4a7   : > { %v1869_v45 = vpop.eup %1868  ;;  %v830_v46 = vmul.f32 1.442695, %v827_v44 }
 0x4a8   : > { %v832_v48 = vsel %vm656_vm8, %v1869_v45, 0.0 }
 0x4a9   : > { %1870 = vpow2.f32 %v830_v46  ;;  %833 = vadd.xlane.f32.xlu2 %v832_v48  ;;  %v1841_v46 = vld [vmem:[%s2385_s9] ss:$0 sm:$0xff] }
 0x4af   : > { %v1871_v49 = vpop.eup %1870 }
 0x4b0   : > { %v835_v50 = vsel %vm656_vm8, %v1871_v49, 0.0 }
 0x4b1   : > { %836 = vadd.xlane.f32.xlu1 %v835_v50 }
 0x4c1   : > { %1821 = vrot.lane.b32.xlu2 %v2076_v58, %s2394_s17 }
 0x4c9   : > { %v770_v2 = vpop.f32.mrf.mxu1 }
 0x4ca   : > { %v779_v5 = vadd.f32 %v1839_v4, %v770_v2  ;;  %v1842_v2 = vld [vmem:[%s2387_s11] ss:$0 sm:$0xff] }
 0x51c   : > { %v834_v53 = vpop.xlane.xlu2 %833 }
 0x51d   : > { %1872 = vrcp.f32 %v834_v53 }
 0x523   : > { %v1873_v56 = vpop.eup %1872 }
 0x524   : > { %v837_v54 = vpop.xlane.xlu1 %836  ;;  %v1822_v55 = vpop.permute.xlu2 %1821  ;;  %v840_v60 = vmul.f32 %v1873_v56, %v1869_v45 }
 0x525   : > { %v1823_v57 = vunpack.i.l.bf16 %v1822_v55  ;;  %1874 = vrcp.f32 %v837_v54  ;;  %v1824_v59 = vunpack.i.h.bf16 %v1822_v55 }
 0x527   : > { %868 = vmatpush.msrb.mxu3 %v1823_v57 }
 0x529   : > { %869 = vmatpush.msrb.mxu3 %v1824_v59  ;;  %v1028_v59 = vld [vmem:[%s2388_s12 + $0x38] sm:$0xff] }
 0x52a   : > { %1735 = vmatmul.msk.f32.vlgmr.msrb.gmra.mxu3 %vm656_vm8, %v840_v60  ;;  %1048 = vmatpush.msra.mxu2 %v1028_v59  ;;  %v1027_v60 = vld [vmem:[%s2388_s12 + $0x30] sm:$0xff] }
 0x52b   : > { %v1875_v61 = vpop.eup %1874 }
 0x52c   : > { %v841_v58 = vmul.f32 %v1875_v61, %v1871_v49  ;;  %1049 = vmatpush.msra.mxu2 %v1027_v60  ;;  %v1026_v61 = vld [vmem:[%s2388_s12 + $0x28] sm:$0xff] }
 0x52e   : > { %1050 = vmatpush.msra.mxu2 %v1026_v61 }
 0x532   : > { %1736 = vmatmul.msk.f32.gmra.mxu3 %vm656_vm8, %v841_v58  ;;  %v1025_v58 = vld [vmem:[%s2388_s12 + $0x20] sm:$0xff] }
 0x533   : > { %1051 = vmatpush.msra.mxu2 %v1025_v58 }
 0x535   : > { %1052 = vmatpush.msra.mxu2 %v1024_v62 }
 0x537   : > { %1053 = vmatpush.msra.mxu2 %v1023_v63 }
 0x5ad   : > { %v871_v0 = vpop.f32.mrf.mxu3 }
 0x5ae   : > { %1737 = vmatmul.msk.f32.vlgmr.msra.gmra.mxu0 %vm656_vm8, %v871_v0  ;;  %v1022_v0 = vld [vmem:[%s2388_s12 + $0x8] sm:$0xff] }
 0x5af   : > { %1054 = vmatpush.msra.mxu2 %v1022_v0  ;;  %v1844_v0 = vld [vmem:[%s2390_s14] ss:$0 sm:$0xff] }
 0x5b5   : > { %v874_v1 = vpop.f32.mrf.mxu3 }
 0x5b6   : > { %1738 = vmatmul.msk.f32.gmra.mxu0 %vm656_vm8, %v874_v1  ;;  %v1021_v1 = vld [vmem:[%s2388_s12] sm:$0xff] }
 0x5b7   : > { %1055 = vmatpush.msra.mxu2 %v1021_v1 }
 0x62b   : > { %v900_v6 = vpop.f32.mrf.mxu0 }
 0x62c   : > { %v906_v7 = vadd.f32 %v900_v6, %v779_v5 }
 0x62e   : > { %v908_v8 = vadd.f32 %v906_v7, %v2063_v47 }
 0x630   : > { %v912_v9 = vsel %vm540_vm0, %v908_v8, 0.0 }
 0x631   : > { %913 = vadd.xlane.f32.xlu0 %v912_v9 }
 0x633   : > { %v903_v12 = vpop.f32.mrf.mxu0 }
 0x634   : > { %v907_v13 = vadd.f32 %v903_v12, %v780_v11 }
 0x636   : > { %v909_v14 = vadd.f32 %v907_v13, %v2067_v52  ;;  %v969_v52 = vld [vmem:[%s2386_s10 + $0x18] sm:$0xff] }
 0x637   : > { %992 = vmatpush.msra.mxu1 %v969_v52 }
 0x638   : > { %v915_v15 = vsel %vm540_vm0, %v909_v14, 0.0 }
 0x639   : > { %916 = vadd.xlane.f32.xlu1 %v915_v15  ;;  %993 = vmatpush.msra.mxu1 %v968_v25  ;;  %v1843_v25 = vld [vmem:[%s2389_s13] ss:$0 sm:$0xff] }
 0x63b   : > { %994 = vmatpush.msra.mxu1 %v967_v26 }
 0x63d   : > { %995 = vmatpush.msra.mxu1 %v966_v27 }
 0x6a4   : > { %v914_v16 = vpop.xlane.xlu0 %913 }
 0x6a5   : > { %v918_v17 = vmul.f32 %v914_v16, %v2037_v10 }
 0x6a7   : > { %v920_v18 = vsub.f32 %v908_v8, %v918_v17 }
 0x6a9   : > { %v922_v19 = vmul.f32 %v920_v18, %v920_v18 }
 0x6ab   : > { %v924_v20 = vsel %vm540_vm0, %v922_v19, 0.0 }
 0x6ac   : > { %v917_v21 = vpop.xlane.xlu1 %916  ;;  %925 = vadd.xlane.f32.xlu0 %v924_v20 }
 0x6ad   : > { %v919_v47 = vmul.f32 %v917_v21, %v2037_v10 }
 0x6af   : > { %v921_v22 = vsub.f32 %v909_v14, %v919_v47 }
 0x6b1   : > { %v923_v23 = vmul.f32 %v921_v22, %v921_v22 }
 0x6b3   : > { %v927_v24 = vsel %vm540_vm0, %v923_v23, 0.0 }
 0x6b4   : > { %928 = vadd.xlane.f32.xlu1 %v927_v24 }
 0x71f   : > { %v926_v28 = vpop.xlane.xlu0 %925 }
 0x720   : > { %v930_v29 = vmul.f32 %v926_v28, %v2037_v10 }
 0x722   : > { %v932_v30 = vadd.f32 1e-12, %v930_v29 }
 0x724   : > { %1876 = vrsqrt.f32 %v932_v30  ;;  %vm940_vm10 = vweird.f32 %v932_v30 }
 0x727   : > { %v929_v31 = vpop.xlane.xlu1 %928 }
 0x728   : > { %v931_v32 = vmul.f32 %v929_v31, %v2037_v10 }
 0x72a   : > { %v1877_v33 = vpop.eup %1876  ;;  %v933_v34 = vadd.f32 1e-12, %v931_v32 }
 0x72b   : > { %v935_v35 = vmul.f32 %v1877_v33, %v932_v30  ;;  %vm941_vm9 = vweird.f32 %v1877_v33 }
 0x72c   : > { %1878 = vrsqrt.f32 %v933_v34  ;;  %vm942_vm11 = vmor %vm940_vm10, %vm941_vm9  ;;  %vm950_vm13 = vweird.f32 %v933_v34 }
 0x72d   : > { %v936_v36 = vmul.f32 %v1877_v33, %v935_v35 }
 0x72f   : > { %v937_v37 = vmul.f32 0.5, %v936_v36 }
 0x731   : > { %v938_v38 = vsub.f32 1.5, %v937_v37 }
 0x732   : > { %v1879_v39 = vpop.eup %1878 }
 0x733   : > { %v939_v40 = vmul.f32 %v1877_v33, %v938_v38  ;;  %v945_v41 = vmul.f32 %v1879_v39, %v933_v34  ;;  %vm951_vm12 = vweird.f32 %v1879_v39 }
 0x734   : > { %vm952_vm14 = vmor %vm950_vm13, %vm951_vm12 }
 0x735   : > { %v943_v43 = vsel %vm942_vm11, %v1877_v33, %v939_v40  ;;  %v946_v44 = vmul.f32 %v1879_v39, %v945_v41 }
 0x736   : > { %v954_v45 = vmul.f32 %v943_v43, %v920_v18 }
 0x737   : > { %v947_v48 = vmul.f32 0.5, %v946_v44  ;;  %v1746_v44 = vld [vmem:[%s2380_s4 + $0x38] sm:$0xff] }
 0x738   : > { %v959_v49 = vmul.f32 %v1840_v42, %v954_v45  ;;  %1156 = vmatpush.msra.mxu3 %v1746_v44  ;;  %v1745_v45 = vld [vmem:[%s2380_s4 + $0x30] sm:$0xff] }
 0x739   : > { %v948_v50 = vsub.f32 1.5, %v947_v48  ;;  %v1743_v48 = vld [vmem:[%s2380_s4 + $0x20] sm:$0xff] }
 0x73a   : > { %v964_v51 = vadd.f32 %v1841_v46, %v959_v49  ;;  %1157 = vmatpush.msra.mxu3 %v1745_v45 }
 0x73b   : > { %v949_v53 = vmul.f32 %v1879_v39, %v948_v50 }
 0x73c   : > { %1739 = vmatmul.msk.f32.vlgmr.msra.gmra.mxu1 %vm540_vm0, %v964_v51 }
 0x73d   : > { %v953_v54 = vsel %vm952_vm14, %v1879_v39, %v949_v53 }
 0x73e   : > { %v955_v55 = vmul.f32 %v953_v54, %v921_v22 }
 0x740   : > { %v960_v56 = vmul.f32 %v1840_v42, %v955_v55 }
 0x742   : > { %v965_v57 = vadd.f32 %v1841_v46, %v960_v56  ;;  %v1744_v46 = vld [vmem:[%s2380_s4 + $0x28] sm:$0xff] }
 0x743   : > { %1158 = vmatpush.msra.mxu3 %v1744_v46 }
 0x744   : > { %1740 = vmatmul.msk.f32.gmra.mxu1 %vm540_vm0, %v965_v57 }
 0x745   : > { %1159 = vmatpush.msra.mxu3 %v1743_v48 }
 0x7b9   : > { %v997_v4 = vpop.f32.mrf.mxu1 }
 0x7ba   : > { %v998_v5 = vadd.f32 %v1842_v2, %v997_v4 }
 0x7bc   : > { %v1005_v6 = vmul.f32 0.044715, %v998_v5  ;;  %v1003_v20 = vmul.f32 0.5, %v998_v5 }
 0x7be   : > { %v1007_v7 = vmul.f32 %v1005_v6, %v998_v5 }
 0x7c0   : > { %v1009_v8 = vmul.f32 %v1007_v7, %v998_v5 }
 0x7c1   : > { %v1000_v9 = vpop.f32.mrf.mxu1 }
 0x7c2   : > { %v1011_v11 = vadd.f32 %v1009_v8, %v998_v5  ;;  %v1001_v12 = vadd.f32 %v1842_v2, %v1000_v9  ;;  %v1845_v5 = vld [vmem:[%s2391_s15] ss:$0 sm:$0xff] }
 0x7c4   : > { %v1013_v13 = vmul.f32 0.7978846, %v1011_v11  ;;  %v1006_v14 = vmul.f32 0.044715, %v1001_v12  ;;  %v1004_v23 = vmul.f32 0.5, %v1001_v12 }
 0x7c6   : > { %1880 = vtanh.f32 %v1013_v13  ;;  %v1008_v15 = vmul.f32 %v1006_v14, %v1001_v12 }
 0x7c8   : > { %v1010_v16 = vmul.f32 %v1008_v15, %v1001_v12 }
 0x7ca   : > { %v1012_v17 = vadd.f32 %v1010_v16, %v1001_v12  ;;  %v1846_v16 = vld [vmem:[%s2381_s5 + $0x1] ss:$0 sm:$0xff] }
 0x7cc   : > { %v1881_v18 = vpop.eup %1880  ;;  %v1014_v19 = vmul.f32 0.7978846, %v1012_v17 }
 0x7cd   : > { %v1017_v21 = vadd.f32 1.0, %v1881_v18 }
 0x7ce   : > { %1882 = vtanh.f32 %v1014_v19 }
 0x7cf   : > { %v1019_v47 = vmul.f32 %v1017_v21, %v1003_v20 }
 0x7d1   : > { %1741 = vmatmul.msk.f32.vlgmr.msra.gmra.mxu2 %vm1033_vm15, %v1019_v47 }
 0x7d4   : > { %v1883_v22 = vpop.eup %1882 }
 0x7d5   : > { %v1018_v24 = vadd.f32 1.0, %v1883_v22 }
 0x7d7   : > { %v1020_v52 = vmul.f32 %v1018_v24, %v1004_v23 }
 0x7d9   : > { %1742 = vmatmul.msk.f32.gmra.mxu2 %vm1033_vm15, %v1020_v52 }
 0x854   : > { %v1057_v26 = vpop.f32.mrf.mxu2 }
 0x855   : > { %v1058_v27 = vadd.f32 %v1843_v25, %v1057_v26 }
 0x857   : > { %v1063_v28 = vadd.f32 %v1058_v27, %v964_v51 }
 0x859   : > { %v1067_v29 = vsel %vm540_vm0, %v1063_v28, 0.0 }
 0x85a   : > { %1068 = vadd.xlane.f32.xlu0 %v1067_v29 }
 0x85c   : > { %v1060_v30 = vpop.f32.mrf.mxu2 }
 0x85d   : > { %v1061_v31 = vadd.f32 %v1843_v25, %v1060_v30 }
 0x85f   : > { %v1064_v32 = vadd.f32 %v1061_v31, %v965_v57 }
 0x861   : > { %v1070_v33 = vsel %vm540_vm0, %v1064_v32, 0.0 }
 0x862   : > { %1071 = vadd.xlane.f32.xlu2 %v1070_v33 }
 0x8cd   : > { %v1069_v34 = vpop.xlane.xlu0 %1068 }
 0x8ce   : > { %v1073_v35 = vmul.f32 %v1069_v34, %v2037_v10 }
 0x8d0   : > { %v1075_v36 = vsub.f32 %v1063_v28, %v1073_v35 }
 0x8d2   : > { %v1077_v37 = vmul.f32 %v1075_v36, %v1075_v36 }
 0x8d4   : > { %v1079_v38 = vsel %vm540_vm0, %v1077_v37, 0.0 }
 0x8d5   : > { %v1072_v39 = vpop.xlane.xlu2 %1071  ;;  %1080 = vadd.xlane.f32.xlu1 %v1079_v38 }
 0x8d6   : > { %v1074_v40 = vmul.f32 %v1072_v39, %v2037_v10 }
 0x8d8   : > { %v1076_v41 = vsub.f32 %v1064_v32, %v1074_v40 }
 0x8da   : > { %v1078_v42 = vmul.f32 %v1076_v41, %v1076_v41 }
 0x8dc   : > { %v1082_v43 = vsel %vm540_vm0, %v1078_v42, 0.0 }
 0x8dd   : > { %1083 = vadd.xlane.f32.xlu0 %v1082_v43 }
 0x948   : > { %v1081_v49 = vpop.xlane.xlu1 %1080 }
 0x949   : > { %v1085_v50 = vmul.f32 %v1081_v49, %v2037_v10 }
 0x94b   : > { %v1087_v51 = vadd.f32 1e-12, %v1085_v50 }
 0x94d   : > { %1884 = vrsqrt.f32 %v1087_v51  ;;  %vm1095_vm2 = vweird.f32 %v1087_v51 }
 0x950   : > { %v1084_v53 = vpop.xlane.xlu0 %1083 }
 0x951   : > { %v1086_v54 = vmul.f32 %v1084_v53, %v2037_v10 }
 0x953   : > { %v1885_v55 = vpop.eup %1884  ;;  %v1088_v56 = vadd.f32 1e-12, %v1086_v54 }
 0x954   : > { %v1090_v57 = vmul.f32 %v1885_v55, %v1087_v51  ;;  %vm1096_vm1 = vweird.f32 %v1885_v55 }
 0x955   : > { %1886 = vrsqrt.f32 %v1088_v56  ;;  %vm1097_vm3 = vmor %vm1095_vm2, %vm1096_vm1  ;;  %vm1105_vm5 = vweird.f32 %v1088_v56 }
 0x956   : > { %v1091_v59 = vmul.f32 %v1885_v55, %v1090_v57 }
 0x958   : > { %v1092_v60 = vmul.f32 0.5, %v1091_v59 }
 0x95a   : > { %v1093_v61 = vsub.f32 1.5, %v1092_v60 }
 0x95b   : > { %v1887_v58 = vpop.eup %1886 }
 0x95c   : > { %v1094_v62 = vmul.f32 %v1885_v55, %v1093_v61  ;;  %v1100_v63 = vmul.f32 %v1887_v58, %v1088_v56  ;;  %vm1106_vm4 = vweird.f32 %v1887_v58 }
 0x95d   : > { %vm1107_vm6 = vmor %vm1105_vm5, %vm1106_vm4 }
 0x95e   : > { %v1098_v1 = vsel %vm1097_vm3, %v1885_v55, %v1094_v62  ;;  %v1101_v2 = vmul.f32 %v1887_v58, %v1100_v63 }
 0x95f   : > { %v1109_v4 = vmul.f32 %v1098_v1, %v1075_v36 }
 0x960   : > { %v1102_v6 = vmul.f32 0.5, %v1101_v2 }
 0x961   : > { %v1114_v7 = vmul.f32 %v1844_v0, %v1109_v4 }
 0x962   : > { %v1103_v8 = vsub.f32 1.5, %v1102_v6 }
 0x963   : > { %v2224_v9 = vadd.f32 %v1845_v5, %v1114_v7 }
 0x964   : > { %v1104_v11 = vmul.f32 %v1887_v58, %v1103_v8 }
 0x965   : > { %1753 = vmatmul.msk.f32.vlgmr.msra.gmra.mxu3 %vm540_vm0, %v2224_v9 }
 0x966   : > { %v1108_v12 = vsel %vm1107_vm6, %v1887_v58, %v1104_v11 }
 0x967   : > { %v1110_v13 = vmul.f32 %v1108_v12, %v1076_v41 }
 0x969   : > { %v1115_v14 = vmul.f32 %v1844_v0, %v1110_v13 }
 0x96b   : > { %v2228_v15 = vadd.f32 %v1845_v5, %v1115_v14  ;;  %v1749_v5 = vld [vmem:[%s2382_s6 + $0x28] sm:$0xff] }
 0x96c   : > { %1285 = vmatpush.msrb.mxu2 %v1749_v5 }
 0x96d   : > { %1754 = vmatmul.msk.f32.gmra.mxu3 %vm540_vm0, %v2228_v15 }
 0x9e8   : > { %v1161_v17 = vpop.f32.mrf.mxu3 }
 0x9e9   : > { %v1162_v18 = vadd.f32 %v1846_v16, %v1161_v17 }
 0x9eb   : > { %1171 = vrot.lane.b32.xlu0 %v1162_v18, %s1925_s19  ;;  %v1167_v22 = vmul.f32 0.25, %v1162_v18 }
 0x9f0   : > { %v1164_v19 = vpop.f32.mrf.mxu3 }
 0x9f1   : > { %v1165_v20 = vadd.f32 %v1846_v16, %v1164_v19 }
 0x9f3   : > { %1305 = vrot.lane.b32.xlu0 %v1165_v20, %s1928_s28  ;;  %1173 = vrot.lane.b32.xlu1 %v1165_v20, %s1925_s19  ;;  %v1168_v21 = vmul.f32 0.25, %v1165_v20  ;;  %v2238_v47 = vpack.i.bf16 %v1162_v18, %v1165_v20  ;;  %s2398_s19 = smov 64   ;;  %v1748_v20 = vld [vmem:[%s2382_s6 + $0x20] sm:$0xff] }
 0x9f4   : > { %1286 = vmatpush.msrb.mxu2 %v1748_v20  ;;  %v1786_v20 = vld [vmem:[%s2388_s12 + $0x70] sm:$0xff] }
 0x9f5   : > { %1301 = vrot.lane.b32.xlu2 %v1168_v21, %s1927_s24 }
 0x9fb   : > { %1299 = vrot.lane.b32.xlu0 %v1167_v22, %s1927_s24  ;;  %1303 = vrot.lane.b32.xlu1 %v1162_v18, %s1928_s28  ;;  %s2399_s24 = smov 48  }
 0xa4f   : > { %v1302_v27 = vpop.permute.xlu2 %1301 }
 0xa5d   : > { %v1172_v23 = vpop.permute.xlu0 %1171 }
 0xa65   : > { %v1174_v24 = vpop.permute.xlu1 %1173  ;;  %v1306_v52 = vpop.permute.xlu0 %1305 }
 0xa66   : > { %1755 = vmatpush.xpose.msk.msrb.mxu0 %vm656_vm8, %v1174_v24  ;;  %1763 = vmatpush.xpose.msk.msrb.mxu3 %vm656_vm8, %v1306_v52 }
 0xa6a   : > { %1756 = vmatpush.xpose.msk.msrb.mxu0 %vm656_vm8, %v1172_v23 }
 0xa6d   : > { %v1304_v25 = vpop.permute.xlu1 %1303  ;;  %1757 = vmatmul.msk.f32.vlgmr.msrb.gmra.mxu0 %vm656_vm8, %v1167_v22  ;;  %v1300_v26 = vpop.permute.xlu0 %1299 }
 0xa6e   : > { %1764 = vmatpush.xpose.msk.msrb.mxu3 %vm656_vm8, %v1304_v25 }
 0xa71   : > { %1765 = vmatmul.msk.f32.vlgmr.msrb.gmra.mxu3 %vm656_vm8, %v1300_v26  ;;  %v1847_v26 = vld [vmem:[%s2383_s7 + $0x1] ss:$0 sm:$0xff] }
 0xa75   : > { %1758 = vmatmul.msk.f32.gmra.mxu0 %vm656_vm8, %v1168_v21  ;;  %v1751_v21 = vld [vmem:[%s2382_s6 + $0x38] sm:$0xff] }
 0xa79   : > { %1766 = vmatmul.msk.f32.gmra.mxu3 %vm656_vm8, %v1302_v27 }
 0xaea   : > { %v1202_v28 = vpop.f32.mrf.mxu0 }
 0xaeb   : > { %v1203_v29 = vadd.f32 %v2091_v3, %v1202_v28 }
 0xaed   : > { %v1208_v30 = vsel %vm656_vm8, %v1203_v29, -inf }
 0xaee   : > { %1209 = vmax.xlane.f32.xlu1 %v1208_v30 }
 0xaf2   : > { %v1205_v31 = vpop.f32.mrf.mxu0 }
 0xaf3   : > { %v1206_v32 = vadd.f32 %v2091_v3, %v1205_v31 }
 0xaf4   : > { %v1332_v33 = vpop.f32.mrf.mxu3 }
 0xaf5   : > { %v1333_v34 = vadd.f32 %v2091_v3, %v1332_v33  ;;  %v1211_v35 = vsel %vm656_vm8, %v1206_v32, -inf }
 0xaf6   : > { %1212 = vmax.xlane.f32.xlu0 %v1211_v35 }
 0xaf7   : > { %v1338_v36 = vsel %vm656_vm8, %v1333_v34, -inf }
 0xaf8   : > { %1339 = vmax.xlane.f32.xlu2 %v1338_v36 }
 0xafc   : > { %v1335_v37 = vpop.f32.mrf.mxu3 }
 0xafd   : > { %v1336_v38 = vadd.f32 %v2091_v3, %v1335_v37 }
 0xaff   : > { %v1341_v39 = vsel %vm656_vm8, %v1336_v38, -inf }
 0xb00   : > { %1342 = vmax.xlane.f32.xlu1 %v1341_v39 }
 0xb19   : > { %1826 = vrot.lane.b32.xlu1 %v2238_v47, %s2398_s19 }
 0xb61   : > { %v1210_v40 = vpop.xlane.xlu1 %1209 }
 0xb62   : > { %v1214_v41 = vsub.f32 %v1203_v29, %v1210_v40 }
 0xb64   : > { %v1216_v42 = vmul.f32 1.442695, %v1214_v41 }
 0xb66   : > { %1888 = vpow2.f32 %v1216_v42 }
 0xb69   : > { %v1213_v43 = vpop.xlane.xlu0 %1212 }
 0xb6a   : > { %v1215_v44 = vsub.f32 %v1206_v32, %v1213_v43 }
 0xb6b   : > { %v1340_v45 = vpop.xlane.xlu2 %1339 }
 0xb6c   : > { %v1889_v46 = vpop.eup %1888  ;;  %v1218_v48 = vmul.f32 1.442695, %v1215_v44  ;;  %v1344_v49 = vsub.f32 %v1333_v34, %v1340_v45 }
 0xb6d   : > { %v1220_v50 = vsel %vm656_vm8, %v1889_v46, 0.0 }
 0xb6e   : > { %1890 = vpow2.f32 %v1218_v48  ;;  %v1346_v3 = vmul.f32 1.442695, %v1344_v49  ;;  %1221 = vadd.xlane.f32.xlu0 %v1220_v50  ;;  %v1775_v48 = vld [vmem:[%s2386_s10 + $0x30] sm:$0xff]  ;;  %v1774_v49 = vld [vmem:[%s2386_s10 + $0x28] sm:$0xff]  ;;  %v1773_v50 = vld [vmem:[%s2386_s10 + $0x20] sm:$0xff] }
 0xb70   : > { %1892 = vpow2.f32 %v1346_v3 }
 0xb73   : > { %v1343_v51 = vpop.xlane.xlu1 %1342 }
 0xb74   : > { %v1891_v53 = vpop.eup %1890  ;;  %v1345_v54 = vsub.f32 %v1336_v38, %v1343_v51 }
 0xb75   : > { %v1223_v55 = vsel %vm656_vm8, %v1891_v53, 0.0 }
 0xb76   : > { %v1893_v56 = vpop.eup %1892  ;;  %v1348_v57 = vmul.f32 1.442695, %v1345_v54  ;;  %1224 = vadd.xlane.f32.xlu0 %v1223_v55 }
 0xb77   : > { %v1350_v59 = vsel %vm656_vm8, %v1893_v56, 0.0 }
 0xb78   : > { %1894 = vpow2.f32 %v1348_v57  ;;  %1351 = vadd.xlane.f32.xlu2 %v1350_v59 }
 0xb7e   : > { %v1895_v60 = vpop.eup %1894 }
 0xb7f   : > { %v1353_v61 = vsel %vm656_vm8, %v1895_v60, 0.0 }
 0xb80   : > { %1354 = vadd.xlane.f32.xlu2 %v1353_v61 }
 0xb8a   : > { %1831 = vrot.lane.b32.xlu0 %v2238_v47, %s2399_s24  ;;  %v1750_v47 = vld [vmem:[%s2382_s6 + $0x30] sm:$0xff] }
 0xb8b   : > { %v1827_v58 = vpop.permute.xlu1 %1826 }
 0xb8c   : > { %v1828_v62 = vunpack.i.l.bf16 %v1827_v58  ;;  %v1829_v63 = vunpack.i.h.bf16 %v1827_v58 }
 0xb8e   : > { %1256 = vmatpush.msrb.mxu1 %v1828_v62 }
 0xb90   : > { %1257 = vmatpush.msrb.mxu1 %v1829_v63 }
 0xb92   : > { %1415 = vmatpush.msra.mxu1 %v1751_v21  ;;  %v1785_v21 = vld [vmem:[%s2388_s12 + $0x68] sm:$0xff] }
 0xb94   : > { %1416 = vmatpush.msra.mxu1 %v1750_v47  ;;  %v1784_v47 = vld [vmem:[%s2388_s12 + $0x60] sm:$0xff] }
 0xbe1   : > { %v1222_v0 = vpop.xlane.xlu0 %1221 }
 0xbe2   : > { %1896 = vrcp.f32 %v1222_v0 }
 0xbe8   : > { %v1897_v1 = vpop.eup %1896 }
 0xbe9   : > { %v1228_v2 = vmul.f32 %v1897_v1, %v1889_v46  ;;  %v1225_v4 = vpop.xlane.xlu0 %1224  ;;  %v1848_v1 = vld [vmem:[%s2384_s8 + $0x1] ss:$0 sm:$0xff] }
 0xbea   : > { %1898 = vrcp.f32 %v1225_v4 }
 0xbeb   : > { %1759 = vmatmul.msk.f32.vlgmr.msrb.gmra.mxu1 %vm656_vm8, %v1228_v2  ;;  %v1352_v8 = vpop.xlane.xlu2 %1351 }
 0xbec   : > { %1900 = vrcp.f32 %v1352_v8 }
 0xbf0   : > { %v1899_v6 = vpop.eup %1898 }
 0xbf1   : > { %v1229_v7 = vmul.f32 %v1899_v6, %v1891_v53  ;;  %v1849_v6 = vld [vmem:[%s2385_s9 + $0x1] ss:$0 sm:$0xff] }
 0xbf2   : > { %v1901_v13 = vpop.eup %1900 }
 0xbf3   : > { %1760 = vmatmul.msk.f32.gmra.mxu1 %vm656_vm8, %v1229_v7  ;;  %v1355_v11 = vpop.xlane.xlu2 %1354  ;;  %v1358_v17 = vmul.f32 %v1901_v13, %v1893_v56 }
 0xbf4   : > { %1902 = vrcp.f32 %v1355_v11 }
 0xbfa   : > { %v1903_v18 = vpop.eup %1902 }
 0xbfb   : > { %v1359_v19 = vmul.f32 %v1903_v18, %v1895_v60 }
 0xbfc   : > { %v1832_v12 = vpop.permute.xlu0 %1831 }
 0xbfd   : > { %v1833_v14 = vunpack.i.l.bf16 %v1832_v12  ;;  %v1834_v16 = vunpack.i.h.bf16 %v1832_v12 }
 0xbff   : > { %1386 = vmatpush.msra.mxu0 %v1833_v14 }
 0xc01   : > { %1387 = vmatpush.msra.mxu0 %v1834_v16 }
 0xc02   : > { %1767 = vmatmul.msk.f32.vlgmr.msra.gmra.mxu0 %vm656_vm8, %v1358_v17 }
 0xc0a   : > { %1768 = vmatmul.msk.f32.gmra.mxu0 %vm656_vm8, %v1359_v19  ;;  %v1787_v19 = vld [vmem:[%s2388_s12 + $0x78] sm:$0xff] }
 0xc0b   : > { %1571 = vmatpush.msra.mxu3 %v1787_v19 }
 0xc0d   : > { %1572 = vmatpush.msra.mxu3 %v1786_v20  ;;  %v1852_v20 = vld [vmem:[%s2390_s14 + $0x1] ss:$0 sm:$0xff] }
 0xc0f   : > { %1573 = vmatpush.msra.mxu3 %v1785_v21 }
 0xc11   : > { %1574 = vmatpush.msra.mxu3 %v1784_v47  ;;  %v1853_v47 = vld [vmem:[%s2391_s15 + $0x1] ss:$0 sm:$0xff] }
 0xc68   : > { %v1259_v22 = vpop.f32.mrf.mxu1 }
 0xc69   : > { %1761 = vmatmul.msk.f32.vlgmr.msrb.gmra.mxu2 %vm656_vm8, %v1259_v22  ;;  %v1783_v22 = vld [vmem:[%s2388_s12 + $0x58] sm:$0xff] }
 0xc6a   : > { %1575 = vmatpush.msra.mxu3 %v1783_v22 }
 0xc70   : > { %v1262_v23 = vpop.f32.mrf.mxu1 }
 0xc71   : > { %1762 = vmatmul.msk.f32.gmra.mxu2 %vm656_vm8, %v1262_v23  ;;  %v1782_v23 = vld [vmem:[%s2388_s12 + $0x50] sm:$0xff] }
 0xc72   : > { %1576 = vmatpush.msra.mxu3 %v1782_v23 }
 0xc7f   : > { %v1389_v24 = vpop.f32.mrf.mxu0 }
 0xc80   : > { %1769 = vmatmul.msk.f32.vlgmr.msra.gmra.mxu1 %vm656_vm8, %v1389_v24  ;;  %v1781_v24 = vld [vmem:[%s2388_s12 + $0x48] sm:$0xff] }
 0xc81   : > { %1577 = vmatpush.msra.mxu3 %v1781_v24 }
 0xc87   : > { %v1392_v52 = vpop.f32.mrf.mxu0 }
 0xc88   : > { %1770 = vmatmul.msk.f32.gmra.mxu1 %vm656_vm8, %v1392_v52  ;;  %v1780_v52 = vld [vmem:[%s2388_s12 + $0x40] sm:$0xff] }
 0xc89   : > { %1578 = vmatpush.msra.mxu3 %v1780_v52 }
 0xcec   : > { %v1288_v25 = vpop.f32.mrf.mxu2 }
 0xced   : > { %v1297_v27 = vadd.f32 %v1847_v26, %v1288_v25  ;;  %v1850_v25 = vld [vmem:[%s2387_s11 + $0x1] ss:$0 sm:$0xff] }
 0xcf4   : > { %v1291_v31 = vpop.f32.mrf.mxu2 }
 0xcf5   : > { %v1298_v33 = vadd.f32 %v1847_v26, %v1291_v31 }
 0xcfd   : > { %v1418_v28 = vpop.f32.mrf.mxu1 }
 0xcfe   : > { %v1424_v29 = vadd.f32 %v1418_v28, %v1297_v27 }
 0xd00   : > { %v1426_v30 = vadd.f32 %v1424_v29, %v2224_v9 }
 0xd02   : > { %v1432_v32 = vsel %vm540_vm0, %v1426_v30, 0.0 }
 0xd03   : > { %1433 = vadd.xlane.f32.xlu1 %v1432_v32 }
 0xd05   : > { %v1421_v34 = vpop.f32.mrf.mxu1 }
 0xd06   : > { %v1425_v35 = vadd.f32 %v1421_v34, %v1298_v33 }
 0xd08   : > { %v1427_v36 = vadd.f32 %v1425_v35, %v2228_v15  ;;  %v1776_v15 = vld [vmem:[%s2386_s10 + $0x38] sm:$0xff] }
 0xd09   : > { %1514 = vmatpush.msra.mxu2 %v1776_v15  ;;  %v1851_v15 = vld [vmem:[%s2389_s13 + $0x1] ss:$0 sm:$0xff] }
 0xd0a   : > { %v1435_v37 = vsel %vm540_vm0, %v1427_v36, 0.0 }
 0xd0b   : > { %1436 = vadd.xlane.f32.xlu2 %v1435_v37  ;;  %1515 = vmatpush.msra.mxu2 %v1775_v48 }
 0xd0d   : > { %1516 = vmatpush.msra.mxu2 %v1774_v49 }
 0xd0f   : > { %1517 = vmatpush.msra.mxu2 %v1773_v50 }
 0xd76   : > { %v1434_v38 = vpop.xlane.xlu1 %1433 }
 0xd77   : > { %v1438_v39 = vmul.f32 %v1434_v38, %v2037_v10 }
 0xd79   : > { %v1440_v40 = vsub.f32 %v1426_v30, %v1438_v39 }
 0xd7b   : > { %v1442_v41 = vmul.f32 %v1440_v40, %v1440_v40 }
 0xd7d   : > { %v1444_v42 = vsel %vm540_vm0, %v1442_v41, 0.0 }
 0xd7e   : > { %1445 = vadd.xlane.f32.xlu0 %v1444_v42  ;;  %v1437_v9 = vpop.xlane.xlu2 %1436 }
 0xd7f   : > { %v1439_v43 = vmul.f32 %v1437_v9, %v2037_v10 }
 0xd81   : > { %v1441_v44 = vsub.f32 %v1427_v36, %v1439_v43 }
 0xd83   : > { %v1443_v45 = vmul.f32 %v1441_v44, %v1441_v44 }
 0xd85   : > { %v1447_v46 = vsel %vm540_vm0, %v1443_v45, 0.0 }
 0xd86   : > { %1448 = vadd.xlane.f32.xlu2 %v1447_v46 }
 0xdf1   : > { %v1446_v3 = vpop.xlane.xlu0 %1445 }
 0xdf2   : > { %v1450_v51 = vmul.f32 %v1446_v3, %v2037_v10 }
 0xdf4   : > { %v1452_v53 = vadd.f32 1e-12, %v1450_v51 }
 0xdf6   : > { %1904 = vrsqrt.f32 %v1452_v53  ;;  %vm1460_vm8 = vweird.f32 %v1452_v53 }
 0xdf9   : > { %v1449_v54 = vpop.xlane.xlu2 %1448 }
 0xdfa   : > { %v1451_v55 = vmul.f32 %v1449_v54, %v2037_v10 }
 0xdfc   : > { %v1905_v56 = vpop.eup %1904  ;;  %v1453_v57 = vadd.f32 1e-12, %v1451_v55 }
 0xdfd   : > { %v1455_v59 = vmul.f32 %v1905_v56, %v1452_v53  ;;  %vm1461_vm7 = vweird.f32 %v1905_v56 }
 0xdfe   : > { %1906 = vrsqrt.f32 %v1453_v57  ;;  %vm1462_vm9 = vmor %vm1460_vm8, %vm1461_vm7  ;;  %vm1470_vm11 = vweird.f32 %v1453_v57 }
 0xdff   : > { %v1456_v60 = vmul.f32 %v1905_v56, %v1455_v59 }
 0xe01   : > { %v1457_v61 = vmul.f32 0.5, %v1456_v60 }
 0xe03   : > { %v1458_v58 = vsub.f32 1.5, %v1457_v61 }
 0xe04   : > { %v1907_v62 = vpop.eup %1906 }
 0xe05   : > { %v1459_v63 = vmul.f32 %v1905_v56, %v1458_v58  ;;  %v1465_v0 = vmul.f32 %v1907_v62, %v1453_v57  ;;  %vm1471_vm10 = vweird.f32 %v1907_v62 }
 0xe06   : > { %vm1472_vm12 = vmor %vm1470_vm11, %vm1471_vm10 }
 0xe07   : > { %v1463_v2 = vsel %vm1462_vm9, %v1905_v56, %v1459_v63  ;;  %v1466_v4 = vmul.f32 %v1907_v62, %v1465_v0 }
 0xe08   : > { %v1474_v5 = vmul.f32 %v1463_v2, %v1440_v40 }
 0xe09   : > { %v1467_v7 = vmul.f32 0.5, %v1466_v4 }
 0xe0a   : > { %v1479_v8 = vmul.f32 %v1848_v1, %v1474_v5 }
 0xe0b   : > { %v1468_v11 = vsub.f32 1.5, %v1467_v7 }
 0xe0c   : > { %v1484_v12 = vadd.f32 %v1849_v6, %v1479_v8 }
 0xe0d   : > { %v1469_v13 = vmul.f32 %v1907_v62, %v1468_v11 }
 0xe0e   : > { %1778 = vmatmul.msk.f32.vlgmr.msra.gmra.mxu2 %vm540_vm0, %v1484_v12 }
 0xe0f   : > { %v1473_v14 = vsel %vm1472_vm12, %v1907_v62, %v1469_v13 }
 0xe10   : > { %v1475_v16 = vmul.f32 %v1473_v14, %v1441_v44 }
 0xe12   : > { %v1480_v17 = vmul.f32 %v1848_v1, %v1475_v16 }
 0xe14   : > { %v1485_v18 = vadd.f32 %v1849_v6, %v1480_v17 }
 0xe16   : > { %1779 = vmatmul.msk.f32.gmra.mxu2 %vm540_vm0, %v1485_v18 }
 0xe91   : > { %v1519_v26 = vpop.f32.mrf.mxu2 }
 0xe92   : > { %v1520_v27 = vadd.f32 %v1850_v25, %v1519_v26 }
 0xe94   : > { %v1527_v28 = vmul.f32 0.044715, %v1520_v27  ;;  %v1525_v41 = vmul.f32 0.5, %v1520_v27 }
 0xe96   : > { %v1529_v29 = vmul.f32 %v1527_v28, %v1520_v27 }
 0xe98   : > { %v1531_v30 = vmul.f32 %v1529_v29, %v1520_v27 }
 0xe99   : > { %v1522_v31 = vpop.f32.mrf.mxu2 }
 0xe9a   : > { %v1533_v32 = vadd.f32 %v1531_v30, %v1520_v27  ;;  %v1523_v33 = vadd.f32 %v1850_v25, %v1522_v31 }
 0xe9c   : > { %v1535_v34 = vmul.f32 0.7978846, %v1533_v32  ;;  %v1528_v35 = vmul.f32 0.044715, %v1523_v33  ;;  %v1526_v44 = vmul.f32 0.5, %v1523_v33 }
 0xe9e   : > { %1908 = vtanh.f32 %v1535_v34  ;;  %v1530_v36 = vmul.f32 %v1528_v35, %v1523_v33 }
 0xea0   : > { %v1532_v37 = vmul.f32 %v1530_v36, %v1523_v33 }
 0xea2   : > { %v1534_v38 = vadd.f32 %v1532_v37, %v1523_v33 }
 0xea4   : > { %v1909_v39 = vpop.eup %1908  ;;  %v1536_v40 = vmul.f32 0.7978846, %v1534_v38 }
 0xea5   : > { %v1539_v42 = vadd.f32 1.0, %v1909_v39 }
 0xea6   : > { %1910 = vtanh.f32 %v1536_v40 }
 0xea7   : > { %v1541_v9 = vmul.f32 %v1539_v42, %v1525_v41 }
 0xea9   : > { %1789 = vmatmul.msk.f32.vlgmr.msra.gmra.mxu3 %vm1033_vm15, %v1541_v9 }
 0xeac   : > { %v1911_v43 = vpop.eup %1910 }
 0xead   : > { %v1540_v45 = vadd.f32 1.0, %v1911_v43 }
 0xeaf   : > { %v1542_v46 = vmul.f32 %v1540_v45, %v1526_v44 }
 0xeb1   : > { %1790 = vmatmul.msk.f32.gmra.mxu3 %vm1033_vm15, %v1542_v46 }
 0xf2c   : > { %v1580_v48 = vpop.f32.mrf.mxu3 }
 0xf2d   : > { %v1581_v49 = vadd.f32 %v1851_v15, %v1580_v48 }
 0xf2f   : > { %v1586_v50 = vadd.f32 %v1581_v49, %v1484_v12 }
 0xf31   : > { %v1592_v3 = vsel %vm540_vm0, %v1586_v50, 0.0 }
 0xf32   : > { %1593 = vadd.xlane.f32.xlu2 %v1592_v3 }
 0xf34   : > { %v1583_v51 = vpop.f32.mrf.mxu3 }
 0xf35   : > { %v1584_v53 = vadd.f32 %v1851_v15, %v1583_v51 }
 0xf37   : > { %v1587_v54 = vadd.f32 %v1584_v53, %v1485_v18 }
 0xf39   : > { %v1595_v55 = vsel %vm540_vm0, %v1587_v54, 0.0 }
 0xf3a   : > { %1596 = vadd.xlane.f32.xlu2 %v1595_v55 }
 0xfa5   : > { %v1594_v56 = vpop.xlane.xlu2 %1593 }
 0xfa6   : > { %v1598_v57 = vmul.f32 %v1594_v56, %v2037_v10 }
 0xfa8   : > { %v1600_v59 = vsub.f32 %v1586_v50, %v1598_v57 }
 0xfaa   : > { %v1602_v60 = vmul.f32 %v1600_v59, %v1600_v59 }
 0xfac   : > { %v1604_v61 = vsel %vm540_vm0, %v1602_v60, 0.0 }
 0xfad   : > { %1605 = vadd.xlane.f32.xlu2 %v1604_v61  ;;  %v1597_v58 = vpop.xlane.xlu2 %1596 }
 0xfae   : > { %v1599_v62 = vmul.f32 %v1597_v58, %v2037_v10 }
 0xfb0   : > { %v1601_v63 = vsub.f32 %v1587_v54, %v1599_v62 }
 0xfb2   : > { %v1603_v0 = vmul.f32 %v1601_v63, %v1601_v63 }
 0xfb4   : > { %v1607_v1 = vsel %vm540_vm0, %v1603_v0, 0.0 }
 0xfb5   : > { %1608 = vadd.xlane.f32.xlu1 %v1607_v1 }
0x1020   : > { %v1606_v2 = vpop.xlane.xlu2 %1605 }
0x1021   : > { %v1610_v4 = vmul.f32 %v1606_v2, %v2037_v10 }
0x1023   : > { %v1612_v5 = vadd.f32 1e-12, %v1610_v4 }
0x1025   : > { %1912 = vrsqrt.f32 %v1612_v5  ;;  %vm1620_vm14 = vweird.f32 %v1612_v5 }
0x1028   : > { %v1609_v6 = vpop.xlane.xlu1 %1608 }
0x1029   : > { %v1611_v7 = vmul.f32 %v1609_v6, %v2037_v10 }
0x102b   : > { %v1913_v8 = vpop.eup %1912  ;;  %v1613_v11 = vadd.f32 1e-12, %v1611_v7 }
0x102c   : > { %v1615_v12 = vmul.f32 %v1913_v8, %v1612_v5  ;;  %vm1621_vm13 = vweird.f32 %v1913_v8 }
0x102d   : > { %1914 = vrsqrt.f32 %v1613_v11  ;;  %vm1622_vm15 = vmor %vm1620_vm14, %vm1621_vm13  ;;  %vm1630_vm2 = vweird.f32 %v1613_v11 }
0x102e   : > { %v1616_v13 = vmul.f32 %v1913_v8, %v1615_v12 }
0x1030   : > { %v1617_v14 = vmul.f32 0.5, %v1616_v13 }
0x1032   : > { %v1618_v16 = vsub.f32 1.5, %v1617_v14 }
0x1033   : > { %v1915_v17 = vpop.eup %1914 }
0x1034   : > { %v1619_v18 = vmul.f32 %v1913_v8, %v1618_v16  ;;  %v1625_v19 = vmul.f32 %v1915_v17, %v1613_v11  ;;  %vm1631_vm1 = vweird.f32 %v1915_v17 }
0x1035   : > { %vm1632_vm3 = vmor %vm1630_vm2, %vm1631_vm1 }
0x1036   : > { %v1623_v21 = vsel %vm1622_vm15, %v1913_v8, %v1619_v18  ;;  %v1626_v10 = vmul.f32 %v1915_v17, %v1625_v19 }
0x1037   : > { %v1634_v22 = vmul.f32 %v1623_v21, %v1600_v59 }
0x1038   : > { %v1627_v23 = vmul.f32 0.5, %v1626_v10 }
0x1039   : > { %v1639_v24 = vmul.f32 %v1852_v20, %v1634_v22 }
0x103a   : > { %v1628_v52 = vsub.f32 1.5, %v1627_v23 }
0x103b   : > { %v1644_v25 = vadd.f32 %v1853_v47, %v1639_v24 }
0x103c   : > { %v1629_v26 = vmul.f32 %v1915_v17, %v1628_v52 }
0x103d   : > { %1646 = vst.msk [vmem:[%s535_s30] sm:$0xff] %vm540_vm0, %v1644_v25 }
0x103e   : > { %v1633_v27 = vsel %vm1632_vm3, %v1915_v17, %v1629_v26 }
0x103f   : > { %v1635_v28 = vmul.f32 %v1633_v27, %v1601_v63 }
0x1041   : > { %v1640_v29 = vmul.f32 %v1852_v20, %v1635_v28 }
0x1043   : > { %v1645_v30 = vadd.f32 %v1853_v47, %v1640_v29 }
0x1045   : > { %1647 = vst.msk [vmem:[%s535_s30 + $0x8] sm:$0xff] %vm540_vm0, %v1645_v30 }
0x1046 PF: > { %s26_s21 = sadd.s32 1, %s1922_s21  }
0x1047   : > { %p23_p4 = scmp.ge.s32.totalorder %s26_s21, 4  }
0x1049   :  { %25 = sbr.rel (!%p23_p4) target bundleno = 2 (0x2), region = 129 }

</bundles_post_ra>
